<compile_context>
chip_gen: v6e
topology: v6e:2x2x1
jax: 0.10.0
libtpu: 0.0.40
codegen_flags: <defaults>
</compile_context>

<pallas_src>
import math
import numpy as np
import jax
import jax.numpy as jnp
from jax.experimental import pallas as pl
from jax.experimental.pallas import tpu as pltpu

# ----- small, module-consistent sizes -----
B, CF, HF, WF = 2, 256, 8, 8      # backbone feature map (stand-in for the 2048-ch layer4 output)
HID = 128                         # stand-in for hidden_dim = 512
K = 8                             # stand-in for K = 50 reparameterization samples
ZOOM = 8                          # zoom_factor
P = B * HF * WF                   # 128 flattened pixels -> lane axis inside the kernel
HPAD = 8                          # padded head count (mean, logvar, folded pred, 5x zero)
OUTH = OUTW = (HF - 1) * ZOOM + 1 # 57 -- F.interpolate(align_corners=True) output size
OUTPIX = OUTH * OUTW              # 3249
OUTPAD = ((OUTPIX + 127) // 128) * 128   # 3328 -- per-batch lane-padded output pixel count
OUT_LANES = B * OUTPAD            # 6656 -- lane-dense packed output width
EPS = 1e-12


# ---------------- fused Pallas kernel ----------------

def fused_kernel(x_ref, wp_ref, bnb_ref, wh_ref, epsx_ref, epsk_ref, w2d_ref,
                 bpred_ref, out_ref, maps_scr):
    # input_proj: 1x1 conv (BN eval-scale pre-folded into wp) + BN shift + ReLU.  [HID, P]
    # (Dropout2d = identity in eval.)
    feat = jnp.dot(wp_ref[...], x_ref[...], preferred_element_type=jnp.float32)
    feat = jnp.maximum(feat + bnb_ref[...], 0.0)

    # stacked small heads in one matmul: row0=mean_conv, row1=std_conv, row2=wc@wpred
    heads = jnp.dot(wh_ref[...], feat, preferred_element_type=jnp.float32)   # [HPAD, P]
    mu = heads[0:1, :]                                                        # [1, P]
    logvar = heads[1:2, :]                                                    # [1, P]
    pred_pre = heads[2:3, :]                                                  # [1, P]

    std = jnp.exp(0.5 * logvar)
    # prob_x = reparameterize(mu, logvar, k=1)   (no sigmoid)
    prob_x = epsx_ref[...] * std + mu                                         # [1, P]
    # prob_out2 = sigmoid(reparameterize(mu, logvar, k=K)) -> stats over the K samples
    p2 = jax.nn.sigmoid(epsk_ref[...] * std + mu)                             # [K, P]
    m3 = jnp.mean(p2, axis=0, keepdims=True)                                  # [1, P]
    # torch .var(dim=1) default is unbiased -> divide by K-1
    var3 = jnp.sum((p2 - m3) ** 2, axis=0, keepdims=True) * (1.0 / (K - 1))   # [1, P]

    # uncertainty = var3; global min/max normalization (whole pixel set is resident:
    # grid=(1,); any future tiling of P must turn this into a two-pass reduction)
    umin = jnp.min(var3)
    umax = jnp.max(var3)
    inv_u = 1.0 / jnp.maximum(umax - umin, EPS)
    u_norm = (var3 - umin) * inv_u

    # pred(Conv1x1) applied to the gated residual, algebraically folded:
    #   ((1-u) * (feat @ wc)) @ wpred + b == (1-u) * (feat @ (wc @ wpred)) + b
    pred = (1.0 - u_norm) * pred_pre + bpred_ref[0, 0]                        # [1, P]

    # direct per-row stores of the low-res maps (no sublane concat, no zero rows)
    maps_scr[0:1, :] = prob_x
    maps_scr[1:2, :] = pred
    maps_scr[2:3, :] = m3
    maps_scr[3:4, :] = var3

    # fused bilinear align_corners=True upsample of all four maps: ONE lane-dense
    # matmul with the batch-block-diagonal kron(Wy, Wx) matrix (no in-kernel reshape).
    up = jnp.dot(maps_scr[...], w2d_ref[...], preferred_element_type=jnp.float32)  # [4, OUT_LANES]

    # final per-map post-ops + direct lane-dense row stores (OUT_LANES % 128 == 0)
    out_ref[0:1, :] = up[0:1, :]                       # prob_x, upsampled
    out_ref[1:2, :] = jax.nn.sigmoid(up[1:2, :])       # sigmoid(pred), upsampled
    out_ref[2:3, :] = up[2:3, :]                       # mean3, upsampled
    # std3 normalization: with align_corners=True and integer zoom the original grid
    # points appear verbatim in the upsampled map, so min/max(upsampled) == umin/umax.
    out_ref[3:4, :] = (up[3:4, :] - umin) * inv_u      # normalized std3, upsampled


def run_fused(xT, wpT, bnbT, whT, eps_xT, eps_kT, w2d, bpred):
    return pl.pallas_call(
        fused_kernel,
        out_shape=jax.ShapeDtypeStruct((4, OUT_LANES), jnp.float32),
        grid_spec=pltpu.PrefetchScalarGridSpec(
            num_scalar_prefetch=0, grid=(1,),
            in_specs=[pl.BlockSpec((CF, P), lambda i: (0, 0)),
                      pl.BlockSpec((HID, CF), lambda i: (0, 0)),
                      pl.BlockSpec((HID, 1), lambda i: (0, 0)),
                      pl.BlockSpec((HPAD, HID), lambda i: (0, 0)),
                      pl.BlockSpec((1, P), lambda i: (0, 0)),
                      pl.BlockSpec((K, P), lambda i: (0, 0)),
                      pl.BlockSpec((P, OUT_LANES), lambda i: (0, 0)),
                      pl.BlockSpec(memory_space=pltpu.MemorySpace.SMEM)],
            out_specs=pl.BlockSpec((4, OUT_LANES), lambda i: (0, 0)),
            scratch_shapes=[pltpu.VMEM((4, P), jnp.float32)]),
        compiler_params=pltpu.CompilerParams(
            dimension_semantics=("arbitrary",),
            vmem_limit_bytes=32 * 1024 * 1024),
    )(xT, wpT, bnbT, whT, eps_xT, eps_kT, w2d, bpred)


# ---------------- JAX glue (trace-time layout / weight folding only) ----------------

def to_flat(x_nchw):
    # NCHW -> [P, C] with pixel index ((b*H + h)*W + w)
    return jnp.transpose(x_nchw, (0, 2, 3, 1)).reshape(P, -1)


def _interp_matrix(in_size, out_size):
    # F.interpolate(mode='bilinear', align_corners=True), one axis, as a dense [out, in] matrix
    if in_size == 1:
        return np.ones((out_size, 1), np.float32)
    pos = np.linspace(0.0, in_size - 1.0, out_size)
    i0 = np.clip(np.floor(pos).astype(np.int64), 0, in_size - 2)
    frac = (pos - i0).astype(np.float32)
    w = np.zeros((out_size, in_size), np.float32)
    rows = np.arange(out_size)
    w[rows, i0] += 1.0 - frac
    w[rows, i0 + 1] += frac
    return w


def _upsample_matrix():
    # Full 2-D bilinear upsample as one right-matmul matrix, block-diagonal over batch:
    #   W2D[(b*HF+hf)*WF+wf, b*OUTPAD + oh*OUTW+ow] = Wy[oh,hf] * Wx[ow,wf]
    # Padding columns (OUTPIX..OUTPAD-1 per batch) are zero and are sliced off outside.
    wy = _interp_matrix(HF, OUTH)                    # [57, 8]
    wx = _interp_matrix(WF, OUTW)                    # [57, 8]
    k2d = np.kron(wy, wx)                            # [OUTPIX, HF*WF]
    k2d_pad = np.zeros((OUTPAD, HF * WF), np.float32)
    k2d_pad[:OUTPIX] = k2d
    w2d = np.zeros((P, OUT_LANES), np.float32)
    for b in range(B):
        w2d[b * HF * WF:(b + 1) * HF * WF, b * OUTPAD:(b + 1) * OUTPAD] = k2d_pad.T
    return w2d


def forward_eval(x_feat, params, eps_x, eps_k):
    # ---- trace-time weight folding / layout prep (one-off, outside the kernel) ----
    wp_folded = params["wp"] * params["bn_scale"]                    # fold BN eval-scale into conv
    wpT = jnp.transpose(wp_folded)                                   # [HID, CF]  (f32)
    bnbT = jnp.transpose(params["bn_shift"])                         # [HID, 1]
    wcp = params["wc"] @ params["wpred"]                             # [HID, 1]  conv -> pred fold
    whT = jnp.concatenate([jnp.transpose(params["wms"]),             # mean_conv, std_conv
                           jnp.transpose(wcp),                       # folded pred head
                           jnp.zeros((HPAD - 3, HID), jnp.float32)],
                          axis=0)                                    # [HPAD, HID]
    xT = jnp.transpose(to_flat(x_feat))                              # [CF, P]
    w2d = jnp.asarray(_upsample_matrix())                            # [P, OUT_LANES] constant
    bpred = params["bpred"].reshape(1, 1)

    packed = run_fused(xT, wpT, bnbT, whT, jnp.transpose(eps_x),
                       jnp.transpose(eps_k), w2d, bpred)             # [4, OUT_LANES]

    # rows: 0=prob_x, 1=sigmoid(pred), 2=mean3, 3=normalized std3 -- already upsampled
    maps = packed.reshape(4, B, OUTPAD)[:, :, :OUTPIX].reshape(4, B, 1, OUTH, OUTW)
    out, std3_norm, mean3_up, prob_x_up = maps[1], maps[3], maps[2], maps[0]
    return out, std3_norm, mean3_up, prob_x_up


if __name__ == "__main__":
    key = jax.random.PRNGKey(0)
    ks = jax.random.split(key, 12)

    params = {
        "wp": jax.random.normal(ks[0], (CF, HID), jnp.float32) * (1.0 / math.sqrt(CF)),
        "bn_scale": 1.0 + 0.1 * jax.random.normal(ks[1], (1, HID), jnp.float32),
        "bn_shift": 0.1 * jax.random.normal(ks[2], (1, HID), jnp.float32),
        "wc": jax.random.normal(ks[3], (HID, HID), jnp.float32) * (1.0 / math.sqrt(HID)),
        "wms": jnp.concatenate(
            [jax.random.normal(ks[4], (HID, 1), jnp.float32) * (1.0 / math.sqrt(HID)),
             jax.random.normal(ks[5], (HID, 1), jnp.float32) * (1.0 / math.sqrt(HID))],
            axis=1),
        "wpred": jax.random.normal(ks[6], (HID, 1), jnp.float32) * (1.0 / math.sqrt(HID)),
        "bpred": 0.1 * jax.random.normal(ks[7], (1, 1), jnp.float32),
    }

    x_feat = jax.random.normal(ks[8], (B, CF, HF, WF), jnp.float32)
    eps_x = jax.random.normal(ks[9], (P, 1), jnp.float32)
    eps_k = jax.random.normal(ks[10], (P, K), jnp.float32)

    out, std3_norm, mean3_up, prob_x_up = jax.jit(forward_eval)(x_feat, params, eps_x, eps_k)
    jax.block_until_ready((out, std3_norm, mean3_up, prob_x_up))

    assert out.shape == (B, 1, OUTH, OUTW)
    assert std3_norm.shape == (B, 1, OUTH, OUTW)
    assert mean3_up.shape == (B, 1, OUTH, OUTW)
    # mirror the torch asserts on finiteness
    assert bool(jnp.all(jnp.isfinite(prob_x_up)))
    assert bool(jnp.all(jnp.isfinite(out)))
    assert bool(jnp.all(jnp.isfinite(std3_norm)))
    print("KERNEL_OK")
</pallas_src>

<mosaic_0001>
module attributes {stable_mosaic.version = 11 : i64} {
  func.func @fused_kernel(%arg0: i32, %arg1: memref<256x128xf32, #tpu.memory_space<vmem>>, %arg2: memref<128x256xf32, #tpu.memory_space<vmem>>, %arg3: memref<128x1xf32, #tpu.memory_space<vmem>>, %arg4: memref<8x128xf32, #tpu.memory_space<vmem>>, %arg5: memref<1x128xf32, #tpu.memory_space<vmem>>, %arg6: memref<8x128xf32, #tpu.memory_space<vmem>>, %arg7: memref<128x6656xf32, #tpu.memory_space<vmem>>, %arg8: memref<1x1xf32, #tpu.memory_space<smem>>, %arg9: memref<4x6656xf32, #tpu.memory_space<vmem>>, %arg10: memref<4x128xf32, #tpu.memory_space<vmem>>) attributes {dimension_semantics = [#tpu.dimension_semantics<arbitrary>], iteration_bounds = array<i64: 1>, scalar_prefetch = 0 : i64, scratch_operands = 1 : i64, tpu.core_type = #tpu.core_type<tc>, window_params = [{pipeline_mode = #tpu.pipeline_mode<synchronous>, transform_indices = @transform_0, window_bounds = array<i64: 256, 128>}, {pipeline_mode = #tpu.pipeline_mode<synchronous>, transform_indices = @transform_1, window_bounds = array<i64: 128, 256>}, {pipeline_mode = #tpu.pipeline_mode<synchronous>, transform_indices = @transform_2, window_bounds = array<i64: 128, 1>}, {pipeline_mode = #tpu.pipeline_mode<synchronous>, transform_indices = @transform_3, window_bounds = array<i64: 8, 128>}, {pipeline_mode = #tpu.pipeline_mode<synchronous>, transform_indices = @transform_4, window_bounds = array<i64: 1, 128>}, {pipeline_mode = #tpu.pipeline_mode<synchronous>, transform_indices = @transform_5, window_bounds = array<i64: 8, 128>}, {pipeline_mode = #tpu.pipeline_mode<synchronous>, transform_indices = @transform_6, window_bounds = array<i64: 128, 6656>}, {transform_indices = @transform_7, window_bounds = array<i64: 1, 1>}, {pipeline_mode = #tpu.pipeline_mode<synchronous>, transform_indices = @transform_8, window_bounds = array<i64: 4, 6656>}]} {
    %c0 = arith.constant 0 : index
    %c0_0 = arith.constant 0 : index
    %0 = vector.load %arg2[%c0, %c0_0] : memref<128x256xf32, #tpu.memory_space<vmem>>, vector<128x256xf32>
    %c0_1 = arith.constant 0 : index
    %c0_2 = arith.constant 0 : index
    %1 = vector.load %arg1[%c0_1, %c0_2] : memref<256x128xf32, #tpu.memory_space<vmem>>, vector<256x128xf32>
    %cst = arith.constant dense<0.000000e+00> : vector<128x128xf32>
    %2 = tpu.matmul %0, %1, %cst {dimension_numbers = #tpu.dot_dimension_numbers<[1], [0], [0], [1], [0, 0, 1, 1], [], []>} : vector<128x256xf32>, vector<256x128xf32>, vector<128x128xf32> -> vector<128x128xf32>
    %c0_3 = arith.constant 0 : index
    %c0_4 = arith.constant 0 : index
    %3 = vector.load %arg3[%c0_3, %c0_4] : memref<128x1xf32, #tpu.memory_space<vmem>>, vector<128x1xf32>
    %4 = vector.broadcast %3 : vector<128x1xf32> to vector<128x128xf32>
    %5 = arith.addf %2, %4 : vector<128x128xf32>
    %cst_5 = arith.constant 0.000000e+00 : f32
    %6 = vector.broadcast %cst_5 : f32 to vector<128x128xf32>
    %7 = arith.maximumf %5, %6 : vector<128x128xf32>
    %c0_6 = arith.constant 0 : index
    %c0_7 = arith.constant 0 : index
    %8 = vector.load %arg4[%c0_6, %c0_7] : memref<8x128xf32, #tpu.memory_space<vmem>>, vector<8x128xf32>
    %cst_8 = arith.constant dense<0.000000e+00> : vector<8x128xf32>
    %9 = tpu.matmul %8, %7, %cst_8 {dimension_numbers = #tpu.dot_dimension_numbers<[1], [0], [0], [1], [0, 0, 1, 1], [], []>} : vector<8x128xf32>, vector<128x128xf32>, vector<8x128xf32> -> vector<8x128xf32>
    %10 = vector.extract_strided_slice %9 {offsets = [0, 0], sizes = [1, 128], strides = [1, 1]} : vector<8x128xf32> to vector<1x128xf32>
    %11 = vector.extract_strided_slice %9 {offsets = [1, 0], sizes = [1, 128], strides = [1, 1]} : vector<8x128xf32> to vector<1x128xf32>
    %12 = vector.extract_strided_slice %9 {offsets = [2, 0], sizes = [1, 128], strides = [1, 1]} : vector<8x128xf32> to vector<1x128xf32>
    %cst_9 = arith.constant 5.000000e-01 : f32
    %13 = vector.broadcast %cst_9 : f32 to vector<1x128xf32>
    %14 = arith.mulf %13, %11 : vector<1x128xf32>
    %15 = math.exp %14 : vector<1x128xf32>
    %c0_10 = arith.constant 0 : index
    %c0_11 = arith.constant 0 : index
    %16 = vector.load %arg5[%c0_10, %c0_11] : memref<1x128xf32, #tpu.memory_space<vmem>>, vector<1x128xf32>
    %17 = arith.mulf %16, %15 : vector<1x128xf32>
    %18 = arith.addf %17, %10 : vector<1x128xf32>
    %c0_12 = arith.constant 0 : index
    %c0_13 = arith.constant 0 : index
    %19 = vector.load %arg6[%c0_12, %c0_13] : memref<8x128xf32, #tpu.memory_space<vmem>>, vector<8x128xf32>
    %20 = vector.broadcast %15 : vector<1x128xf32> to vector<8x128xf32>
    %21 = arith.mulf %19, %20 : vector<8x128xf32>
    %22 = vector.broadcast %10 : vector<1x128xf32> to vector<8x128xf32>
    %23 = arith.addf %21, %22 : vector<8x128xf32>
    %24 = arith.negf %23 : vector<8x128xf32>
    %25 = math.exp %24 : vector<8x128xf32>
    %cst_14 = arith.constant 1.000000e+00 : f32
    %26 = vector.broadcast %cst_14 : f32 to vector<8x128xf32>
    %27 = arith.addf %26, %25 : vector<8x128xf32>
    %28 = arith.divf %26, %27 : vector<8x128xf32>
    %cst_15 = arith.constant dense<0.000000e+00> : vector<128xf32>
    %29 = vector.multi_reduction <add>, %28, %cst_15 [0] : vector<8x128xf32> to vector<128xf32>
    %30 = vector.shape_cast %29 : vector<128xf32> to vector<1x128xf32>
    %cst_16 = arith.constant 8.000000e+00 : f32
    %31 = vector.broadcast %cst_16 : f32 to vector<1x128xf32>
    %32 = arith.divf %30, %31 : vector<1x128xf32>
    %33 = vector.broadcast %32 : vector<1x128xf32> to vector<8x128xf32>
    %34 = arith.subf %28, %33 : vector<8x128xf32>
    %35 = arith.mulf %34, %34 : vector<8x128xf32>
    %cst_17 = arith.constant dense<0.000000e+00> : vector<128xf32>
    %36 = vector.multi_reduction <add>, %35, %cst_17 [0] : vector<8x128xf32> to vector<128xf32>
    %37 = vector.shape_cast %36 : vector<128xf32> to vector<1x128xf32>
    %cst_18 = arith.constant 0.142857149 : f32
    %38 = vector.broadcast %cst_18 : f32 to vector<1x128xf32>
    %39 = arith.mulf %37, %38 : vector<1x128xf32>
    %40 = vector.shape_cast %39 : vector<1x128xf32> to vector<1x1x128xf32>
    %cst_19 = arith.constant dense<0x7F800000> : vector<1xf32>
    %41 = vector.multi_reduction <minimumf>, %40, %cst_19 [1, 2] : vector<1x1x128xf32> to vector<1xf32>
    %42 = vector.shape_cast %41 : vector<1xf32> to vector<1x1x1xf32>
    %43 = vector.extract %42[0, 0, 0] : f32 from vector<1x1x1xf32>
    %44 = vector.shape_cast %39 : vector<1x128xf32> to vector<1x1x128xf32>
    %cst_20 = arith.constant dense<0xFF800000> : vector<1xf32>
    %45 = vector.multi_reduction <maximumf>, %44, %cst_20 [1, 2] : vector<1x1x128xf32> to vector<1xf32>
    %46 = vector.shape_cast %45 : vector<1xf32> to vector<1x1x1xf32>
    %47 = vector.extract %46[0, 0, 0] : f32 from vector<1x1x1xf32>
    %48 = arith.subf %47, %43 : f32
    %cst_21 = arith.constant 9.99999996E-13 : f32
    %49 = arith.maximumf %48, %cst_21 : f32
    %cst_22 = arith.constant 1.000000e+00 : f32
    %50 = arith.divf %cst_22, %49 : f32
    %51 = vector.broadcast %43 : f32 to vector<1x128xf32>
    %52 = arith.subf %39, %51 : vector<1x128xf32>
    %53 = vector.broadcast %50 : f32 to vector<1x128xf32>
    %54 = arith.mulf %52, %53 : vector<1x128xf32>
    %cst_23 = arith.constant 1.000000e+00 : f32
    %55 = vector.broadcast %cst_23 : f32 to vector<1x128xf32>
    %56 = arith.subf %55, %54 : vector<1x128xf32>
    %57 = arith.mulf %56, %12 : vector<1x128xf32>
    %c0_24 = arith.constant 0 : index
    %c0_25 = arith.constant 0 : index
    %58 = memref.load %arg8[%c0_24, %c0_25] : memref<1x1xf32, #tpu.memory_space<smem>>
    %59 = vector.broadcast %58 : f32 to vector<1x128xf32>
    %60 = arith.addf %57, %59 : vector<1x128xf32>
    %c0_26 = arith.constant 0 : index
    %c0_27 = arith.constant 0 : index
    %61 = vector.load %arg10[%c0_26, %c0_27] : memref<4x128xf32, #tpu.memory_space<vmem>>, vector<1x128xf32>
    tpu.vector_store %arg10[%c0_26, %c0_27], %18 {strides = array<i32>} : memref<4x128xf32, #tpu.memory_space<vmem>>, vector<1x128xf32>,
    %c1 = arith.constant 1 : index
    %c0_28 = arith.constant 0 : index
    %62 = vector.load %arg10[%c1, %c0_28] : memref<4x128xf32, #tpu.memory_space<vmem>>, vector<1x128xf32>
    tpu.vector_store %arg10[%c1, %c0_28], %60 {strides = array<i32>} : memref<4x128xf32, #tpu.memory_space<vmem>>, vector<1x128xf32>,
    %c2 = arith.constant 2 : index
    %c0_29 = arith.constant 0 : index
    %63 = vector.load %arg10[%c2, %c0_29] : memref<4x128xf32, #tpu.memory_space<vmem>>, vector<1x128xf32>
    tpu.vector_store %arg10[%c2, %c0_29], %32 {strides = array<i32>} : memref<4x128xf32, #tpu.memory_space<vmem>>, vector<1x128xf32>,
    %c3 = arith.constant 3 : index
    %c0_30 = arith.constant 0 : index
    %64 = vector.load %arg10[%c3, %c0_30] : memref<4x128xf32, #tpu.memory_space<vmem>>, vector<1x128xf32>
    tpu.vector_store %arg10[%c3, %c0_30], %39 {strides = array<i32>} : memref<4x128xf32, #tpu.memory_space<vmem>>, vector<1x128xf32>,
    %c0_31 = arith.constant 0 : index
    %c0_32 = arith.constant 0 : index
    %65 = vector.load %arg10[%c0_31, %c0_32] : memref<4x128xf32, #tpu.memory_space<vmem>>, vector<4x128xf32>
    %c0_33 = arith.constant 0 : index
    %c0_34 = arith.constant 0 : index
    %66 = vector.load %arg7[%c0_33, %c0_34] : memref<128x6656xf32, #tpu.memory_space<vmem>>, vector<128x6656xf32>
    %cst_35 = arith.constant dense<0.000000e+00> : vector<4x6656xf32>
    %67 = tpu.matmul %65, %66, %cst_35 {dimension_numbers = #tpu.dot_dimension_numbers<[1], [0], [0], [1], [0, 0, 1, 1], [], []>} : vector<4x128xf32>, vector<128x6656xf32>, vector<4x6656xf32> -> vector<4x6656xf32>
    %68 = vector.extract_strided_slice %67 {offsets = [0, 0], sizes = [1, 6656], strides = [1, 1]} : vector<4x6656xf32> to vector<1x6656xf32>
    %c0_36 = arith.constant 0 : index
    %c0_37 = arith.constant 0 : index
    %69 = vector.load %arg9[%c0_36, %c0_37] : memref<4x6656xf32, #tpu.memory_space<vmem>>, vector<1x6656xf32>
    tpu.vector_store %arg9[%c0_36, %c0_37], %68 {strides = array<i32>} : memref<4x6656xf32, #tpu.memory_space<vmem>>, vector<1x6656xf32>,
    %70 = vector.extract_strided_slice %67 {offsets = [1, 0], sizes = [1, 6656], strides = [1, 1]} : vector<4x6656xf32> to vector<1x6656xf32>
    %71 = arith.negf %70 : vector<1x6656xf32>
    %72 = math.exp %71 : vector<1x6656xf32>
    %cst_38 = arith.constant 1.000000e+00 : f32
    %73 = vector.broadcast %cst_38 : f32 to vector<1x6656xf32>
    %74 = arith.addf %73, %72 : vector<1x6656xf32>
    %75 = arith.divf %73, %74 : vector<1x6656xf32>
    %c1_39 = arith.constant 1 : index
    %c0_40 = arith.constant 0 : index
    %76 = vector.load %arg9[%c1_39, %c0_40] : memref<4x6656xf32, #tpu.memory_space<vmem>>, vector<1x6656xf32>
    tpu.vector_store %arg9[%c1_39, %c0_40], %75 {strides = array<i32>} : memref<4x6656xf32, #tpu.memory_space<vmem>>, vector<1x6656xf32>,
    %77 = vector.extract_strided_slice %67 {offsets = [2, 0], sizes = [1, 6656], strides = [1, 1]} : vector<4x6656xf32> to vector<1x6656xf32>
    %c2_41 = arith.constant 2 : index
    %c0_42 = arith.constant 0 : index
    %78 = vector.load %arg9[%c2_41, %c0_42] : memref<4x6656xf32, #tpu.memory_space<vmem>>, vector<1x6656xf32>
    tpu.vector_store %arg9[%c2_41, %c0_42], %77 {strides = array<i32>} : memref<4x6656xf32, #tpu.memory_space<vmem>>, vector<1x6656xf32>,
    %79 = vector.extract_strided_slice %67 {offsets = [3, 0], sizes = [1, 6656], strides = [1, 1]} : vector<4x6656xf32> to vector<1x6656xf32>
    %80 = vector.broadcast %43 : f32 to vector<1x6656xf32>
    %81 = arith.subf %79, %80 : vector<1x6656xf32>
    %82 = vector.broadcast %50 : f32 to vector<1x6656xf32>
    %83 = arith.mulf %81, %82 : vector<1x6656xf32>
    %c3_43 = arith.constant 3 : index
    %c0_44 = arith.constant 0 : index
    %84 = vector.load %arg9[%c3_43, %c0_44] : memref<4x6656xf32, #tpu.memory_space<vmem>>, vector<1x6656xf32>
    tpu.vector_store %arg9[%c3_43, %c0_44], %83 {strides = array<i32>} : memref<4x6656xf32, #tpu.memory_space<vmem>>, vector<1x6656xf32>,
    return
  }
  func.func @transform_0(%arg0: i32) -> (i32, i32) {
    %c0_i32 = arith.constant 0 : i32
    %c0_i32_0 = arith.constant 0 : i32
    %c0_i32_1 = arith.constant 0 : i32
    return %c0_i32, %c0_i32_0 : i32, i32
  }
  func.func @transform_1(%arg0: i32) -> (i32, i32) {
    %c0_i32 = arith.constant 0 : i32
    %c0_i32_0 = arith.constant 0 : i32
    %c0_i32_1 = arith.constant 0 : i32
    return %c0_i32, %c0_i32_0 : i32, i32
  }
  func.func @transform_2(%arg0: i32) -> (i32, i32) {
    %c0_i32 = arith.constant 0 : i32
    %c0_i32_0 = arith.constant 0 : i32
    %c0_i32_1 = arith.constant 0 : i32
    return %c0_i32, %c0_i32_0 : i32, i32
  }
  func.func @transform_3(%arg0: i32) -> (i32, i32) {
    %c0_i32 = arith.constant 0 : i32
    %c0_i32_0 = arith.constant 0 : i32
    %c0_i32_1 = arith.constant 0 : i32
    return %c0_i32, %c0_i32_0 : i32, i32
  }
  func.func @transform_4(%arg0: i32) -> (i32, i32) {
    %c0_i32 = arith.constant 0 : i32
    %c0_i32_0 = arith.constant 0 : i32
    %c0_i32_1 = arith.constant 0 : i32
    return %c0_i32, %c0_i32_0 : i32, i32
  }
  func.func @transform_5(%arg0: i32) -> (i32, i32) {
    %c0_i32 = arith.constant 0 : i32
    %c0_i32_0 = arith.constant 0 : i32
    %c0_i32_1 = arith.constant 0 : i32
    return %c0_i32, %c0_i32_0 : i32, i32
  }
  func.func @transform_6(%arg0: i32) -> (i32, i32) {
    %c0_i32 = arith.constant 0 : i32
    %c0_i32_0 = arith.constant 0 : i32
    %c0_i32_1 = arith.constant 0 : i32
    return %c0_i32, %c0_i32_0 : i32, i32
  }
  func.func @transform_7(%arg0: i32) -> (i32, i32) {
    %c0_i32 = arith.constant 0 : i32
    %c0_i32_0 = arith.constant 0 : i32
    %c0_i32_1 = arith.constant 0 : i32
    return %c0_i32, %c0_i32_0 : i32, i32
  }
  func.func @transform_8(%arg0: i32) -> (i32, i32) {
    %c0_i32 = arith.constant 0 : i32
    %c0_i32_0 = arith.constant 0 : i32
    %c0_i32_1 = arith.constant 0 : i32
    return %c0_i32, %c0_i32_0 : i32, i32
  }
}

</mosaic_0001>

<bundles_post_ra>
// kernel: squeeze.7
= control target key start
LH: loop header
LB: loop body
LE: loop exit
PB: predicated region body
PF: predicated region fallthrough
CT: control target
= control target key end

     0   :  { %s150_s26 = smov 3  ;;  %s1768_s10 = smov 127   ;;  %vm363_vm0 = vcmask 588800   ;;  %vm377_vm1 = vcmask 596992   ;;  %vm133_vm2 = vcmask 465920   ;;  %vm391_vm3 = vcmask 605184   ;;  %s1948_s0 = inlined_call_operand.vmem [shape: f32[1,2,3249], index: 0, kind: input, shape index: {}]   ;;  %s1949_s1 = inlined_call_operand.hbm [shape: f32[2,1,57,57], index: 1, kind: output, shape index: {}]  }
   0x1   :  { %v1685_v0 = vld [vmem:[%s1948_s0 + $0x8] sm:$0x3]  ;;  %v1677_v1 = vld [vmem:[%s1948_s0 + $0x18] sm:$0x3]  ;;  %v1681_v2 = vld [vmem:[%s1948_s0 + $0x10] sm:$0x3] }
   0x2   :  { %115 = vst [vmem:[#allocation3 + $0x20] sm:$0x3] %v1685_v0  ;;  %75 = vst [vmem:[#allocation3 + $0x60] sm:$0x3] %v1677_v1  ;;  %v1673_v3 = vld [vmem:[%s1948_s0 + $0x20] sm:$0x3] }
   0x3   :  { %95 = vst [vmem:[#allocation3 + $0x40] sm:$0x3] %v1681_v2  ;;  %55 = vst [vmem:[#allocation3 + $0x80] sm:$0x3] %v1673_v3  ;;  %v1669_v4 = vld [vmem:[%s1948_s0 + $0x28] sm:$0x3] }
   0x4   :  { %v1665_v5 = vld [vmem:[%s1948_s0 + $0x30] sm:$0x3]  ;;  %35 = vst [vmem:[#allocation3 + $0xa0] sm:$0x3] %v1669_v4  ;;  %v1686_v6 = vld [vmem:[%s1948_s0 + $0x6] sm:$0x3] }
   0x5   :  { %15 = vst [vmem:[#allocation3 + $0xc0] sm:$0x3] %v1665_v5  ;;  %v1682_v7 = vld [vmem:[%s1948_s0 + $0xe] sm:$0x3]  ;;  %120 = vst [vmem:[#allocation3 + $0x18] sm:$0x3] %v1686_v6 }
   0x6   :  { %100 = vst [vmem:[#allocation3 + $0x38] sm:$0x3] %v1682_v7  ;;  %v1678_v8 = vld [vmem:[%s1948_s0 + $0x16] sm:$0x3]  ;;  %v1674_v9 = vld [vmem:[%s1948_s0 + $0x1e] sm:$0x3] }
   0x7   :  { %80 = vst [vmem:[#allocation3 + $0x58] sm:$0x3] %v1678_v8  ;;  %60 = vst [vmem:[#allocation3 + $0x78] sm:$0x3] %v1674_v9  ;;  %v1670_v10 = vld [vmem:[%s1948_s0 + $0x26] sm:$0x3] }
   0x8   :  { %v1666_v11 = vld [vmem:[%s1948_s0 + $0x2e] sm:$0x3]  ;;  %40 = vst [vmem:[#allocation3 + $0x98] sm:$0x3] %v1670_v10  ;;  %v1687_v12 = vld [vmem:[%s1948_s0 + $0x4] sm:$0x3] }
   0x9   :  { %20 = vst [vmem:[#allocation3 + $0xb8] sm:$0x3] %v1666_v11  ;;  %v1683_v13 = vld [vmem:[%s1948_s0 + $0xc] sm:$0x3]  ;;  %125 = vst [vmem:[#allocation3 + $0x10] sm:$0x3] %v1687_v12 }
   0xa   :  { %105 = vst [vmem:[#allocation3 + $0x30] sm:$0x3] %v1683_v13  ;;  %v1679_v14 = vld [vmem:[%s1948_s0 + $0x14] sm:$0x3]  ;;  %v1675_v15 = vld [vmem:[%s1948_s0 + $0x1c] sm:$0x3] }
   0xb   :  { %v136_v16 = vld [vmem:[#allocation3 + $0x20] sm:$0x3]   ;;  %85 = vst [vmem:[#allocation3 + $0x50] sm:$0x3] %v1679_v14  ;;  %65 = vst [vmem:[#allocation3 + $0x70] sm:$0x3] %v1675_v15 }
   0xc   :  { %v151_v17 = vld [vmem:[#allocation3 + $0x61] ss:$-1 sm:%s150_s26]   ;;  %137 = vrot.lane.b32.xlu0 %v136_v16, %s1768_s10  ;;  %s1769_s11 = smov 125   ;;  %v1671_v20 = vld [vmem:[%s1948_s0 + $0x24] sm:$0x3]  ;;  %s1770_s16 = smov 126  }
   0xd   :  { %152 = vrot.lane.b32.xlu1 %v151_v17, %s1769_s11  ;;  %v143_v18 = vld [vmem:[#allocation3 + $0x40] sm:$0x3]   ;;  %45 = vst [vmem:[#allocation3 + $0x90] sm:$0x3] %v1671_v20  ;;  %v1667_v21 = vld [vmem:[%s1948_s0 + $0x2c] sm:$0x3] }
   0xe   :  { %v158_v19 = vld [vmem:[#allocation3 + $0x80] sm:$0x3]   ;;  %s1771_s17 = smov 124   ;;  %25 = vst [vmem:[#allocation3 + $0xb0] sm:$0x3] %v1667_v21  ;;  %s179_s20 = smov 3 }
   0xf   :  { %v1688_v22 = vld [vmem:[%s1948_s0 + $0x2] sm:$0x3]  ;;  %v1684_v25 = vld [vmem:[%s1948_s0 + $0xa] sm:$0x3]  ;;  %v1680_v26 = vld [vmem:[%s1948_s0 + $0x12] sm:$0x3] }
  0x10   :  { %144 = vrot.lane.b32.xlu0 %v143_v18, %s1770_s16  ;;  %v165_v23 = vld [vmem:[#allocation3 + $0xa0] sm:$0x3]   ;;  %129 = vst [vmem:[#allocation3 + $0x8] sm:$0x3] %v1688_v22  ;;  %110 = vst [vmem:[#allocation3 + $0x28] sm:$0x3] %v1684_v25 }
  0x11   :  { %159 = vrot.lane.b32.xlu1 %v158_v19, %s1771_s17  ;;  %v172_v24 = vld [vmem:[#allocation3 + $0xc0] sm:$0x3]   ;;  %v1676_v27 = vld [vmem:[%s1948_s0 + $0x1a] sm:$0x3]  ;;  %s1772_s27 = smov 123   ;;  %s1773_s28 = smov 122  }
  0x12   :  { %90 = vst [vmem:[#allocation3 + $0x48] sm:$0x3] %v1680_v26  ;;  %70 = vst [vmem:[#allocation3 + $0x68] sm:$0x3] %v1676_v27  ;;  %v180_v28 = vld [vmem:[#allocation3 + $0x19] ss:$-1 sm:%s179_s20]  }
  0x13   :  { %v187_v29 = vld [vmem:[#allocation3 + $0x38] sm:$0x3]   ;;  %s1774_s29 = smov 113   ;;  %s1775_s30 = smov 112   ;;  %v223_v34 = vld [vmem:[#allocation3 + $0x10] sm:$0x3]  }
  0x14   :  { %166 = vrot.lane.b32.xlu0 %v165_v23, %s1772_s27  ;;  %v194_v30 = vld [vmem:[#allocation3 + $0x58] sm:$0x3]   ;;  %s208_s2 = smov 3  ;;  %s1776_s3 = smov 111   ;;  %v230_v35 = vld [vmem:[#allocation3 + $0x30] sm:$0x3]  }
  0x15   :  { %173 = vrot.lane.b32.xlu1 %v172_v24, %s1773_s28  ;;  %v201_v31 = vld [vmem:[#allocation3 + $0x78] sm:$0x3]   ;;  %s1777_s4 = smov 110   ;;  %s1778_s5 = smov 109   ;;  %v245_v37 = vld [vmem:[#allocation3 + $0x70] sm:$0x3]  }
  0x16   :  { %v209_v32 = vld [vmem:[#allocation3 + $0x99] ss:$-1 sm:%s208_s2]   ;;  %s1779_s6 = smov 108   ;;  %s237_s7 = smov 3  ;;  %v1672_v38 = vld [vmem:[%s1948_s0 + $0x22] sm:$0x3] }
  0x17   :  { %v216_v33 = vld [vmem:[#allocation3 + $0xb8] sm:$0x3]   ;;  %s1780_s8 = smov 99   ;;  %s1781_s9 = smov 98   ;;  %v238_v36 = vld [vmem:[#allocation3 + $0x51] ss:$-1 sm:%s237_s7]  }
  0x18   :  { %181 = vrot.lane.b32.xlu0 %v180_v28, %s1774_s29  ;;  %50 = vst [vmem:[#allocation3 + $0x88] sm:$0x3] %v1672_v38  ;;  %s1782_s12 = smov 97   ;;  %s1783_s13 = smov 96   ;;  %v1668_v39 = vld [vmem:[%s1948_s0 + $0x2a] sm:$0x3] }
  0x19   :  { %188 = vrot.lane.b32.xlu1 %v187_v29, %s1775_s30  ;;  %v252_v40 = vld [vmem:[#allocation3 + $0x90] sm:$0x3]   ;;  %30 = vst [vmem:[#allocation3 + $0xa8] sm:$0x3] %v1668_v39  ;;  %v130_v42 = vld [vmem:[%s1948_s0] sm:$0x3] }
  0x1a   :  { %v259_v41 = vld [vmem:[#allocation3 + $0xb0] sm:$0x3]   ;;  %s266_s18 = smov 3  ;;  %131 = vst [vmem:[#allocation3] sm:$0x3] %v130_v42  ;;  %s1784_s19 = smov 95  }
  0x1b   :  { %s1785_s20 = smov 94   ;;  %v267_v43 = vld [vmem:[#allocation3 + $0x9] ss:$-1 sm:%s266_s18]   ;;  %v1664_v45 = vld [vmem:[%s1948_s0 + $0x32] sm:$0x3]  ;;  %s1786_s0 = smov 85  }
  0x1c   :  { %195 = vrot.lane.b32.xlu0 %v194_v30, %s1776_s3  ;;  %v274_v44 = vld [vmem:[#allocation3 + $0x28] sm:$0x3]   ;;  %s1787_s23 = smov 84   ;;  %v360_v46 = vld [vmem:[#allocation3 + $0x18] sm:$0x3]   ;;  %s402_s24 = smov 3 }
  0x1d   :  { %202 = vrot.lane.b32.xlu1 %v201_v31, %s1777_s4  ;;  %10 = vst [vmem:[#allocation3 + $0xc8] sm:$0x3] %v1664_v45  ;;  %v281_v47 = vld [vmem:[#allocation3 + $0x48] sm:$0x3]   ;;  %v362_v49 = vld [vmem:[#allocation3 + $0x20] sm:$0x3]  }
  0x1e   :  { %v288_v48 = vld [vmem:[#allocation3 + $0x68] sm:$0x3]   ;;  %v374_v50 = vld [vmem:[#allocation3 + $0x38] sm:$0x3]   ;;  %v376_v51 = vld [vmem:[#allocation3 + $0x40] sm:$0x3]   ;;  %v364_v53 = vsel %vm363_vm0, %v362_v49, %v360_v46 }
  0x1f   :  { %s405_s25 = smov 3  ;;  %s1788_s26 = smov 83   ;;  %v378_v54 = vsel %vm377_vm1, %v376_v51, %v374_v50  ;;  %v388_v55 = vld [vmem:[#allocation3 + $0x58] sm:$0x3]   ;;  %v390_v56 = vld [vmem:[#allocation3 + $0x60] sm:$0x3]  }
  0x20   :  { %210 = vrot.lane.b32.xlu0 %v209_v32, %s1778_s5  ;;  %s1789_s27 = smov 82   ;;  %v403_v57 = vld [vmem:[#allocation3 + $0x79] ss:$-1 sm:%s402_s24]   ;;  %v406_v58 = vld [vmem:[#allocation3 + $0x81] ss:$-1 sm:%s405_s25]   ;;  %vm407_vm4 = vcmask 613376  }
  0x21   :  { %217 = vrot.lane.b32.xlu1 %v216_v33, %s1779_s6  ;;  %v132_v52 = vld [vmem:[#allocation3] sm:$0x3]   ;;  %s1790_s28 = smov 56   ;;  %s1791_s29 = smov 55  }
  0x22   :  { %134 = vst.msk [vmem:[#allocation2] ss:$456 sm:$0x3] %vm133_vm2, %v132_v52  }
  0x24   :  { %224 = vrot.lane.b32.xlu0 %v223_v34, %s1780_s8 }
  0x25   :  { %231 = vrot.lane.b32.xlu1 %v230_v35, %s1781_s9 }
  0x28   :  { %239 = vrot.lane.b32.xlu0 %v238_v36, %s1782_s12 }
  0x29   :  { %246 = vrot.lane.b32.xlu1 %v245_v37, %s1783_s13 }
  0x2c   :  { %253 = vrot.lane.b32.xlu0 %v252_v40, %s1784_s19 }
  0x2d   :  { %260 = vrot.lane.b32.xlu1 %v259_v41, %s1785_s20 }
  0x30   :  { %268 = vrot.lane.b32.xlu0 %v267_v43, %s1786_s0 }
  0x31   :  { %275 = vrot.lane.b32.xlu1 %v274_v44, %s1787_s23 }
  0x34   :  { %282 = vrot.lane.b32.xlu0 %v281_v47, %s1788_s26 }
  0x35   :  { %289 = vrot.lane.b32.xlu1 %v288_v48, %s1789_s27 }
  0x38   :  { %365 = vrot.lane.b32.xlu0 %v364_v53, %s1790_s28 }
  0x39   :  { %379 = vrot.lane.b32.xlu1 %v378_v54, %s1791_s29 }
  0x3a   :  { %2 = vsyncpa [#allocation1], 0  ;;  %v392_v59 = vsel %vm391_vm3, %v390_v56, %v388_v55  ;;  %v408_v60 = vsel %vm407_vm4, %v406_v58, %v403_v57  ;;  %v418_v61 = vld [vmem:[#allocation3 + $0x98] sm:$0x3]   ;;  %v420_v62 = vld [vmem:[#allocation3 + $0xa0] sm:$0x3]  }
  0x3b   :  { %vm421_vm5 = vcmask 621568   ;;  %v432_v63 = vld [vmem:[#allocation3 + $0xb8] sm:$0x3]   ;;  %v434_v0 = vld [vmem:[#allocation3 + $0xc0] sm:$0x3]   ;;  %vm435_vm6 = vcmask 629760  }
  0x3c   :  { %s460_s30 = smov 3  ;;  %s463_s2 = smov 3  ;;  %v724_v1 = vld [vmem:[#allocation2] sm:$0x1]  ;;  %v1120_v2 = vld [vmem:[#allocation2 + $0x1c8] sm:$0x1]  ;;  %v422_v3 = vsel %vm421_vm5, %v420_v62, %v418_v61  ;;  %v436_v4 = vsel %vm435_vm6, %v434_v0, %v432_v63 }
  0x3d   :  { %s1792_s3 = smov 54   ;;  %s1793_s4 = smov 53   ;;  %727 = vst [vmem:[#allocation0] sm:$0x1] %v724_v1  ;;  %1125 = vst [vmem:[#allocation0 + $0x39] sm:$0x1] %v1120_v2 }
  0x3e   :  { %393 = vrot.lane.b32.xlu0 %v392_v59, %s1792_s3  ;;  %409 = vrot.lane.b32.xlu1 %v408_v60, %s1793_s4  ;;  %v446_v5 = vld [vmem:[#allocation3 + $0x10] sm:$0x3]   ;;  %v448_v6 = vld [vmem:[#allocation3 + $0x18] sm:$0x3]   ;;  %vm449_vm7 = vcmask 703488   ;;  %vm465_vm8 = vcmask 711680  }
  0x3f   :  { %v461_v7 = vld [vmem:[#allocation3 + $0x31] ss:$-1 sm:%s460_s30]   ;;  %v464_v8 = vld [vmem:[#allocation3 + $0x39] ss:$-1 sm:%s463_s2]   ;;  %s1794_s5 = smov 52   ;;  %s1795_s6 = smov 51   ;;  %v450_v9 = vsel %vm449_vm7, %v448_v6, %v446_v5 }
  0x40   :  { %v466_v10 = vsel %vm465_vm8, %v464_v8, %v461_v7  ;;  %v476_v11 = vld [vmem:[#allocation3 + $0x50] sm:$0x3]   ;;  %v478_v12 = vld [vmem:[#allocation3 + $0x58] sm:$0x3]   ;;  %vm479_vm9 = vcmask 719872   ;;  %vm493_vm10 = vcmask 728064  }
  0x41   :  { %v490_v13 = vld [vmem:[#allocation3 + $0x70] sm:$0x3]   ;;  %v492_v14 = vld [vmem:[#allocation3 + $0x78] sm:$0x3]   ;;  %s518_s7 = smov 3  ;;  %s521_s8 = smov 3  ;;  %v480_v15 = vsel %vm479_vm9, %v478_v12, %v476_v11 }
  0x42   :  { %423 = vrot.lane.b32.xlu0 %v422_v3, %s1794_s5  ;;  %437 = vrot.lane.b32.xlu1 %v436_v4, %s1795_s6  ;;  %s1796_s9 = smov 42   ;;  %s1797_s10 = smov 41   ;;  %v494_v16 = vsel %vm493_vm10, %v492_v14, %v490_v13  ;;  %v504_v17 = vld [vmem:[#allocation3 + $0x90] sm:$0x3]   ;;  %v506_v18 = vld [vmem:[#allocation3 + $0x98] sm:$0x3]  }
  0x43   :  { %vm507_vm11 = vcmask 736256   ;;  %v519_v19 = vld [vmem:[#allocation3 + $0xb1] ss:$-1 sm:%s518_s7]   ;;  %v522_v20 = vld [vmem:[#allocation3 + $0xb9] ss:$-1 sm:%s521_s8]   ;;  %vm523_vm12 = vcmask 744448  }
  0x44   :  { %s1798_s11 = smov 40   ;;  %s1799_s12 = smov 39   ;;  %v508_v21 = vsel %vm507_vm11, %v506_v18, %v504_v17  ;;  %v524_v22 = vsel %vm523_vm12, %v522_v20, %v519_v19  ;;  %v534_v23 = vld [vmem:[#allocation3 + $0x8] sm:$0x3]   ;;  %v536_v24 = vld [vmem:[#allocation3 + $0x10] sm:$0x3]  }
  0x45   :  { %vm537_vm13 = vcmask 818176   ;;  %v548_v25 = vld [vmem:[#allocation3 + $0x28] sm:$0x3]   ;;  %v550_v26 = vld [vmem:[#allocation3 + $0x30] sm:$0x3]   ;;  %vm551_vm14 = vcmask 826368  }
  0x46   :  { %451 = vrot.lane.b32.xlu0 %v450_v9, %s1796_s9  ;;  %467 = vrot.lane.b32.xlu1 %v466_v10, %s1797_s10  ;;  %s576_s13 = smov 3  ;;  %s579_s14 = smov 3  ;;  %v538_v27 = vsel %vm537_vm13, %v536_v24, %v534_v23  ;;  %v552_v28 = vsel %vm551_vm14, %v550_v26, %v548_v25  ;;  %v562_v29 = vld [vmem:[#allocation3 + $0x48] sm:$0x3]   ;;  %v564_v30 = vld [vmem:[#allocation3 + $0x50] sm:$0x3]  }
  0x47   :  { %s1800_s15 = smov 38   ;;  %s1801_s16 = smov 37   ;;  %vm565_vm15 = vcmask 834560   ;;  %v577_v31 = vld [vmem:[#allocation3 + $0x69] ss:$-1 sm:%s576_s13]   ;;  %vm581_vm0 = vcmask 842752  }
  0x48   :  { %v580_v32 = vld [vmem:[#allocation3 + $0x71] ss:$-1 sm:%s579_s14]   ;;  %s1802_s17 = smov 28   ;;  %s1803_s18 = smov 27   ;;  %v566_v33 = vsel %vm565_vm15, %v564_v30, %v562_v29  ;;  %vm595_vm1 = vcmask 850944   ;;  %vm609_vm3 = vcmask 859136  }
  0x49   :  { %v582_v34 = vsel %vm581_vm0, %v580_v32, %v577_v31  ;;  %v594_v35 = vld [vmem:[#allocation3 + $0x90] sm:$0x3]   ;;  %v592_v36 = vld [vmem:[#allocation3 + $0x88] sm:$0x3]   ;;  %s633_s19 = smov 3  ;;  %s636_s20 = smov 3 }
  0x4a   :  { %481 = vrot.lane.b32.xlu0 %v480_v15, %s1798_s11  ;;  %495 = vrot.lane.b32.xlu1 %v494_v16, %s1799_s12  ;;  %v606_v37 = vld [vmem:[#allocation3 + $0xa8] sm:$0x3]   ;;  %v608_v38 = vld [vmem:[#allocation3 + $0xb0] sm:$0x3]   ;;  %s1804_s21 = smov 26   ;;  %s1805_s22 = smov 25   ;;  %v596_v39 = vsel %vm595_vm1, %v594_v35, %v592_v36 }
  0x4b   :  { %v610_v40 = vsel %vm609_vm3, %v608_v38, %v606_v37  ;;  %v621_v41 = vld [vmem:[#allocation3 + $0x8] sm:$0x3]   ;;  %vm622_vm4 = vcmask 932864   ;;  %vm638_vm5 = vcmask 941056   ;;  %v619_v42 = vld [vmem:[#allocation3] sm:$0x3]  }
  0x4c   :  { %v634_v43 = vld [vmem:[#allocation3 + $0x21] ss:$-1 sm:%s633_s19]   ;;  %v637_v44 = vld [vmem:[#allocation3 + $0x29] ss:$-1 sm:%s636_s20]   ;;  %s1806_s0 = smov 24   ;;  %s1807_s23 = smov 23   ;;  %v623_v45 = vsel %vm622_vm4, %v621_v41, %v619_v42 }
  0x4d   :  { %v639_v46 = vsel %vm638_vm5, %v637_v44, %v634_v43  ;;  %v649_v47 = vld [vmem:[#allocation3 + $0x40] sm:$0x3]   ;;  %v651_v48 = vld [vmem:[#allocation3 + $0x48] sm:$0x3]   ;;  %vm652_vm6 = vcmask 949248   ;;  %vm666_vm7 = vcmask 957440  }
  0x4e   :  { %509 = vrot.lane.b32.xlu0 %v508_v21, %s1800_s15  ;;  %525 = vrot.lane.b32.xlu1 %v524_v22, %s1801_s16  ;;  %v663_v49 = vld [vmem:[#allocation3 + $0x60] sm:$0x3]   ;;  %v665_v50 = vld [vmem:[#allocation3 + $0x68] sm:$0x3]   ;;  %s691_s24 = smov 3  ;;  %s694_s25 = smov 3  ;;  %v653_v51 = vsel %vm652_vm6, %v651_v48, %v649_v47 }
  0x4f   :  { %s1808_s26 = smov 14   ;;  %s1809_s27 = smov 13   ;;  %v667_v52 = vsel %vm666_vm7, %v665_v50, %v663_v49  ;;  %v677_v53 = vld [vmem:[#allocation3 + $0x80] sm:$0x3]   ;;  %v679_v54 = vld [vmem:[#allocation3 + $0x88] sm:$0x3]  }
  0x50   :  { %vm680_vm8 = vcmask 965632   ;;  %v692_v55 = vld [vmem:[#allocation3 + $0xa1] ss:$-1 sm:%s691_s24]   ;;  %v695_v56 = vld [vmem:[#allocation3 + $0xa9] ss:$-1 sm:%s694_s25]   ;;  %vm696_vm9 = vcmask 973824  }
  0x51   :  { %s1810_s28 = smov 12   ;;  %s1811_s29 = smov 11   ;;  %v681_v57 = vsel %vm680_vm8, %v679_v54, %v677_v53  ;;  %v697_v58 = vsel %vm696_vm9, %v695_v56, %v692_v55  ;;  %v707_v59 = vld [vmem:[#allocation3 + $0xc0] sm:$0x3]   ;;  %v709_v60 = vld [vmem:[#allocation3 + $0xc8] sm:$0x3]  }
  0x52   :  { %539 = vrot.lane.b32.xlu0 %v538_v27, %s1802_s17  ;;  %553 = vrot.lane.b32.xlu1 %v552_v28, %s1803_s18  ;;  %s295_s30 = smov 3  ;;  %vm710_vm10 = vcmask 982016   ;;  %s1812_s2 = smov 10   ;;  %v309_v63 = vld [vmem:[#allocation3] sm:$0x3]   ;;  %vm367_vm11 = vcmask 457728  }
  0x53   :  { %s1813_s3 = smov 9   ;;  %v296_v61 = vld [vmem:[#allocation3 + $0x89] ss:$-1 sm:%s295_s30]   ;;  %v711_v62 = vsel %vm710_vm10, %v709_v60, %v707_v59  ;;  %s1814_s4 = smov 81   ;;  %v316_v2 = vld [vmem:[#allocation3 + $0x20] sm:$0x3]  }
  0x54   :  { %s1815_s5 = smov 8   ;;  %v303_v0 = vld [vmem:[#allocation3 + $0xa8] sm:$0x3]   ;;  %s323_s6 = smov 3  ;;  %v338_v3 = vld [vmem:[#allocation3 + $0x80] sm:$0x3]  }
  0x55   :  { %s1816_s7 = smov 71   ;;  %s1817_s8 = smov 80   ;;  %v324_v1 = vld [vmem:[#allocation3 + $0x41] ss:$-1 sm:%s323_s6]   ;;  %vm381_vm12 = vcmask 449536   ;;  %vm370_vm13 = vcmask 466368  }
  0x56   :  { %567 = vrot.lane.b32.xlu0 %v566_v33, %s1804_s21  ;;  %583 = vrot.lane.b32.xlu1 %v582_v34, %s1805_s22  ;;  %s1818_s9 = smov 69   ;;  %s1819_s10 = smov 70   ;;  %v331_v4 = vld [vmem:[#allocation3 + $0x60] sm:$0x3]   ;;  %vm384_vm14 = vcmask 466360   ;;  %vm395_vm15 = vcmask 441344  }
  0x57   :  { %s352_s11 = smov 3  ;;  %s1820_s12 = smov 67   ;;  %v345_v6 = vld [vmem:[#allocation3 + $0xa0] sm:$0x3]   ;;  %vm411_vm0 = vcmask 433152   ;;  %vm398_vm1 = vcmask 466352  }
  0x58   :  { %s1821_s13 = smov 68   ;;  %v353_v5 = vld [vmem:[#allocation3 + $0xc1] ss:$-1 sm:%s352_s11]   ;;  %s1822_s14 = smov 65   ;;  %vm414_vm3 = vcmask 466344   ;;  %vm425_vm4 = vcmask 424960  }
  0x59   :  { %s1823_s15 = smov 66   ;;  %vm439_vm5 = vcmask 416768   ;;  %vm428_vm6 = vcmask 466336   ;;  %vm442_vm7 = vcmask 466328   ;;  %vm453_vm8 = vcmask 343040   ;;  %s1824_s16 = smov [#allocation0]  }
  0x5a   :  { %597 = vrot.lane.b32.xlu0 %v596_v39, %s1806_s0  ;;  %611 = vrot.lane.b32.xlu1 %v610_v40, %s1807_s23  ;;  %vm469_vm9 = vcmask 334848   ;;  %vm456_vm10 = vcmask 466256   ;;  %s1522_s17 = sshll.u32 %s1824_s16, 4  ;;  %s1523_s17 = int_to_ptr.vmem [resolvable:$true] %s1522_s17 }
  0x5b   :  { %s1746_s18 = scalar_lea.vmem %s1523_s17, 1824  ;;  %p1751_p1 = scmp.lt.s32.totalorder %s1523_s17, %s1523_s17 }
  0x5c   :  { %p1747_p0 = scmp.ne.s32.totalorder %s1523_s17, %s1746_s18  ;;  %p1752_p2 = scmp.lt.s32.totalorder %s1746_s18, %s1746_s18 }
  0x5e   :  { %624 = vrot.lane.b32.xlu0 %v623_v45, %s1808_s26  ;;  %640 = vrot.lane.b32.xlu1 %v639_v46, %s1809_s27  ;;  %p1753_p3 = por %p1752_p2, %p1751_p1 }
  0x60   :  { %p1754_p4 = pnand %p1753_p3, %p1747_p0 }
  0x62   :  { %654 = vrot.lane.b32.xlu0 %v653_v51, %s1810_s28  ;;  %668 = vrot.lane.b32.xlu1 %v667_v52, %s1811_s29 }
  0x66   :  { %682 = vrot.lane.b32.xlu0 %v681_v57, %s1812_s2  ;;  %698 = vrot.lane.b32.xlu1 %v697_v58, %s1813_s3 }
  0x6a   :  { %297 = vrot.lane.b32.xlu1 %v296_v61, %s1814_s4  ;;  %712 = vrot.lane.b32.xlu0 %v711_v62, %s1815_s5 }
  0x6e   :  { %310 = vrot.lane.b32.xlu1 %v309_v63, %s1816_s7  ;;  %304 = vrot.lane.b32.xlu0 %v303_v0, %s1817_s8 }
  0x72   :  { %325 = vrot.lane.b32.xlu1 %v324_v1, %s1818_s9  ;;  %317 = vrot.lane.b32.xlu0 %v316_v2, %s1819_s10 }
  0x76   :  { %339 = vrot.lane.b32.xlu1 %v338_v3, %s1820_s12  ;;  %332 = vrot.lane.b32.xlu0 %v331_v4, %s1821_s13 }
  0x7a   :  { %354 = vrot.lane.b32.xlu1 %v353_v5, %s1822_s14  ;;  %346 = vrot.lane.b32.xlu0 %v345_v6, %s1823_s15 }
  0x7e   :  { %v138_v7 = vpop.permute.xlu0 %137  }
  0x7f   :  { %v153_v8 = vpop.permute.xlu1 %152   ;;  %141 = vst.msk [vmem:[#allocation2 + $0x48] ss:$456 sm:$0x3] %vm133_vm2, %v138_v7  }
  0x80   :  { %156 = vst.msk [vmem:[#allocation2 + $0x2a0] ss:$-456 sm:$0x3] %vm133_vm2, %v153_v8  }
  0x82   :  { %v145_v9 = vpop.permute.xlu0 %144  }
  0x83   :  { %v160_v10 = vpop.permute.xlu1 %159   ;;  %148 = vst.msk [vmem:[#allocation2 + $0x90] ss:$456 sm:$0x3] %vm133_vm2, %v145_v9  }
  0x84   :  { %163 = vst.msk [vmem:[#allocation2 + $0x120] ss:$456 sm:$0x3] %vm133_vm2, %v160_v10  }
  0x86   :  { %v784_v11 = vld [vmem:[#allocation2 + $0x48] sm:$0x1]  ;;  %v1183_v12 = vld [vmem:[#allocation2 + $0x210] sm:$0x1]  ;;  %v167_v14 = vpop.permute.xlu0 %166  }
  0x87   :  { %v910_v13 = vld [vmem:[#allocation2 + $0xd8] sm:$0x1]  ;;  %v174_v15 = vpop.permute.xlu1 %173   ;;  %789 = vst [vmem:[#allocation0 + $0x9] sm:$0x1] %v784_v11  ;;  %1188 = vst [vmem:[#allocation0 + $0x42] sm:$0x1] %v1183_v12 }
  0x88   :  { %915 = vst [vmem:[#allocation0 + $0x1b] sm:$0x1] %v910_v13  ;;  %v1309_v16 = vld [vmem:[#allocation2 + $0x2a0] sm:$0x1] }
  0x89   :  { %170 = vst.msk [vmem:[#allocation2 + $0x168] ss:$456 sm:$0x3] %vm133_vm2, %v167_v14   ;;  %177 = vst.msk [vmem:[#allocation2 + $0x1b0] ss:$456 sm:$0x3] %vm133_vm2, %v174_v15  }
  0x8a   :  { %1314 = vst [vmem:[#allocation0 + $0x54] sm:$0x1] %v1309_v16  ;;  %v847_v17 = vld [vmem:[#allocation2 + $0x90] sm:$0x1]  ;;  %v1246_v18 = vld [vmem:[#allocation2 + $0x258] sm:$0x1]  ;;  %v182_v20 = vpop.permute.xlu0 %181  }
  0x8b   :  { %v973_v19 = vld [vmem:[#allocation2 + $0x120] sm:$0x1]  ;;  %v189_v21 = vpop.permute.xlu1 %188   ;;  %852 = vst [vmem:[#allocation0 + $0x12] sm:$0x1] %v847_v17  ;;  %1251 = vst [vmem:[#allocation0 + $0x4b] sm:$0x1] %v1246_v18 }
  0x8c   :  { %978 = vst [vmem:[#allocation0 + $0x24] sm:$0x1] %v973_v19  ;;  %v1372_v22 = vld [vmem:[#allocation2 + $0x2e8] sm:$0x1] }
  0x8d   :  { %185 = vst.msk [vmem:[#allocation2 + $0x200] ss:$-456 sm:$0x3] %vm133_vm2, %v182_v20   ;;  %192 = vst.msk [vmem:[#allocation2 + $0x80] ss:$456 sm:$0x3] %vm133_vm2, %v189_v21  }
  0x8e   :  { %1377 = vst [vmem:[#allocation0 + $0x5d] sm:$0x1] %v1372_v22  ;;  %v196_v26 = vpop.permute.xlu0 %195  }
  0x8f   :  { %v203_v27 = vpop.permute.xlu1 %202   ;;  %199 = vst.msk [vmem:[#allocation2 + $0xc8] ss:$456 sm:$0x3] %vm133_vm2, %v196_v26  }
  0x90   :  { %v1036_v23 = vld [vmem:[#allocation2 + $0x168] sm:$0x1]  ;;  %v1435_v24 = vld [vmem:[#allocation2 + $0x330] sm:$0x1]  ;;  %v1498_v28 = vld [vmem:[#allocation2 + $0x378] sm:$0x1] }
  0x91   :  { %v1099_v25 = vld [vmem:[#allocation2 + $0x1b0] sm:$0x1]  ;;  %1041 = vst [vmem:[#allocation0 + $0x2d] sm:$0x1] %v1036_v23  ;;  %1440 = vst [vmem:[#allocation0 + $0x66] sm:$0x1] %v1435_v24 }
  0x92   :  { %1104 = vst [vmem:[#allocation0 + $0x36] sm:$0x1] %v1099_v25  ;;  %206 = vst.msk [vmem:[#allocation2 + $0x110] ss:$456 sm:$0x3] %vm133_vm2, %v203_v27   ;;  %v211_v32 = vpop.permute.xlu0 %210  }
  0x93   :  { %1503 = vst [vmem:[#allocation0 + $0x6f] sm:$0x1] %v1498_v28  ;;  %v218_v33 = vpop.permute.xlu1 %217   ;;  %214 = vst.msk [vmem:[#allocation2 + $0x320] ss:$-456 sm:$0x3] %vm133_vm2, %v211_v32  }
  0x94   :  { %v770_v29 = vld [vmem:[#allocation2 + $0x38] sm:$0x1]  ;;  %v1169_v30 = vld [vmem:[#allocation2 + $0x200] sm:$0x1]  ;;  %v1232_v34 = vld [vmem:[#allocation2 + $0x248] sm:$0x1] }
  0x95   :  { %v833_v31 = vld [vmem:[#allocation2 + $0x80] sm:$0x1]  ;;  %775 = vst [vmem:[#allocation0 + $0x7] sm:$0x1] %v770_v29  ;;  %1174 = vst [vmem:[#allocation0 + $0x40] sm:$0x1] %v1169_v30 }
  0x96   :  { %838 = vst [vmem:[#allocation0 + $0x10] sm:$0x1] %v833_v31  ;;  %221 = vst.msk [vmem:[#allocation2 + $0x1a0] ss:$456 sm:$0x3] %vm133_vm2, %v218_v33   ;;  %v225_v38 = vpop.permute.xlu0 %224  }
  0x97   :  { %1237 = vst [vmem:[#allocation0 + $0x49] sm:$0x1] %v1232_v34  ;;  %v896_v35 = vld [vmem:[#allocation2 + $0xc8] sm:$0x1]  ;;  %v1295_v36 = vld [vmem:[#allocation2 + $0x290] sm:$0x1]  ;;  %v232_v39 = vpop.permute.xlu1 %231  }
  0x98   :  { %901 = vst [vmem:[#allocation0 + $0x19] sm:$0x1] %v896_v35  ;;  %1300 = vst [vmem:[#allocation0 + $0x52] sm:$0x1] %v1295_v36 }
  0x99   :  { %v959_v37 = vld [vmem:[#allocation2 + $0x110] sm:$0x1]  ;;  %v1358_v40 = vld [vmem:[#allocation2 + $0x2d8] sm:$0x1] }
  0x9a   :  { %964 = vst [vmem:[#allocation0 + $0x22] sm:$0x1] %v959_v37  ;;  %228 = vst.msk [vmem:[#allocation2 + $0x28] ss:$456 sm:$0x3] %vm133_vm2, %v225_v38   ;;  %v240_v44 = vpop.permute.xlu0 %239  }
  0x9b   :  { %235 = vst.msk [vmem:[#allocation2 + $0x70] ss:$456 sm:$0x3] %vm133_vm2, %v232_v39   ;;  %1363 = vst [vmem:[#allocation0 + $0x5b] sm:$0x1] %v1358_v40  ;;  %v247_v45 = vpop.permute.xlu1 %246  }
  0x9c   :  { %v1022_v41 = vld [vmem:[#allocation2 + $0x158] sm:$0x1]  ;;  %v1421_v42 = vld [vmem:[#allocation2 + $0x320] sm:$0x1] }
  0x9d   :  { %v1085_v43 = vld [vmem:[#allocation2 + $0x1a0] sm:$0x1]  ;;  %1027 = vst [vmem:[#allocation0 + $0x2b] sm:$0x1] %v1022_v41  ;;  %1426 = vst [vmem:[#allocation0 + $0x64] sm:$0x1] %v1421_v42 }
  0x9e   :  { %1090 = vst [vmem:[#allocation0 + $0x34] sm:$0x1] %v1085_v43  ;;  %v1484_v46 = vld [vmem:[#allocation2 + $0x368] sm:$0x1]  ;;  %v254_v50 = vpop.permute.xlu0 %253  }
  0x9f   :  { %243 = vst.msk [vmem:[#allocation2 + $0x280] ss:$-456 sm:$0x3] %vm133_vm2, %v240_v44   ;;  %250 = vst.msk [vmem:[#allocation2 + $0x100] ss:$456 sm:$0x3] %vm133_vm2, %v247_v45   ;;  %v261_v51 = vpop.permute.xlu1 %260  }
  0xa0   :  { %1489 = vst [vmem:[#allocation0 + $0x6d] sm:$0x1] %v1484_v46  ;;  %257 = vst.msk [vmem:[#allocation2 + $0x148] ss:$456 sm:$0x3] %vm133_vm2, %v254_v50  }
  0xa1   :  { %v756_v47 = vld [vmem:[#allocation2 + $0x28] sm:$0x1]  ;;  %v1155_v48 = vld [vmem:[#allocation2 + $0x1f0] sm:$0x1] }
  0xa2   :  { %v819_v49 = vld [vmem:[#allocation2 + $0x70] sm:$0x1]  ;;  %761 = vst [vmem:[#allocation0 + $0x5] sm:$0x1] %v756_v47  ;;  %1160 = vst [vmem:[#allocation0 + $0x3e] sm:$0x1] %v1155_v48  ;;  %v269_v56 = vpop.permute.xlu0 %268  }
  0xa3   :  { %824 = vst [vmem:[#allocation0 + $0xe] sm:$0x1] %v819_v49  ;;  %v1218_v52 = vld [vmem:[#allocation2 + $0x238] sm:$0x1]  ;;  %v276_v57 = vpop.permute.xlu1 %275  }
  0xa4   :  { %264 = vst.msk [vmem:[#allocation2 + $0x190] ss:$456 sm:$0x3] %vm133_vm2, %v261_v51   ;;  %1223 = vst [vmem:[#allocation0 + $0x47] sm:$0x1] %v1218_v52 }
  0xa5   :  { %272 = vst.msk [vmem:[#allocation2 + $0x1e0] ss:$-456 sm:$0x3] %vm133_vm2, %v269_v56   ;;  %279 = vst.msk [vmem:[#allocation2 + $0x60] ss:$456 sm:$0x3] %vm133_vm2, %v276_v57  }
  0xa6   :  { %v882_v53 = vld [vmem:[#allocation2 + $0xb8] sm:$0x1]  ;;  %v1281_v54 = vld [vmem:[#allocation2 + $0x280] sm:$0x1]  ;;  %v1344_v58 = vld [vmem:[#allocation2 + $0x2c8] sm:$0x1]  ;;  %v283_v62 = vpop.permute.xlu0 %282  }
  0xa7   :  { %v945_v55 = vld [vmem:[#allocation2 + $0x100] sm:$0x1]  ;;  %887 = vst [vmem:[#allocation0 + $0x17] sm:$0x1] %v882_v53  ;;  %1286 = vst [vmem:[#allocation0 + $0x50] sm:$0x1] %v1281_v54  ;;  %v290_v63 = vpop.permute.xlu1 %289  }
  0xa8   :  { %950 = vst [vmem:[#allocation0 + $0x20] sm:$0x1] %v945_v55  ;;  %1349 = vst [vmem:[#allocation0 + $0x59] sm:$0x1] %v1344_v58  ;;  %v1008_v59 = vld [vmem:[#allocation2 + $0x148] sm:$0x1] }
  0xa9   :  { %v1407_v60 = vld [vmem:[#allocation2 + $0x310] sm:$0x1]  ;;  %1013 = vst [vmem:[#allocation0 + $0x29] sm:$0x1] %v1008_v59 }
  0xaa   :  { %1412 = vst [vmem:[#allocation0 + $0x62] sm:$0x1] %v1407_v60  ;;  %286 = vst.msk [vmem:[#allocation2 + $0xa8] ss:$456 sm:$0x3] %vm133_vm2, %v283_v62   ;;  %v366_v4 = vpop.permute.xlu0 %365  }
  0xab   :  { %v1071_v61 = vld [vmem:[#allocation2 + $0x190] sm:$0x1]  ;;  %v1470_v0 = vld [vmem:[#allocation2 + $0x358] sm:$0x1]  ;;  %v380_v5 = vpop.permute.xlu1 %379  }
  0xac   :  { %1076 = vst [vmem:[#allocation0 + $0x32] sm:$0x1] %v1071_v61  ;;  %293 = vst.msk [vmem:[#allocation2 + $0xf0] ss:$456 sm:$0x3] %vm133_vm2, %v290_v63  }
  0xad   :  { %1475 = vst [vmem:[#allocation0 + $0x6b] sm:$0x1] %v1470_v0  ;;  %v742_v1 = vld [vmem:[#allocation2 + $0x18] sm:$0x1]  ;;  %v1141_v2 = vld [vmem:[#allocation2 + $0x1e0] sm:$0x1] }
  0xae   :  { %v805_v3 = vld [vmem:[#allocation2 + $0x60] sm:$0x1]  ;;  %747 = vst [vmem:[#allocation0 + $0x3] sm:$0x1] %v742_v1  ;;  %1146 = vst [vmem:[#allocation0 + $0x3c] sm:$0x1] %v1141_v2 }
  0xaf   :  { %810 = vst [vmem:[#allocation0 + $0xc] sm:$0x1] %v805_v3  ;;  %v1204_v6 = vld [vmem:[#allocation2 + $0x228] sm:$0x1] }
  0xb0   :  { %369 = vst.msk [vmem:[#allocation2 + $0x40] ss:$456 sm:$0x3] %vm367_vm11, %v366_v4   ;;  %1209 = vst [vmem:[#allocation0 + $0x45] sm:$0x1] %v1204_v6  ;;  %v394_v10 = vpop.permute.xlu0 %393   ;;  %v410_v11 = vpop.permute.xlu1 %409   ;;  %vm472_vm11 = vcmask 466248  }
  0xb1   :  { %383 = vst.msk [vmem:[#allocation2 + $0x88] ss:$456 sm:$0x3] %vm381_vm12, %v380_v5   ;;  %v868_v7 = vld [vmem:[#allocation2 + $0xa8] sm:$0x1]  ;;  %vm483_vm12 = vcmask 326656  }
  0xb2   :  { %372 = vst.msk [vmem:[#allocation2 + $0x40] ss:$456 sm:$0x3] %vm370_vm13, %v366_v4   ;;  %v1267_v8 = vld [vmem:[#allocation2 + $0x270] sm:$0x1]  ;;  %vm497_vm13 = vcmask 318464  }
  0xb3   :  { %386 = vst.msk [vmem:[#allocation2 + $0x88] ss:$456 sm:$0x3] %vm384_vm14, %v380_v5   ;;  %v931_v9 = vld [vmem:[#allocation2 + $0xf0] sm:$0x1]  ;;  %vm486_vm14 = vcmask 466240  }
  0xb4   :  { %873 = vst [vmem:[#allocation0 + $0x15] sm:$0x1] %v868_v7  ;;  %1272 = vst [vmem:[#allocation0 + $0x4e] sm:$0x1] %v1267_v8  ;;  %v1330_v12 = vld [vmem:[#allocation2 + $0x2b8] sm:$0x1]  ;;  %v424_v13 = vpop.permute.xlu0 %423   ;;  %v438_v14 = vpop.permute.xlu1 %437  }
  0xb5   :  { %936 = vst [vmem:[#allocation0 + $0x1e] sm:$0x1] %v931_v9  ;;  %397 = vst.msk [vmem:[#allocation2 + $0xd0] ss:$456 sm:$0x3] %vm395_vm15, %v394_v10   ;;  %vm500_vm15 = vcmask 466232  }
  0xb6   :  { %413 = vst.msk [vmem:[#allocation2 + $0x2e0] ss:$-456 sm:$0x3] %vm411_vm0, %v410_v11   ;;  %1335 = vst [vmem:[#allocation0 + $0x57] sm:$0x1] %v1330_v12  ;;  %vm511_vm0 = vcmask 310272  }
  0xb7   :  { %400 = vst.msk [vmem:[#allocation2 + $0xd0] ss:$456 sm:$0x3] %vm398_vm1, %v394_v10   ;;  %vm527_vm1 = vcmask 302080  }
  0xb8   :  { %416 = vst.msk [vmem:[#allocation2 + $0x2e0] ss:$-456 sm:$0x3] %vm414_vm3, %v410_v11   ;;  %v452_v19 = vpop.permute.xlu0 %451   ;;  %v468_v20 = vpop.permute.xlu1 %467   ;;  %vm514_vm3 = vcmask 466224  }
  0xb9   :  { %v777_v15 = vld [vmem:[#allocation2 + $0x40] sm:$0x1]  ;;  %v1176_v16 = vld [vmem:[#allocation2 + $0x208] sm:$0x1] }
  0xba   :  { %v840_v17 = vld [vmem:[#allocation2 + $0x88] sm:$0x1]  ;;  %427 = vst.msk [vmem:[#allocation2 + $0x160] ss:$456 sm:$0x3] %vm425_vm4, %v424_v13   ;;  %vm530_vm4 = vcmask 466216  }
  0xbb   :  { %441 = vst.msk [vmem:[#allocation2 + $0x1a8] ss:$456 sm:$0x3] %vm439_vm5, %v438_v14   ;;  %782 = vst [vmem:[#allocation0 + $0x8] sm:$0x1] %v777_v15  ;;  %vm541_vm5 = vcmask 228352  }
  0xbc   :  { %1181 = vst [vmem:[#allocation0 + $0x41] sm:$0x1] %v1176_v16  ;;  %845 = vst [vmem:[#allocation0 + $0x11] sm:$0x1] %v840_v17  ;;  %v1239_v18 = vld [vmem:[#allocation2 + $0x250] sm:$0x1]  ;;  %v482_v25 = vpop.permute.xlu0 %481   ;;  %v496_v26 = vpop.permute.xlu1 %495  }
  0xbd   :  { %430 = vst.msk [vmem:[#allocation2 + $0x160] ss:$456 sm:$0x3] %vm428_vm6, %v424_v13   ;;  %1244 = vst [vmem:[#allocation0 + $0x4a] sm:$0x1] %v1239_v18  ;;  %vm555_vm6 = vcmask 220160  }
  0xbe   :  { %444 = vst.msk [vmem:[#allocation2 + $0x1a8] ss:$456 sm:$0x3] %vm442_vm7, %v438_v14   ;;  %v903_v21 = vld [vmem:[#allocation2 + $0xd0] sm:$0x1]  ;;  %vm544_vm7 = vcmask 466144  }
  0xbf   :  { %v1302_v22 = vld [vmem:[#allocation2 + $0x298] sm:$0x1]  ;;  %455 = vst.msk [vmem:[#allocation2 + $0x30] ss:$456 sm:$0x3] %vm453_vm8, %v452_v19   ;;  %vm558_vm8 = vcmask 466136  }
  0xc0   :  { %v966_v23 = vld [vmem:[#allocation2 + $0x118] sm:$0x1]  ;;  %471 = vst.msk [vmem:[#allocation2 + $0x240] ss:$-456 sm:$0x3] %vm469_vm9, %v468_v20   ;;  %v510_v31 = vpop.permute.xlu0 %509   ;;  %v526_v32 = vpop.permute.xlu1 %525   ;;  %vm569_vm9 = vcmask 211968  }
  0xc1   :  { %908 = vst [vmem:[#allocation0 + $0x1a] sm:$0x1] %v903_v21  ;;  %1307 = vst [vmem:[#allocation0 + $0x53] sm:$0x1] %v1302_v22  ;;  %v1365_v24 = vld [vmem:[#allocation2 + $0x2e0] sm:$0x1] }
  0xc2   :  { %971 = vst [vmem:[#allocation0 + $0x23] sm:$0x1] %v966_v23  ;;  %458 = vst.msk [vmem:[#allocation2 + $0x30] ss:$456 sm:$0x3] %vm456_vm10, %v452_v19   ;;  %vm585_vm10 = vcmask 203776  }
  0xc3   :  { %474 = vst.msk [vmem:[#allocation2 + $0x240] ss:$-456 sm:$0x3] %vm472_vm11, %v468_v20   ;;  %1370 = vst [vmem:[#allocation0 + $0x5c] sm:$0x1] %v1365_v24  ;;  %vm572_vm11 = vcmask 466128  }
  0xc4   :  { %v1029_v27 = vld [vmem:[#allocation2 + $0x160] sm:$0x1]  ;;  %v1428_v28 = vld [vmem:[#allocation2 + $0x328] sm:$0x1]  ;;  %v540_v37 = vpop.permute.xlu0 %539   ;;  %v554_v38 = vpop.permute.xlu1 %553  }
  0xc5   :  { %v1092_v29 = vld [vmem:[#allocation2 + $0x1a8] sm:$0x1]  ;;  %485 = vst.msk [vmem:[#allocation2 + $0xc0] ss:$456 sm:$0x3] %vm483_vm12, %v482_v25   ;;  %vm588_vm12 = vcmask 466120  }
  0xc6   :  { %499 = vst.msk [vmem:[#allocation2 + $0x108] ss:$456 sm:$0x3] %vm497_vm13, %v496_v26   ;;  %1034 = vst [vmem:[#allocation0 + $0x2c] sm:$0x1] %v1029_v27  ;;  %vm599_vm13 = vcmask 195584  }
  0xc7   :  { %1433 = vst [vmem:[#allocation0 + $0x65] sm:$0x1] %v1428_v28  ;;  %1097 = vst [vmem:[#allocation0 + $0x35] sm:$0x1] %v1092_v29  ;;  %v1491_v30 = vld [vmem:[#allocation2 + $0x370] sm:$0x1] }
  0xc8   :  { %488 = vst.msk [vmem:[#allocation2 + $0xc0] ss:$456 sm:$0x3] %vm486_vm14, %v482_v25   ;;  %1496 = vst [vmem:[#allocation0 + $0x6e] sm:$0x1] %v1491_v30  ;;  %v568_v43 = vpop.permute.xlu0 %567   ;;  %v584_v44 = vpop.permute.xlu1 %583   ;;  %vm613_vm14 = vcmask 187392  }
  0xc9   :  { %502 = vst.msk [vmem:[#allocation2 + $0x108] ss:$456 sm:$0x3] %vm500_vm15, %v496_v26   ;;  %v763_v33 = vld [vmem:[#allocation2 + $0x30] sm:$0x1]  ;;  %vm602_vm15 = vcmask 466112  }
  0xca   :  { %v1162_v34 = vld [vmem:[#allocation2 + $0x1f8] sm:$0x1]  ;;  %513 = vst.msk [vmem:[#allocation2 + $0x150] ss:$456 sm:$0x3] %vm511_vm0, %v510_v31   ;;  %vm616_vm0 = vcmask 466104  }
  0xcb   :  { %v826_v35 = vld [vmem:[#allocation2 + $0x78] sm:$0x1]  ;;  %529 = vst.msk [vmem:[#allocation2 + $0x360] ss:$-456 sm:$0x3] %vm527_vm1, %v526_v32   ;;  %vm626_vm1 = vcmask 113664  }
  0xcc   :  { %768 = vst [vmem:[#allocation0 + $0x6] sm:$0x1] %v763_v33  ;;  %1167 = vst [vmem:[#allocation0 + $0x3f] sm:$0x1] %v1162_v34  ;;  %v1225_v36 = vld [vmem:[#allocation2 + $0x240] sm:$0x1]  ;;  %v598_v49 = vpop.permute.xlu0 %597   ;;  %v612_v50 = vpop.permute.xlu1 %611  }
  0xcd   :  { %831 = vst [vmem:[#allocation0 + $0xf] sm:$0x1] %v826_v35  ;;  %516 = vst.msk [vmem:[#allocation2 + $0x150] ss:$456 sm:$0x3] %vm514_vm3, %v510_v31   ;;  %vm642_vm3 = vcmask 105472  }
  0xce   :  { %532 = vst.msk [vmem:[#allocation2 + $0x360] ss:$-456 sm:$0x3] %vm530_vm4, %v526_v32   ;;  %1230 = vst [vmem:[#allocation0 + $0x48] sm:$0x1] %v1225_v36  ;;  %vm629_vm4 = vcmask 466032  }
  0xcf   :  { %v889_v39 = vld [vmem:[#allocation2 + $0xc0] sm:$0x1]  ;;  %v1288_v40 = vld [vmem:[#allocation2 + $0x288] sm:$0x1] }
  0xd0   :  { %v952_v41 = vld [vmem:[#allocation2 + $0x108] sm:$0x1]  ;;  %543 = vst.msk [vmem:[#allocation2 + $0x20] ss:$456 sm:$0x3] %vm541_vm5, %v540_v37   ;;  %vm645_vm5 = vcmask 466024   ;;  %v625_v55 = vpop.permute.xlu0 %624   ;;  %v641_v56 = vpop.permute.xlu1 %640  }
  0xd1   :  { %557 = vst.msk [vmem:[#allocation2 + $0x68] ss:$456 sm:$0x3] %vm555_vm6, %v554_v38   ;;  %894 = vst [vmem:[#allocation0 + $0x18] sm:$0x1] %v889_v39  ;;  %vm656_vm6 = vcmask 97280  }
  0xd2   :  { %1293 = vst [vmem:[#allocation0 + $0x51] sm:$0x1] %v1288_v40  ;;  %957 = vst [vmem:[#allocation0 + $0x21] sm:$0x1] %v952_v41  ;;  %v1351_v42 = vld [vmem:[#allocation2 + $0x2d0] sm:$0x1] }
  0xd3   :  { %546 = vst.msk [vmem:[#allocation2 + $0x20] ss:$456 sm:$0x3] %vm544_vm7, %v540_v37   ;;  %1356 = vst [vmem:[#allocation0 + $0x5a] sm:$0x1] %v1351_v42  ;;  %vm670_vm7 = vcmask 89088  }
  0xd4   :  { %560 = vst.msk [vmem:[#allocation2 + $0x68] ss:$456 sm:$0x3] %vm558_vm8, %v554_v38   ;;  %v1015_v45 = vld [vmem:[#allocation2 + $0x150] sm:$0x1]  ;;  %vm659_vm8 = vcmask 466016   ;;  %v655_v61 = vpop.permute.xlu0 %654   ;;  %v669_v62 = vpop.permute.xlu1 %668  }
  0xd5   :  { %v1414_v46 = vld [vmem:[#allocation2 + $0x318] sm:$0x1]  ;;  %571 = vst.msk [vmem:[#allocation2 + $0xb0] ss:$456 sm:$0x3] %vm569_vm9, %v568_v43   ;;  %vm673_vm9 = vcmask 466008  }
  0xd6   :  { %v1078_v47 = vld [vmem:[#allocation2 + $0x198] sm:$0x1]  ;;  %587 = vst.msk [vmem:[#allocation2 + $0x2c0] ss:$-456 sm:$0x3] %vm585_vm10, %v584_v44   ;;  %vm684_vm10 = vcmask 80896  }
  0xd7   :  { %1020 = vst [vmem:[#allocation0 + $0x2a] sm:$0x1] %v1015_v45  ;;  %1419 = vst [vmem:[#allocation0 + $0x63] sm:$0x1] %v1414_v46  ;;  %v1477_v48 = vld [vmem:[#allocation2 + $0x360] sm:$0x1] }
  0xd8   :  { %1083 = vst [vmem:[#allocation0 + $0x33] sm:$0x1] %v1078_v47  ;;  %574 = vst.msk [vmem:[#allocation2 + $0xb0] ss:$456 sm:$0x3] %vm572_vm11, %v568_v43   ;;  %vm700_vm11 = vcmask 72704   ;;  %v683_v3 = vpop.permute.xlu0 %682   ;;  %v699_v4 = vpop.permute.xlu1 %698  }
  0xd9   :  { %590 = vst.msk [vmem:[#allocation2 + $0x2c0] ss:$-456 sm:$0x3] %vm588_vm12, %v584_v44   ;;  %1482 = vst [vmem:[#allocation0 + $0x6c] sm:$0x1] %v1477_v48  ;;  %vm687_vm12 = vcmask 466000  }
  0xda   :  { %v749_v51 = vld [vmem:[#allocation2 + $0x20] sm:$0x1]  ;;  %v1148_v52 = vld [vmem:[#allocation2 + $0x1e8] sm:$0x1] }
  0xdb   :  { %v812_v53 = vld [vmem:[#allocation2 + $0x68] sm:$0x1]  ;;  %601 = vst.msk [vmem:[#allocation2 + $0x140] ss:$456 sm:$0x3] %vm599_vm13, %v598_v49   ;;  %vm703_vm13 = vcmask 465992  }
  0xdc   :  { %615 = vst.msk [vmem:[#allocation2 + $0x188] ss:$456 sm:$0x3] %vm613_vm14, %v612_v50   ;;  %754 = vst [vmem:[#allocation0 + $0x4] sm:$0x1] %v749_v51  ;;  %vm714_vm14 = vcmask 64512   ;;  %v298_v9 = vpop.permute.xlu1 %297   ;;  %v713_v10 = vpop.permute.xlu0 %712  }
  0xdd   :  { %1153 = vst [vmem:[#allocation0 + $0x3d] sm:$0x1] %v1148_v52  ;;  %817 = vst [vmem:[#allocation0 + $0xd] sm:$0x1] %v812_v53  ;;  %v1211_v54 = vld [vmem:[#allocation2 + $0x230] sm:$0x1] }
  0xde   :  { %604 = vst.msk [vmem:[#allocation2 + $0x140] ss:$456 sm:$0x3] %vm602_vm15, %v598_v49   ;;  %1216 = vst [vmem:[#allocation0 + $0x46] sm:$0x1] %v1211_v54  ;;  %vm717_vm15 = vcmask 465984  }
  0xdf   :  { %618 = vst.msk [vmem:[#allocation2 + $0x188] ss:$456 sm:$0x3] %vm616_vm0, %v612_v50   ;;  %v875_v57 = vld [vmem:[#allocation2 + $0xb0] sm:$0x1] }
  0xe0   :  { %v1274_v58 = vld [vmem:[#allocation2 + $0x278] sm:$0x1]  ;;  %628 = vst.msk [vmem:[#allocation2 + $0x10] ss:$456 sm:$0x3] %vm626_vm1, %v625_v55   ;;  %v311_v15 = vpop.permute.xlu1 %310   ;;  %v305_v16 = vpop.permute.xlu0 %304  }
  0xe1   :  { %v938_v59 = vld [vmem:[#allocation2 + $0xf8] sm:$0x1]  ;;  %644 = vst.msk [vmem:[#allocation2 + $0x220] ss:$-456 sm:$0x3] %vm642_vm3, %v641_v56  }
  0xe2   :  { %880 = vst [vmem:[#allocation0 + $0x16] sm:$0x1] %v875_v57  ;;  %1279 = vst [vmem:[#allocation0 + $0x4f] sm:$0x1] %v1274_v58  ;;  %v1337_v60 = vld [vmem:[#allocation2 + $0x2c0] sm:$0x1] }
  0xe3   :  { %943 = vst [vmem:[#allocation0 + $0x1f] sm:$0x1] %v938_v59  ;;  %631 = vst.msk [vmem:[#allocation2 + $0x10] ss:$456 sm:$0x3] %vm629_vm4, %v625_v55  }
  0xe4   :  { %647 = vst.msk [vmem:[#allocation2 + $0x220] ss:$-456 sm:$0x3] %vm645_vm5, %v641_v56   ;;  %1342 = vst [vmem:[#allocation0 + $0x58] sm:$0x1] %v1337_v60  ;;  %v326_v23 = vpop.permute.xlu1 %325   ;;  %v318_v24 = vpop.permute.xlu0 %317  }
  0xe5   :  { %v1001_v63 = vld [vmem:[#allocation2 + $0x140] sm:$0x1]  ;;  %v1400_v0 = vld [vmem:[#allocation2 + $0x308] sm:$0x1] }
  0xe6   :  { %v1064_v1 = vld [vmem:[#allocation2 + $0x188] sm:$0x1]  ;;  %658 = vst.msk [vmem:[#allocation2 + $0xa0] ss:$456 sm:$0x3] %vm656_vm6, %v655_v61  }
  0xe7   :  { %672 = vst.msk [vmem:[#allocation2 + $0xe8] ss:$456 sm:$0x3] %vm670_vm7, %v669_v62   ;;  %1006 = vst [vmem:[#allocation0 + $0x28] sm:$0x1] %v1001_v63 }
  0xe8   :  { %1405 = vst [vmem:[#allocation0 + $0x61] sm:$0x1] %v1400_v0  ;;  %1069 = vst [vmem:[#allocation0 + $0x31] sm:$0x1] %v1064_v1  ;;  %v1463_v2 = vld [vmem:[#allocation2 + $0x350] sm:$0x1]  ;;  %v340_v30 = vpop.permute.xlu1 %339   ;;  %v333_v31 = vpop.permute.xlu0 %332  }
  0xe9   :  { %661 = vst.msk [vmem:[#allocation2 + $0xa0] ss:$456 sm:$0x3] %vm659_vm8, %v655_v61   ;;  %1468 = vst [vmem:[#allocation0 + $0x6a] sm:$0x1] %v1463_v2 }
  0xea   :  { %675 = vst.msk [vmem:[#allocation2 + $0xe8] ss:$456 sm:$0x3] %vm673_vm9, %v669_v62   ;;  %v735_v5 = vld [vmem:[#allocation2 + $0x10] sm:$0x1] }
  0xeb   :  { %v1134_v6 = vld [vmem:[#allocation2 + $0x1d8] sm:$0x1]  ;;  %686 = vst.msk [vmem:[#allocation2 + $0x130] ss:$456 sm:$0x3] %vm684_vm10, %v683_v3  }
  0xec   :  { %v798_v7 = vld [vmem:[#allocation2 + $0x58] sm:$0x1]  ;;  %702 = vst.msk [vmem:[#allocation2 + $0x340] ss:$-456 sm:$0x3] %vm700_vm11, %v699_v4   ;;  %v355_v36 = vpop.permute.xlu1 %354   ;;  %v347_v37 = vpop.permute.xlu0 %346  }
  0xed   :  { %740 = vst [vmem:[#allocation0 + $0x2] sm:$0x1] %v735_v5  ;;  %1139 = vst [vmem:[#allocation0 + $0x3b] sm:$0x1] %v1134_v6  ;;  %v1197_v8 = vld [vmem:[#allocation2 + $0x220] sm:$0x1] }
  0xee   :  { %803 = vst [vmem:[#allocation0 + $0xb] sm:$0x1] %v798_v7  ;;  %689 = vst.msk [vmem:[#allocation2 + $0x130] ss:$456 sm:$0x3] %vm687_vm12, %v683_v3  }
  0xef   :  { %705 = vst.msk [vmem:[#allocation2 + $0x340] ss:$-456 sm:$0x3] %vm703_vm13, %v699_v4   ;;  %1202 = vst [vmem:[#allocation0 + $0x44] sm:$0x1] %v1197_v8 }
  0xf0   :  { %v861_v11 = vld [vmem:[#allocation2 + $0xa0] sm:$0x1]  ;;  %v1260_v12 = vld [vmem:[#allocation2 + $0x268] sm:$0x1] }
  0xf1   :  { %v924_v13 = vld [vmem:[#allocation2 + $0xe8] sm:$0x1]  ;;  %301 = vst.msk [vmem:[#allocation2 + $0x300] ss:$-456 sm:$0x3] %vm133_vm2, %v298_v9  }
  0xf2   :  { %716 = vst.msk [vmem:[#allocation2 + $0x1c0] ss:$456 sm:$0x3] %vm714_vm14, %v713_v10   ;;  %866 = vst [vmem:[#allocation0 + $0x14] sm:$0x1] %v861_v11 }
  0xf3   :  { %1265 = vst [vmem:[#allocation0 + $0x4d] sm:$0x1] %v1260_v12  ;;  %929 = vst [vmem:[#allocation0 + $0x1d] sm:$0x1] %v924_v13  ;;  %v1323_v14 = vld [vmem:[#allocation2 + $0x2b0] sm:$0x1] }
  0xf4   :  { %719 = vst.msk [vmem:[#allocation2 + $0x1c0] ss:$456 sm:$0x3] %vm717_vm15, %v713_v10   ;;  %1328 = vst [vmem:[#allocation0 + $0x56] sm:$0x1] %v1323_v14 }
  0xf5   :  { %v987_v17 = vld [vmem:[#allocation2 + $0x130] sm:$0x1]  ;;  %v1386_v18 = vld [vmem:[#allocation2 + $0x2f8] sm:$0x1] }
  0xf6   :  { %v1050_v19 = vld [vmem:[#allocation2 + $0x178] sm:$0x1]  ;;  %314 = vst.msk [vmem:[#allocation2 + $0x8] ss:$456 sm:$0x3] %vm133_vm2, %v311_v15  }
  0xf7   :  { %308 = vst.msk [vmem:[#allocation2 + $0x180] ss:$456 sm:$0x3] %vm133_vm2, %v305_v16   ;;  %992 = vst [vmem:[#allocation0 + $0x26] sm:$0x1] %v987_v17 }
  0xf8   :  { %1391 = vst [vmem:[#allocation0 + $0x5f] sm:$0x1] %v1386_v18  ;;  %1055 = vst [vmem:[#allocation0 + $0x2f] sm:$0x1] %v1050_v19  ;;  %v1449_v20 = vld [vmem:[#allocation2 + $0x340] sm:$0x1] }
  0xf9   :  { %1454 = vst [vmem:[#allocation0 + $0x68] sm:$0x1] %v1449_v20  ;;  %v994_v21 = vld [vmem:[#allocation2 + $0x138] sm:$0x1]  ;;  %v1393_v22 = vld [vmem:[#allocation2 + $0x300] sm:$0x1] }
  0xfa   :  { %999 = vst [vmem:[#allocation0 + $0x27] sm:$0x1] %v994_v21  ;;  %1398 = vst [vmem:[#allocation0 + $0x60] sm:$0x1] %v1393_v22 }
  0xfb   :  { %v1113_v25 = vld [vmem:[#allocation2 + $0x1c0] sm:$0x1]  ;;  %v1512_v26 = vld [vmem:[#allocation2 + $0x388] sm:$0x1] }
  0xfc   :  { %329 = vst.msk [vmem:[#allocation2 + $0x260] ss:$-456 sm:$0x3] %vm133_vm2, %v326_v23   ;;  %321 = vst.msk [vmem:[#allocation2 + $0x50] ss:$456 sm:$0x3] %vm133_vm2, %v318_v24  }
  0xfd   :  { %1118 = vst [vmem:[#allocation0 + $0x38] sm:$0x1] %v1113_v25  ;;  %1517 = vst [vmem:[#allocation0 + $0x71] sm:$0x1] %v1512_v26  ;;  %v729_v27 = vld [vmem:[#allocation2 + $0x8] sm:$0x1] }
  0xfe   :  { %v1127_v28 = vld [vmem:[#allocation2 + $0x1d0] sm:$0x1]  ;;  %v1057_v29 = vld [vmem:[#allocation2 + $0x180] sm:$0x1]  ;;  %733 = vst [vmem:[#allocation0 + $0x1] sm:$0x1] %v729_v27 }
  0xff   :  { %1132 = vst [vmem:[#allocation0 + $0x3a] sm:$0x1] %v1127_v28  ;;  %1062 = vst [vmem:[#allocation0 + $0x30] sm:$0x1] %v1057_v29  ;;  %v1456_v32 = vld [vmem:[#allocation2 + $0x348] sm:$0x1] }
 0x100   :  { %343 = vst.msk [vmem:[#allocation2 + $0x128] ss:$456 sm:$0x3] %vm133_vm2, %v340_v30   ;;  %336 = vst.msk [vmem:[#allocation2 + $0xe0] ss:$456 sm:$0x3] %vm133_vm2, %v333_v31  }
 0x101   :  { %1461 = vst [vmem:[#allocation0 + $0x69] sm:$0x1] %v1456_v32  ;;  %358 = vst.msk [vmem:[#allocation2 + $0x380] ss:$-456 sm:$0x3] %vm133_vm2, %v355_v36  }
 0x102   :  { %350 = vst.msk [vmem:[#allocation2 + $0x170] ss:$456 sm:$0x3] %vm133_vm2, %v347_v37  }
 0x103   :  { %v854_v33 = vld [vmem:[#allocation2 + $0x98] sm:$0x1]  ;;  %v1253_v34 = vld [vmem:[#allocation2 + $0x260] sm:$0x1]  ;;  %v791_v35 = vld [vmem:[#allocation2 + $0x50] sm:$0x1] }
 0x104   :  { %859 = vst [vmem:[#allocation0 + $0x13] sm:$0x1] %v854_v33  ;;  %1258 = vst [vmem:[#allocation0 + $0x4c] sm:$0x1] %v1253_v34  ;;  %v1190_v38 = vld [vmem:[#allocation2 + $0x218] sm:$0x1] }
 0x105   :  { %796 = vst [vmem:[#allocation0 + $0xa] sm:$0x1] %v791_v35  ;;  %1195 = vst [vmem:[#allocation0 + $0x43] sm:$0x1] %v1190_v38 }
 0x107   :  { %v980_v39 = vld [vmem:[#allocation2 + $0x128] sm:$0x1]  ;;  %v1379_v40 = vld [vmem:[#allocation2 + $0x2f0] sm:$0x1]  ;;  %v917_v41 = vld [vmem:[#allocation2 + $0xe0] sm:$0x1] }
 0x108   :  { %985 = vst [vmem:[#allocation0 + $0x25] sm:$0x1] %v980_v39  ;;  %1384 = vst [vmem:[#allocation0 + $0x5e] sm:$0x1] %v1379_v40  ;;  %v1316_v42 = vld [vmem:[#allocation2 + $0x2a8] sm:$0x1] }
 0x109   :  { %922 = vst [vmem:[#allocation0 + $0x1c] sm:$0x1] %v917_v41  ;;  %1321 = vst [vmem:[#allocation0 + $0x55] sm:$0x1] %v1316_v42  ;;  %v1106_v43 = vld [vmem:[#allocation2 + $0x1b8] sm:$0x1] }
 0x10a   :  { %v1505_v44 = vld [vmem:[#allocation2 + $0x380] sm:$0x1]  ;;  %v1043_v45 = vld [vmem:[#allocation2 + $0x170] sm:$0x1]  ;;  %1111 = vst [vmem:[#allocation0 + $0x37] sm:$0x1] %v1106_v43 }
 0x10b   :  { %1510 = vst [vmem:[#allocation0 + $0x70] sm:$0x1] %v1505_v44  ;;  %1048 = vst [vmem:[#allocation0 + $0x2e] sm:$0x1] %v1043_v45  ;;  %v1442_v46 = vld [vmem:[#allocation2 + $0x338] sm:$0x1] }
 0x10c   :  { %1447 = vst [vmem:[#allocation0 + $0x67] sm:$0x1] %v1442_v46 }
 0x10d   :  { %1757 = shalt.err (!%p1754_p4)
}
 0x10e   :  { %1525 = dma.vmem_to_hbm [thread:$0]  %s1523_s17, 1824, %s1949_s1, [#allocation1]  }
 0x10f   :  { %1766 = dma.done.wait [#allocation1], 1824  }
 0x110   :  { %1767 = vsyncadd [#allocation1], 4294965472 }
 0x111   :  { %1527 = vsyncpa [#allocation1], 1 }

// kernel: forward_eval.1
= control target key start
LH: loop header
LB: loop body
LE: loop exit
PB: predicated region body
PF: predicated region fallthrough
CT: control target
= control target key end

     0   :  { %14 = vsyncpa [#allocation5], 0  ;;  %s6213_s0 = inlined_call_operand.vmem [shape: f32[256,128], index: 0, kind: input, shape index: {}]   ;;  %s6214_s1 = inlined_call_operand.vmem [shape: f32[128,256], index: 1, kind: input, shape index: {}]   ;;  %s6215_s2 = inlined_call_operand.vmem [shape: f32[128,1], index: 2, kind: input, shape index: {}]   ;;  %s6216_s3 = inlined_call_operand.vmem [shape: f32[8,128], index: 3, kind: input, shape index: {}]   ;;  %s6217_s4 = inlined_call_operand.hbm [shape: f32[1,128], index: 4, kind: input, shape index: {}]   ;;  %s6218_s5 = inlined_call_operand.hbm [shape: f32[8,128], index: 5, kind: input, shape index: {}]   ;;  %s6219_s6 = inlined_call_operand.hbm [shape: f32[128,6656], index: 6, kind: input, shape index: {}]   ;;  %s6220_s7 = inlined_call_operand.<no memory space> [shape: f32[1,1], index: 7, kind: input, shape index: {}]   ;;  %s6221_s8 = inlined_call_operand.vmem [shape: f32[4,6656], index: 8, kind: output, shape index: {}]  }
   0x1   :  { %15 = vsyncpa [#allocation7], 0  ;;  %s5359_s27 = smov [#allocation6]   ;;  %s5360_s29 = smov [#allocation4]  }
   0x2   :  { %s40_s28 = sshll.u32 %s5359_s27, 4  ;;  %s30_s30 = sshll.u32 %s5360_s29, 4  ;;  %s41_s28 = int_to_ptr.vmem [resolvable:$true] %s40_s28  ;;  %s31_s30 = int_to_ptr.vmem [resolvable:$true] %s30_s30 }
   0x3   :  { %s5303_s9 = scalar_lea.vmem %s41_s28, 128  ;;  %p5308_p1 = scmp.lt.s32.totalorder %s41_s28, %s41_s28 }
   0x4   :  { %p5304_p0 = scmp.ne.s32.totalorder %s41_s28, %s5303_s9  ;;  %p5309_p2 = scmp.lt.s32.totalorder %s5303_s9, %s5303_s9 }
   0x6   :  { %p5310_p3 = por %p5309_p2, %p5308_p1 }
   0x8   :  { %p5311_p4 = pnand %p5310_p3, %p5304_p0 }
   0xa   :  { %5314 = shalt.err (!%p5311_p4)
}
   0xb   :  { %43 = dma.hbm_to_vmem [thread:$0]  %s6218_s5, 128, %s41_s28, [#allocation7]  }
   0xc   :  { %s5323_s12 = scalar_lea.vmem %s31_s30, 16  ;;  %s5327_s13 = scalar_lea.vmem %s31_s30, 32 }
   0xd   :  { %p5324_p5 = scmp.ne.s32.totalorder %s31_s30, %s5323_s12  ;;  %p5328_p6 = scmp.lt.s32.totalorder %s31_s30, %s31_s30 }
   0xe   :  { %p5329_p7 = scmp.lt.s32.totalorder %s5327_s13, %s5323_s12 }
  0x10   :  { %p5330_p8 = por %p5329_p7, %p5328_p6 }
  0x12   :  { %p5331_p9 = pnand %p5330_p8, %p5324_p5 }
  0x14   :  { %5334 = shalt.err (!%p5331_p9)
}
  0x15   :  { %33 = dma.hbm_to_vmem [thread:$0]  %s6217_s4, 16, %s31_s30, [#allocation5]  }
  0x16   :  { %s5361_s16 = smov [#allocation8]  }
  0x17   :  { %s49_s17 = sshll.u32 %s5361_s16, 4  ;;  %s50_s17 = int_to_ptr.vmem [resolvable:$true] %s49_s17 }
  0x18   :  { %s5343_s18 = scalar_lea.vmem %s50_s17, 106496  ;;  %p5348_p11 = scmp.lt.s32.totalorder %s50_s17, %s50_s17 }
  0x19   :  { %p5344_p10 = scmp.ne.s32.totalorder %s50_s17, %s5343_s18  ;;  %p5349_p12 = scmp.lt.s32.totalorder %s5343_s18, %s5343_s18 }
  0x1b   :  { %p5350_p13 = por %p5349_p12, %p5348_p11 }
  0x1d   :  { %p5351_p0 = pnand %p5350_p13, %p5344_p10 }
  0x1f   :  { %5354 = shalt.err (!%p5351_p0)
}
  0x20   :  { %s5362_s5 = smov 6656   ;;  %s5363_s19 = smov 416  }
  0x21   :  { %55 = dma.hbm_to_vmem [thread:$0]  %s6219_s6, 106496, %s50_s17, [#allocation7], %s5362_s5, %s5362_s5, %s5363_s19  }
  0x22   :  { %5355 = dma.done.wait [#allocation5], 16  }
  0x23   :  { %5356 = vsyncadd [#allocation5], 4294967280 }
  0x24   :  { %5357 = dma.done.wait [#allocation7], 106624  }
  0x25   :  { %5358 = vsyncadd [#allocation7], 4294860672  ;;  %v5364_v0 = vmov 0   ;;  %v130_v1 = vld [vmem:[%s6213_s0 + $0xf8] sm:$0xff]  ;;  %v129_v3 = vld [vmem:[%s6213_s0 + $0xf0] sm:$0xff]  ;;  %vm5366_vm0 = vmmov 0  }
  0x26   :  { %5075 = vset.pattern.permute.xlu1 %v5364_v0  ;;  %5074 = vset.pattern.permute.xlu0 %v5364_v0  ;;  %v114_v2 = vld [vmem:[%s6213_s0 + $0x78] sm:$0xff]  ;;  %v113_v4 = vld [vmem:[%s6213_s0 + $0x70] sm:$0xff]  ;;  %v128_v5 = vld [vmem:[%s6213_s0 + $0xe8] sm:$0xff]  ;;  %s5368_s28 = smov 1e-12  }
  0x27   :  { %4926 = vmatprep.subr.mxu0 %v130_v1  ;;  %v112_v6 = vld [vmem:[%s6213_s0 + $0x68] sm:$0xff]  ;;  %v127_v7 = vld [vmem:[%s6213_s0 + $0xe0] sm:$0xff]  ;;  %v126_v9 = vld [vmem:[%s6213_s0 + $0xd8] sm:$0xff] }
  0x28   :  { %4927 = vmatpush3.msra.mxu0 %v114_v2  ;;  %v111_v8 = vld [vmem:[%s6213_s0 + $0x60] sm:$0xff]  ;;  %v110_v10 = vld [vmem:[%s6213_s0 + $0x58] sm:$0xff]  ;;  %v125_v11 = vld [vmem:[%s6213_s0 + $0xd0] sm:$0xff] }
  0x29   :  { %4928 = vmatprep.subr.mxu0 %v129_v3  ;;  %v109_v12 = vld [vmem:[%s6213_s0 + $0x50] sm:$0xff]  ;;  %v124_v13 = vld [vmem:[%s6213_s0 + $0xc8] sm:$0xff]  ;;  %v123_v16 = vld [vmem:[%s6213_s0 + $0xc0] sm:$0xff] }
  0x2a   :  { %4929 = vmatpush3.msra.mxu0 %v113_v4  ;;  %v68_v14 = vld [vmem:[%s6214_s1 + $0x8] sm:$0xff]  ;;  %v107_v17 = vld [vmem:[%s6213_s0 + $0x40] sm:$0xff]  ;;  %v122_v18 = vld [vmem:[%s6213_s0 + $0xb8] sm:$0xff] }
  0x2b   :  { %4930 = vmatprep.subr.mxu0 %v128_v5  ;;  %v108_v15 = vld [vmem:[%s6213_s0 + $0x48] sm:$0xff]  ;;  %291 = vmatprep.mubr.f32.mxu0 %v68_v14  ;;  %v106_v19 = vld [vmem:[%s6213_s0 + $0x38] sm:$0xff]  ;;  %v121_v20 = vld [vmem:[%s6213_s0 + $0xb0] sm:$0xff] }
  0x2c   :  { %4931 = vmatpush3.msra.mxu0 %v112_v6  ;;  %v105_v21 = vld [vmem:[%s6213_s0 + $0x30] sm:$0xff]  ;;  %v120_v22 = vld [vmem:[%s6213_s0 + $0xa8] sm:$0xff]  ;;  %v146_v25 = vld [vmem:[%s6215_s2 + $0x78] sm:$0xff] }
  0x2d   :  { %4932 = vmatprep.subr.mxu0 %v127_v7  ;;  %v144_v23 = vld [vmem:[%s6215_s2 + $0x68] sm:$0xff]  ;;  %v119_v26 = vld [vmem:[%s6213_s0 + $0xa0] sm:$0xff]  ;;  %224 = vperm.xlu0 %5074, %v146_v25   ;;  %v145_v29 = vld [vmem:[%s6215_s2 + $0x70] sm:$0xff] }
  0x2e   :  { %4933 = vmatpush3.msra.mxu0 %v111_v8  ;;  %v104_v24 = vld [vmem:[%s6213_s0 + $0x28] sm:$0xff]  ;;  %214 = vperm.xlu1 %5075, %v144_v23   ;;  %v143_v27 = vld [vmem:[%s6215_s2 + $0x60] sm:$0xff]  ;;  %v118_v30 = vld [vmem:[%s6213_s0 + $0x98] sm:$0xff] }
  0x2f   :  { %4934 = vmatprep.subr.mxu0 %v126_v9  ;;  %v103_v28 = vld [vmem:[%s6213_s0 + $0x20] sm:$0xff]  ;;  %v102_v31 = vld [vmem:[%s6213_s0 + $0x18] sm:$0xff]  ;;  %v117_v32 = vld [vmem:[%s6213_s0 + $0x90] sm:$0xff] }
  0x30   :  { %4935 = vmatpush3.msra.mxu0 %v110_v10  ;;  %v141_v33 = vld [vmem:[%s6215_s2 + $0x50] sm:$0xff]  ;;  %v142_v35 = vld [vmem:[%s6215_s2 + $0x58] sm:$0xff]  ;;  %v116_v36 = vld [vmem:[%s6213_s0 + $0x88] sm:$0xff] }
  0x31   :  { %4936 = vmatprep.subr.mxu0 %v125_v11  ;;  %219 = vperm.xlu0 %5074, %v145_v29   ;;  %v101_v34 = vld [vmem:[%s6213_s0 + $0x10] sm:$0xff]  ;;  %v100_v37 = vld [vmem:[%s6213_s0 + $0x8] sm:$0xff]  ;;  %v115_v38 = vld [vmem:[%s6213_s0 + $0x80] sm:$0xff] }
  0x32   :  { %4937 = vmatpush3.msra.mxu0 %v109_v12  ;;  %209 = vperm.xlu1 %5075, %v143_v27   ;;  %v139_v39 = vld [vmem:[%s6215_s2 + $0x40] sm:$0xff]  ;;  %v140_v41 = vld [vmem:[%s6215_s2 + $0x48] sm:$0xff]  ;;  %v70_v43 = vld [vmem:[%s6214_s1 + $0x18] sm:$0xff] }
  0x33   :  { %4938 = vmatprep.subr.mxu0 %v124_v13  ;;  %v99_v40 = vld [vmem:[%s6213_s0] sm:$0xff]  ;;  %v137_v44 = vld [vmem:[%s6215_s2 + $0x30] sm:$0xff]  ;;  %v138_v45 = vld [vmem:[%s6215_s2 + $0x38] sm:$0xff] }
  0x34   :  { %4939 = vmatpush3.msra.mxu0 %v108_v15  ;;  %v67_v42 = vld [vmem:[%s6214_s1] sm:$0xff]  ;;  %v69_v46 = vld [vmem:[%s6214_s1 + $0x10] sm:$0xff]  ;;  %v72_v47 = vld [vmem:[%s6214_s1 + $0x28] sm:$0xff] }
  0x35   :  { %4940 = vmatprep.subr.mxu0 %v123_v16  ;;  %204 = vperm.xlu0 %5074, %v142_v35   ;;  %v135_v48 = vld [vmem:[%s6215_s2 + $0x20] sm:$0xff]  ;;  %v136_v49 = vld [vmem:[%s6215_s2 + $0x28] sm:$0xff]  ;;  %v74_v51 = vld [vmem:[%s6214_s1 + $0x38] sm:$0xff] }
  0x36   :  { %4941 = vmatpush3.msra.mxu0 %v107_v17  ;;  %199 = vperm.xlu1 %5075, %v141_v33   ;;  %v71_v50 = vld [vmem:[%s6214_s1 + $0x20] sm:$0xff]  ;;  %v133_v52 = vld [vmem:[%s6215_s2 + $0x10] sm:$0xff]  ;;  %v134_v53 = vld [vmem:[%s6215_s2 + $0x18] sm:$0xff]  ;;  %v5365_v17 = vmov 0.0  }
  0x37   :  { %4942 = vmatprep.subr.mxu0 %v122_v18  ;;  %v73_v54 = vld [vmem:[%s6214_s1 + $0x30] sm:$0xff]  ;;  %v76_v55 = vld [vmem:[%s6214_s1 + $0x48] sm:$0xff]  ;;  %v131_v56 = vld [vmem:[%s6215_s2] sm:$0xff]  ;;  %5023 = vmatprep.subr.mxu1 %v5365_v17 }
  0x38   :  { %4943 = vmatpush3.msra.mxu0 %v106_v19  ;;  %v132_v57 = vld [vmem:[%s6215_s2 + $0x8] sm:$0xff]  ;;  %v75_v58 = vld [vmem:[%s6214_s1 + $0x40] sm:$0xff]  ;;  %v78_v59 = vld [vmem:[%s6214_s1 + $0x58] sm:$0xff]  ;;  %5055 = vmatprep.mubr.msk.f32.mxu1 %vm5366_vm0, %v5365_v17 }
  0x39   :  { %4944 = vmatprep.subr.mxu0 %v121_v20  ;;  %194 = vperm.xlu0 %5074, %v140_v41   ;;  %v77_v60 = vld [vmem:[%s6214_s1 + $0x50] sm:$0xff]  ;;  %v80_v61 = vld [vmem:[%s6214_s1 + $0x68] sm:$0xff]  ;;  %v79_v62 = vld [vmem:[%s6214_s1 + $0x60] sm:$0xff] }
  0x3a   :  { %4945 = vmatpush3.msra.mxu0 %v105_v21  ;;  %189 = vperm.xlu1 %5075, %v139_v39   ;;  %v82_v63 = vld [vmem:[%s6214_s1 + $0x78] sm:$0xff]  ;;  %v81_v0 = vld [vmem:[%s6214_s1 + $0x70] sm:$0xff]  ;;  %v84_v1 = vld [vmem:[%s6214_s1 + $0x88] sm:$0xff] }
  0x3b   :  { %4946 = vmatprep.subr.mxu0 %v120_v22  ;;  %v83_v2 = vld [vmem:[%s6214_s1 + $0x80] sm:$0xff]  ;;  %v86_v3 = vld [vmem:[%s6214_s1 + $0x98] sm:$0xff]  ;;  %v85_v4 = vld [vmem:[%s6214_s1 + $0x90] sm:$0xff] }
  0x3c   :  { %4947 = vmatpush3.msra.mxu0 %v104_v24  ;;  %v88_v5 = vld [vmem:[%s6214_s1 + $0xa8] sm:$0xff]  ;;  %v87_v6 = vld [vmem:[%s6214_s1 + $0xa0] sm:$0xff]  ;;  %v90_v7 = vld [vmem:[%s6214_s1 + $0xb8] sm:$0xff] }
  0x3d   :  { %4948 = vmatprep.subr.mxu0 %v119_v26  ;;  %184 = vperm.xlu0 %5074, %v138_v45   ;;  %v89_v8 = vld [vmem:[%s6214_s1 + $0xb0] sm:$0xff]  ;;  %v92_v9 = vld [vmem:[%s6214_s1 + $0xc8] sm:$0xff]  ;;  %v91_v10 = vld [vmem:[%s6214_s1 + $0xc0] sm:$0xff] }
  0x3e   :  { %4949 = vmatpush3.msra.mxu0 %v103_v28  ;;  %179 = vperm.xlu1 %5075, %v137_v44   ;;  %v94_v11 = vld [vmem:[%s6214_s1 + $0xd8] sm:$0xff]  ;;  %v93_v12 = vld [vmem:[%s6214_s1 + $0xd0] sm:$0xff]  ;;  %v96_v13 = vld [vmem:[%s6214_s1 + $0xe8] sm:$0xff] }
  0x3f   :  { %4950 = vmatprep.subr.mxu0 %v118_v30  ;;  %v95_v14 = vld [vmem:[%s6214_s1 + $0xe0] sm:$0xff]  ;;  %v98_v15 = vld [vmem:[%s6214_s1 + $0xf8] sm:$0xff]  ;;  %v97_v16 = vld [vmem:[%s6214_s1 + $0xf0] sm:$0xff] }
  0x40   :  { %4951 = vmatpush3.msra.mxu0 %v102_v31 }
  0x41   :  { %4952 = vmatprep.subr.mxu0 %v117_v32  ;;  %174 = vperm.xlu0 %5074, %v136_v49  }
  0x42   :  { %4953 = vmatpush3.msra.mxu0 %v101_v34  ;;  %169 = vperm.xlu1 %5075, %v135_v48  }
  0x43   :  { %4954 = vmatprep.subr.mxu0 %v116_v36 }
  0x44   :  { %4955 = vmatpush3.msra.mxu0 %v100_v37 }
  0x45   :  { %4956 = vmatprep.subr.mxu0 %v115_v38  ;;  %164 = vperm.xlu0 %5074, %v134_v53  }
  0x46   :  { %4957 = vmatpush3.msra.mxu0 %v99_v40  ;;  %159 = vperm.xlu1 %5075, %v133_v52  }
  0x47   :  { %292 = vmatmul.mubr.f32.vlgmr.msra.gmra.mxu0 %v67_v42 }
  0x48   :  { %296 = vmatprep.mubr.f32.mxu0 %v70_v43 }
  0x49   :  { %154 = vperm.xlu0 %5074, %v132_v57  }
  0x4a   :  { %149 = vperm.xlu1 %5075, %v131_v56  }
  0x4b   :  { %297 = vmatmul.mubr.f32.gmra.mxu0 %v69_v46 }
  0x4c   :  { %301 = vmatprep.mubr.f32.mxu0 %v72_v47 }
  0x4f   :  { %302 = vmatmul.mubr.f32.gmra.mxu0 %v71_v50 }
  0x50   :  { %306 = vmatprep.mubr.f32.mxu0 %v74_v51 }
  0x53   :  { %307 = vmatmul.mubr.f32.gmra.mxu0 %v73_v54 }
  0x54   :  { %311 = vmatprep.mubr.f32.mxu0 %v76_v55 }
  0x57   :  { %312 = vmatmul.mubr.f32.gmra.mxu0 %v75_v58 }
  0x58   :  { %316 = vmatprep.mubr.f32.mxu0 %v78_v59 }
  0x5b   :  { %317 = vmatmul.mubr.f32.gmra.mxu0 %v77_v60 }
  0x5c   :  { %321 = vmatprep.mubr.f32.mxu0 %v80_v61 }
  0x5f   :  { %322 = vmatmul.mubr.f32.gmra.mxu0 %v79_v62 }
  0x60   :  { %326 = vmatprep.mubr.f32.mxu0 %v82_v63 }
  0x63   :  { %327 = vmatmul.mubr.f32.gmra.mxu0 %v81_v0 }
  0x64   :  { %331 = vmatprep.mubr.f32.mxu0 %v84_v1 }
  0x67   :  { %332 = vmatmul.mubr.f32.gmra.mxu0 %v83_v2 }
  0x68   :  { %336 = vmatprep.mubr.f32.mxu0 %v86_v3 }
  0x6b   :  { %337 = vmatmul.mubr.f32.gmra.mxu0 %v85_v4 }
  0x6c   :  { %341 = vmatprep.mubr.f32.mxu0 %v88_v5 }
  0x6f   :  { %342 = vmatmul.mubr.f32.gmra.mxu0 %v87_v6 }
  0x70   :  { %346 = vmatprep.mubr.f32.mxu0 %v90_v7 }
  0x73   :  { %347 = vmatmul.mubr.f32.gmra.mxu0 %v89_v8 }
  0x74   :  { %351 = vmatprep.mubr.f32.mxu0 %v92_v9 }
  0x77   :  { %352 = vmatmul.mubr.f32.gmra.mxu0 %v91_v10 }
  0x78   :  { %356 = vmatprep.mubr.f32.mxu0 %v94_v11 }
  0x7b   :  { %357 = vmatmul.mubr.f32.gmra.mxu0 %v93_v12 }
  0x7c   :  { %361 = vmatprep.mubr.f32.mxu0 %v96_v13 }
  0x7f   :  { %362 = vmatmul.mubr.f32.gmra.mxu0 %v95_v14 }
  0x80   :  { %366 = vmatprep.mubr.f32.mxu0 %v98_v15 }
  0x83   :  { %367 = vmatmul.mubr.f32.gmra.mxu0 %v97_v16 }
  0x84   :  { %1508 = vmatprep.mubr.f32.mxu0 %v5365_v17 }
  0xa8   :  { %v225_v46 = vpop.permute.xlu0 %224 }
  0xa9   :  { %v215_v48 = vpop.permute.xlu1 %214 }
  0xac   :  { %v220_v51 = vpop.permute.xlu0 %219 }
  0xad   :  { %v210_v53 = vpop.permute.xlu1 %209 }
  0xb0   :  { %v205_v56 = vpop.permute.xlu0 %204 }
  0xb1   :  { %v200_v58 = vpop.permute.xlu1 %199 }
  0xb4   :  { %v195_v0 = vpop.permute.xlu0 %194 }
  0xb5   :  { %v190_v4 = vpop.permute.xlu1 %189 }
  0xb8   :  { %v185_v11 = vpop.permute.xlu0 %184 }
  0xb9   :  { %v180_v15 = vpop.permute.xlu1 %179 }
 0x107   :  { %v4958_v18 = vpop.f32.mrf.mxu0 }
 0x109   :  { %v4959_v19 = vpop.f32.mrf.mxu0 }
 0x10a   :  { %v5666_v20 = vadd.f32 %v4959_v19, %v4958_v18 }
 0x10b   :  { %v4961_v21 = vpop.f32.mrf.mxu0 }
 0x10d   :  { %v4962_v22 = vpop.f32.mrf.mxu0 }
 0x10e   :  { %v5668_v23 = vadd.f32 %v4962_v22, %v4961_v21 }
 0x10f   :  { %v4964_v24 = vpop.f32.mrf.mxu0 }
 0x111   :  { %v4965_v25 = vpop.f32.mrf.mxu0 }
 0x112   :  { %v5670_v26 = vadd.f32 %v4965_v25, %v4964_v24  ;;  %v175_v25 = vpop.permute.xlu0 %174 }
 0x113   :  { %v4967_v27 = vpop.f32.mrf.mxu0 }
 0x115   :  { %v4968_v28 = vpop.f32.mrf.mxu0 }
 0x116   :  { %v5672_v29 = vadd.f32 %v4968_v28, %v4967_v27 }
 0x117   :  { %v4970_v30 = vpop.f32.mrf.mxu0 }
 0x119   :  { %v4971_v31 = vpop.f32.mrf.mxu0 }
 0x11a   :  { %v5674_v32 = vadd.f32 %v4971_v31, %v4970_v30  ;;  %v170_v31 = vpop.permute.xlu1 %169 }
 0x11b   :  { %v5676_v33 = vpop.f32.mrf.mxu0 }
 0x11d   :  { %v5678_v34 = vpop.f32.mrf.mxu0 }
 0x11f   :  { %v4976_v35 = vpop.f32.mrf.mxu0 }
 0x121   :  { %v4977_v36 = vpop.f32.mrf.mxu0 }
 0x122   :  { %v4978_v27 = vadd.f32 %v4977_v36, %v4976_v35 }
 0x123   :  { %v4979_v37 = vpop.f32.mrf.mxu0 }
 0x125   :  { %v4980_v38 = vpop.f32.mrf.mxu0 }
 0x126   :  { %v4981_v21 = vadd.f32 %v4980_v38, %v4979_v37  ;;  %v324_v37 = vadd.f32 %v4978_v27, %v180_v15 }
 0x127   :  { %v4982_v39 = vpop.f32.mrf.mxu0 }
 0x129   :  { %v4983_v40 = vpop.f32.mrf.mxu0 }
 0x12a   :  { %v4984_v16 = vadd.f32 %v4983_v40, %v4982_v39  ;;  %v4975_v39 = vadd.f32 %v5678_v34, %v5676_v33  ;;  %v329_v40 = vadd.f32 %v4981_v21, %v185_v11  ;;  %v378_v33 = vmax.f32 %v324_v37, 0.0 }
 0x12b   :  { %v4985_v41 = vpop.f32.mrf.mxu0 }
 0x12c   :  { %v334_v28 = vadd.f32 %v4984_v16, %v190_v4  ;;  %v319_v35 = vadd.f32 %v4975_v39, %v175_v25  ;;  %v379_v36 = vmax.f32 %v329_v40, 0.0 }
 0x12d   :  { %v4986_v42 = vpop.f32.mrf.mxu0 }
 0x12e   :  { %v4987_v12 = vadd.f32 %v4986_v42, %v4985_v41  ;;  %v380_v38 = vmax.f32 %v334_v28, 0.0  ;;  %v165_v42 = vpop.permute.xlu0 %164 }
 0x12f   :  { %v4988_v43 = vpop.f32.mrf.mxu0  ;;  %v309_v34 = vadd.f32 %v5672_v29, %v165_v42  ;;  %v1324_v42 = vld [vmem:[#allocation8 + $0x1878] sm:$0xff] }
 0x130   :  { %v339_v22 = vadd.f32 %v4987_v12, %v195_v0  ;;  %1444 = vmatprep.subr.mxu0 %v1324_v42 }
 0x131   :  { %v4989_v44 = vpop.f32.mrf.mxu0 }
 0x132   :  { %v4990_v8 = vadd.f32 %v4989_v44, %v4988_v43  ;;  %v381_v41 = vmax.f32 %v339_v22, 0.0  ;;  %v160_v43 = vpop.permute.xlu1 %159  ;;  %v314_v44 = vadd.f32 %v5674_v32, %v170_v31 }
 0x133   :  { %v4991_v45 = vpop.f32.mrf.mxu0 }
 0x134   :  { %v344_v18 = vadd.f32 %v4990_v8, %v200_v58  ;;  %v467_v58 = vlaneseq }
 0x135   :  { %v4992_v47 = vpop.f32.mrf.mxu0 }
 0x136   :  { %v4993_v5 = vadd.f32 %v4992_v47, %v4991_v45  ;;  %v382_v30 = vmax.f32 %v344_v18, 0.0  ;;  %v377_v45 = vmax.f32 %v319_v35, 0.0  ;;  %v304_v47 = vadd.f32 %v5670_v26, %v160_v43  ;;  %v1323_v35 = vld [vmem:[#allocation8 + $0x1870] sm:$0xff] }
 0x137   :  { %v4994_v49 = vpop.f32.mrf.mxu0  ;;  %v1271_v43 = vld [vmem:[#allocation8 + $0x16d0] sm:$0xff]  ;;  %1445 = vmatpush1.msra.mxu0 %v1323_v35  ;;  %vm6179_vm1 = vcmp.lt.s32.totalorder %v467_v58, 512 }
 0x138   :  { %v349_v13 = vadd.f32 %v4993_v5, %v205_v56  ;;  %v5367_v56 = vmov 1966171168  }
 0x139   :  { %v4995_v50 = vpop.f32.mrf.mxu0 }
 0x13a   :  { %v4996_v1 = vadd.f32 %v4995_v50, %v4994_v49  ;;  %v383_v24 = vmax.f32 %v349_v13, 0.0  ;;  %v150_v49 = vpop.permute.xlu1 %149  ;;  %v375_v50 = vmax.f32 %v309_v34, 0.0  ;;  %v1168_v34 = vld [vmem:[#allocation8 + $0x1398] sm:$0xff] }
 0x13b   :  { %v4997_v52 = vpop.f32.mrf.mxu0  ;;  %v294_v29 = vadd.f32 %v5666_v20, %v150_v49  ;;  %v1270_v49 = vld [vmem:[#allocation8 + $0x16c8] sm:$0xff] }
 0x13c   :  { %v354_v9 = vadd.f32 %v4996_v1, %v210_v53  ;;  %v482_v1 = vld [vmem:[#allocation6] sm:$0xff] }
 0x13d   :  { %v4998_v54 = vpop.f32.mrf.mxu0  ;;  %v372_v26 = vmax.f32 %v294_v29, 0.0  ;;  %v1218_v29 = vld [vmem:[#allocation8 + $0x1528] sm:$0xff] }
 0x13e   :  { %v4999_v62 = vadd.f32 %v4998_v54, %v4997_v52  ;;  %v384_v19 = vmax.f32 %v354_v9, 0.0 }
 0x13f   :  { %v5000_v55 = vpop.f32.mrf.mxu0 }
 0x140   :  { %v359_v6 = vadd.f32 %v4999_v62, %v215_v48  ;;  %v376_v48 = vmax.f32 %v314_v44, 0.0  ;;  %v1220_v44 = vld [vmem:[#allocation8 + $0x1538] sm:$0xff] }
 0x141   :  { %v5001_v57 = vpop.f32.mrf.mxu0 }
 0x142   :  { %v5002_v60 = vadd.f32 %v5001_v57, %v5000_v55  ;;  %v385_v14 = vmax.f32 %v359_v6, 0.0  ;;  %v465_v57 = vunpack.c.l.s4 %v5367_v56  ;;  %v1114_v56 = vld [vmem:[#allocation8 + $0x11e8] sm:$0xff] }
 0x143   :  { %v5003_v59 = vpop.f32.mrf.mxu0 }
 0x144   :  { %v364_v2 = vadd.f32 %v5002_v60, %v220_v51  ;;  %v374_v51 = vmax.f32 %v304_v47, 0.0  ;;  %v468_v60 = vshrl.u32 %v467_v58, 7  ;;  %v1116_v47 = vld [vmem:[#allocation8 + $0x11f8] sm:$0xff] }
 0x145   :  { %v5004_v61 = vpop.f32.mrf.mxu0 }
 0x146   :  { %v5005_v63 = vadd.f32 %v5004_v61, %v5003_v59  ;;  %v386_v10 = vmax.f32 %v364_v2, 0.0  ;;  %v466_v59 = vunpack.c.0.s8 %v465_v57  ;;  %v485_v62 = vsub.s32 1, %v468_v60  ;;  %v960_v57 = vld [vmem:[#allocation8 + $0xd18] sm:$0xff] }
 0x148   :  { %v369_v3 = vadd.f32 %v5005_v63, %v225_v46  ;;  %v155_v46 = vpop.permute.xlu0 %154  ;;  %v5710_v61 = vsub.s32 %v466_v59, %v468_v60  ;;  %v490_v63 = vsub.s32 0, %v468_v60  ;;  %v1113_v59 = vld [vmem:[#allocation8 + $0x11e0] sm:$0xff]  ;;  %v959_v60 = vld [vmem:[#allocation8 + $0xd10] sm:$0xff] }
 0x149   :  { %v299_v32 = vadd.f32 %v5668_v23, %v155_v46  ;;  %v388_v23 = vld [vmem:[%s6216_s3] sm:$0xff]  ;;  %v1322_v46 = vld [vmem:[#allocation8 + $0x1868] sm:$0xff] }
 0x14a   :  { %v387_v7 = vmax.f32 %v369_v3, 0.0 }
 0x14b   :  { %v373_v52 = vmax.f32 %v299_v32, 0.0  ;;  %v1115_v32 = vld [vmem:[#allocation8 + $0x11f0] sm:$0xff] }
 0x14c   :  { %5024 = vmatpush3.msra.mxu1 %v387_v7  ;;  %v462_v7 = vld [vmem:[#allocation4] sm:$0x1] }
 0x14d   :  { %5025 = vmatprep.subr.mxu1 %v5365_v17 }
 0x14e   :  { %5026 = vmatpush3.msra.mxu1 %v386_v10 }
 0x14f   :  { %5027 = vmatprep.subr.mxu1 %v5365_v17 }
 0x150   :  { %5028 = vmatpush3.msra.mxu1 %v385_v14 }
 0x151   :  { %5029 = vmatprep.subr.mxu1 %v5365_v17 }
 0x152   :  { %5030 = vmatpush3.msra.mxu1 %v384_v19 }
 0x153   :  { %5031 = vmatprep.subr.mxu1 %v5365_v17 }
 0x154   :  { %5032 = vmatpush3.msra.mxu1 %v383_v24 }
 0x155   :  { %5033 = vmatprep.subr.mxu1 %v5365_v17 }
 0x156   :  { %5034 = vmatpush3.msra.mxu1 %v382_v30 }
 0x157   :  { %5035 = vmatprep.subr.mxu1 %v5365_v17 }
 0x158   :  { %5036 = vmatpush3.msra.mxu1 %v381_v41 }
 0x159   :  { %5037 = vmatprep.subr.mxu1 %v5365_v17 }
 0x15a   :  { %5038 = vmatpush3.msra.mxu1 %v380_v38 }
 0x15b   :  { %5039 = vmatprep.subr.mxu1 %v5365_v17 }
 0x15c   :  { %5040 = vmatpush3.msra.mxu1 %v379_v36  ;;  %v1272_v36 = vld [vmem:[#allocation8 + $0x16d8] sm:$0xff] }
 0x15d   :  { %5041 = vmatprep.subr.mxu1 %v5365_v17  ;;  %1446 = vmatprep.subr.mxu0 %v1272_v36  ;;  %v645_v36 = vld [vmem:[#allocation8 + $0x340] sm:$0xff] }
 0x15e   :  { %5042 = vmatpush3.msra.mxu1 %v378_v33  ;;  %v1219_v33 = vld [vmem:[#allocation8 + $0x1530] sm:$0xff]  ;;  %1447 = vmatpush1.msra.mxu0 %v1271_v43  ;;  %v1328_v43 = vld [vmem:[#allocation8 + $0x1898] sm:$0xff] }
 0x15f   :  { %5043 = vmatprep.subr.mxu1 %v5365_v17  ;;  %1448 = vmatprep.subr.mxu0 %v1220_v44  ;;  %v594_v44 = vld [vmem:[#allocation8 + $0x1a8] sm:$0xff] }
 0x160   :  { %5044 = vmatpush3.msra.mxu1 %v377_v45  ;;  %v1167_v45 = vld [vmem:[#allocation8 + $0x1390] sm:$0xff]  ;;  %1449 = vmatpush1.msra.mxu0 %v1219_v33  ;;  %v593_v33 = vld [vmem:[#allocation8 + $0x1a0] sm:$0xff] }
 0x161   :  { %5045 = vmatprep.subr.mxu1 %v5365_v17  ;;  %1450 = vmatprep.subr.mxu0 %v1168_v34  ;;  %v542_v34 = vld [vmem:[#allocation8 + $0x8] sm:$0xff] }
 0x162   :  { %5046 = vmatpush3.msra.mxu1 %v376_v48  ;;  %v1321_v48 = vld [vmem:[#allocation8 + $0x1860] sm:$0xff]  ;;  %1451 = vmatpush1.msra.mxu0 %v1167_v45 }
 0x163   :  { %5047 = vmatprep.subr.mxu1 %v5365_v17  ;;  %1452 = vmatprep.subr.mxu0 %v1116_v47  ;;  %v541_v45 = vld [vmem:[#allocation8] sm:$0xff] }
 0x164   :  { %5048 = vmatpush3.msra.mxu1 %v375_v50  ;;  %v1269_v50 = vld [vmem:[#allocation8 + $0x16c0] sm:$0xff]  ;;  %1453 = vmatpush1.msra.mxu0 %v1115_v32 }
 0x165   :  { %5049 = vmatprep.subr.mxu1 %v5365_v17 }
 0x166   :  { %5050 = vmatpush3.msra.mxu1 %v374_v51  ;;  %v1064_v51 = vld [vmem:[#allocation8 + $0x1058] sm:$0xff] }
 0x167   :  { %5051 = vmatprep.subr.mxu1 %v5365_v17  ;;  %1454 = vmatprep.subr.mxu0 %v1064_v51 }
 0x168   :  { %5052 = vmatpush3.msra.mxu1 %v373_v52  ;;  %v1217_v52 = vld [vmem:[#allocation8 + $0x1520] sm:$0xff] }
 0x169   :  { %5053 = vmatprep.subr.mxu1 %v5365_v17 }
 0x16a   :  { %5054 = vmatpush3.msra.mxu1 %v372_v26  ;;  %v1063_v26 = vld [vmem:[#allocation8 + $0x1050] sm:$0xff] }
 0x16b   :  { %5056 = vmatmul.mubr.f32.vlgmr.msra.gmra.mxu1 %v388_v23  ;;  %1373 = vmatprep.subr.mxu1 %v1322_v46  ;;  %v1166_v23 = vld [vmem:[#allocation8 + $0x1388] sm:$0xff] }
 0x16c   :  { %1437 = vmatprep.mubr.f32.mxu1 %v5365_v17  ;;  %1374 = vmatpush1.msra.mxu1 %v1321_v48  ;;  %v1326_v46 = vld [vmem:[#allocation8 + $0x1888] sm:$0xff] }
 0x16d   :  { %1375 = vmatprep.subr.mxu1 %v1270_v49  ;;  %1455 = vmatpush1.msra.mxu0 %v1063_v26 }
 0x16e   :  { %1376 = vmatpush1.msra.mxu1 %v1269_v50 }
 0x16f   :  { %1377 = vmatprep.subr.mxu1 %v1218_v29 }
 0x170   :  { %1378 = vmatpush1.msra.mxu1 %v1217_v52  ;;  %v534_v52 = vstv %s6220_s7 }
 0x171   :  { %1379 = vmatprep.subr.mxu1 %v1166_v23 }
 0x22b   :  { %v5706_v20 = vpop.f32.mrf.mxu1 }
 0x22c   :  { %v459_v53 = vmul.f32 0.5, %v5706_v20  ;;  %v491_v6 = vrot.slane %v5706_v20, %v490_v63  ;;  %v908_v63 = vld [vmem:[#allocation8 + $0xb78] sm:$0xff] }
 0x22d   :  { %v5057_v54 = vpop.f32.mrf.mxu1 }
 0x22e   :  { %v460_v55 = vmul.f32 1.442695, %v459_v53  ;;  %v1012_v53 = vld [vmem:[#allocation8 + $0xeb8] sm:$0xff]  ;;  %v1165_v54 = vld [vmem:[#allocation8 + $0x1380] sm:$0xff] }
 0x22f   :  { %1456 = vmatprep.subr.mxu0 %v1012_v53  ;;  %1380 = vmatpush1.msra.mxu1 %v1165_v54  ;;  %v1325_v53 = vld [vmem:[#allocation8 + $0x1880] sm:$0xff]  ;;  %v1327_v54 = vld [vmem:[#allocation8 + $0x1890] sm:$0xff] }
 0x230   :  { %5076 = vpow2.f32 %v460_v55  ;;  %v1011_v55 = vld [vmem:[#allocation8 + $0xeb0] sm:$0xff]  ;;  %1381 = vmatprep.subr.mxu1 %v1114_v56  ;;  %v1274_v56 = vld [vmem:[#allocation8 + $0x16e8] sm:$0xff] }
 0x231   :  { %1457 = vmatpush1.msra.mxu0 %v1011_v55  ;;  %1382 = vmatpush1.msra.mxu1 %v1113_v59  ;;  %v1275_v59 = vld [vmem:[#allocation8 + $0x16f0] sm:$0xff] }
 0x232   :  { %1458 = vmatprep.subr.mxu0 %v960_v57  ;;  %v1276_v57 = vld [vmem:[#allocation8 + $0x16f8] sm:$0xff] }
 0x233   :  { %1459 = vmatpush1.msra.mxu0 %v959_v60  ;;  %v1222_v60 = vld [vmem:[#allocation8 + $0x1548] sm:$0xff] }
 0x234   :  { %1460 = vmatprep.subr.mxu0 %v908_v63  ;;  %v1223_v63 = vld [vmem:[#allocation8 + $0x1550] sm:$0xff] }
 0x23d   :  { %v5077_v0 = vpop.eup %5076 }
 0x23e   :  { %v470_v2 = vrot.slane %v5077_v0, %v5710_v61  ;;  %v486_v3 = vrot.slane %v5077_v0, %v485_v62  ;;  %v1062_v62 = vld [vmem:[#allocation8 + $0x1048] sm:$0xff]  ;;  %v1061_v0 = vld [vmem:[#allocation8 + $0x1040] sm:$0xff] }
 0x23f   :  { %1383 = vmatprep.subr.mxu1 %v1062_v62  ;;  %v1224_v62 = vld [vmem:[#allocation8 + $0x1558] sm:$0xff] }
 0x240   :  { %v471_v4 = vcombine.high %v470_v2, %v470_v2  ;;  %v487_v5 = vmul.f32 %v486_v3, %v482_v1  ;;  %v907_v1 = vld [vmem:[#allocation8 + $0xb70] sm:$0xff]  ;;  %v1010_v2 = vld [vmem:[#allocation8 + $0xea8] sm:$0xff]  ;;  %v856_v3 = vld [vmem:[#allocation8 + $0x9d8] sm:$0xff]  ;;  %1384 = vmatpush1.msra.mxu1 %v1061_v0 }
 0x241   :  { %1461 = vmatpush1.msra.mxu0 %v907_v1  ;;  %1385 = vmatprep.subr.mxu1 %v1010_v2  ;;  %v1170_v0 = vld [vmem:[#allocation8 + $0x13a8] sm:$0xff]  ;;  %v1172_v1 = vld [vmem:[#allocation8 + $0x13b8] sm:$0xff]  ;;  %v1169_v2 = vld [vmem:[#allocation8 + $0x13a0] sm:$0xff] }
 0x242   :  { %v478_v8 = vrot.slane %v471_v4, %v5710_v61  ;;  %v492_v9 = vadd.f32 %v491_v6, %v487_v5  ;;  %v1009_v4 = vld [vmem:[#allocation8 + $0xea0] sm:$0xff]  ;;  %v855_v5 = vld [vmem:[#allocation8 + $0x9d0] sm:$0xff]  ;;  %v958_v6 = vld [vmem:[#allocation8 + $0xd08] sm:$0xff]  ;;  %1462 = vmatprep.subr.mxu0 %v856_v3 }
 0x243   :  { %1386 = vmatpush1.msra.mxu1 %v1009_v4  ;;  %1463 = vmatpush1.msra.mxu0 %v855_v5  ;;  %v1171_v3 = vld [vmem:[#allocation8 + $0x13b0] sm:$0xff]  ;;  %v1118_v4 = vld [vmem:[#allocation8 + $0x1208] sm:$0xff]  ;;  %v1120_v5 = vld [vmem:[#allocation8 + $0x1218] sm:$0xff] }
 0x244   :  { %v480_v10 = vmul.f32 %v478_v8, %v462_v7  ;;  %v4846_v11 = vmul.f32 -1.442695, %v492_v9  ;;  %v804_v7 = vld [vmem:[#allocation8 + $0x838] sm:$0xff]  ;;  %v803_v8 = vld [vmem:[#allocation8 + $0x830] sm:$0xff]  ;;  %1387 = vmatprep.subr.mxu1 %v958_v6  ;;  %v1117_v6 = vld [vmem:[#allocation8 + $0x1200] sm:$0xff] }
 0x245   :  { %v752_v9 = vld [vmem:[#allocation8 + $0x698] sm:$0xff]  ;;  %1464 = vmatprep.subr.mxu0 %v804_v7  ;;  %v1119_v7 = vld [vmem:[#allocation8 + $0x1210] sm:$0xff] }
 0x246   :  { %v481_v12 = vadd.f32 %v480_v10, %v5706_v20  ;;  %5078 = vpow2.f32 %v4846_v11  ;;  %v751_v10 = vld [vmem:[#allocation8 + $0x690] sm:$0xff]  ;;  %1465 = vmatpush1.msra.mxu0 %v803_v8  ;;  %v957_v11 = vld [vmem:[#allocation8 + $0xd00] sm:$0xff]  ;;  %v1066_v8 = vld [vmem:[#allocation8 + $0x1068] sm:$0xff] }
 0x247   :  { %1466 = vmatprep.subr.mxu0 %v752_v9  ;;  %1388 = vmatpush1.msra.mxu1 %v957_v11  ;;  %v1068_v9 = vld [vmem:[#allocation8 + $0x1078] sm:$0xff]  ;;  %v1067_v11 = vld [vmem:[#allocation8 + $0x1070] sm:$0xff] }
 0x248   :  { %536 = vst [vmem:[#allocation2] sm:$0x1] %v481_v12  ;;  %1467 = vmatpush1.msra.mxu0 %v751_v10  ;;  %v906_v12 = vld [vmem:[#allocation8 + $0xb68] sm:$0xff]  ;;  %v1065_v10 = vld [vmem:[#allocation8 + $0x1060] sm:$0xff] }
 0x249   :  { %1389 = vmatprep.subr.mxu1 %v906_v12  ;;  %v1014_v12 = vld [vmem:[#allocation8 + $0xec8] sm:$0xff] }
 0x253   :  { %v5079_v13 = vpop.eup %5078 }
 0x254   :  { %v496_v14 = vadd.f32 1.0, %v5079_v13  ;;  %v700_v13 = vld [vmem:[#allocation8 + $0x4f8] sm:$0xff] }
 0x255   :  { %1468 = vmatprep.subr.mxu0 %v700_v13  ;;  %v1016_v13 = vld [vmem:[#allocation8 + $0xed8] sm:$0xff] }
 0x256   :  { %5080 = vrcp.f32 %v496_v14  ;;  %v905_v14 = vld [vmem:[#allocation8 + $0xb60] sm:$0xff] }
 0x257   :  { %1390 = vmatpush1.msra.mxu1 %v905_v14  ;;  %v1013_v14 = vld [vmem:[#allocation8 + $0xec0] sm:$0xff] }
 0x263   :  { %v5081_v15 = vpop.eup %5080 }
 0x264   :  { %v499_v16 = vrot.slane %v5081_v15, 4 }
 0x266   :  { %v500_v18 = vadd.f32 %v5081_v15, %v499_v16  ;;  %v854_v16 = vld [vmem:[#allocation8 + $0x9c8] sm:$0xff] }
 0x267   :  { %1391 = vmatprep.subr.mxu1 %v854_v16  ;;  %v962_v16 = vld [vmem:[#allocation8 + $0xd28] sm:$0xff] }
 0x268   :  { %v501_v19 = vrot.slane %v500_v18, 2 }
 0x26a   :  { %v502_v21 = vadd.f32 %v501_v19, %v500_v18  ;;  %v853_v18 = vld [vmem:[#allocation8 + $0x9c0] sm:$0xff]  ;;  %v802_v19 = vld [vmem:[#allocation8 + $0x828] sm:$0xff] }
 0x26b   :  { %1392 = vmatpush1.msra.mxu1 %v853_v18  ;;  %v964_v18 = vld [vmem:[#allocation8 + $0xd38] sm:$0xff] }
 0x26c   :  { %v503_v22 = vrot.slane %v502_v21, 1  ;;  %1393 = vmatprep.subr.mxu1 %v802_v19  ;;  %v961_v19 = vld [vmem:[#allocation8 + $0xd20] sm:$0xff] }
 0x26e   :  { %v504_v24 = vadd.f32 %v503_v22, %v502_v21  ;;  %v648_v21 = vld [vmem:[#allocation8 + $0x358] sm:$0xff]  ;;  %v801_v22 = vld [vmem:[#allocation8 + $0x820] sm:$0xff] }
 0x26f   :  { %1394 = vmatpush1.msra.mxu1 %v801_v22  ;;  %v910_v22 = vld [vmem:[#allocation8 + $0xb88] sm:$0xff] }
 0x270   :  { %v506_v25 = vmul.f32 0.125, %v504_v24  ;;  %v647_v24 = vld [vmem:[#allocation8 + $0x350] sm:$0xff] }
 0x272   :  { %v507_v27 = vsub.f32 %v5081_v15, %v506_v25  ;;  %538 = vst [vmem:[#allocation2 + $0x2] sm:$0x1] %v506_v25  ;;  %v699_v15 = vld [vmem:[#allocation8 + $0x4f0] sm:$0xff]  ;;  %v750_v25 = vld [vmem:[#allocation8 + $0x688] sm:$0xff] }
 0x273   :  { %1469 = vmatpush1.msra.mxu0 %v699_v15  ;;  %1395 = vmatprep.subr.mxu1 %v750_v25  ;;  %v1015_v15 = vld [vmem:[#allocation8 + $0xed0] sm:$0xff]  ;;  %v909_v25 = vld [vmem:[#allocation8 + $0xb80] sm:$0xff] }
 0x274   :  { %v508_v28 = vmul.f32 %v507_v27, %v507_v27  ;;  %1470 = vmatprep.subr.mxu0 %v648_v21  ;;  %v749_v27 = vld [vmem:[#allocation8 + $0x680] sm:$0xff]  ;;  %v963_v21 = vld [vmem:[#allocation8 + $0xd30] sm:$0xff] }
 0x275   :  { %1471 = vmatpush1.msra.mxu0 %v647_v24  ;;  %1396 = vmatpush1.msra.mxu1 %v749_v27  ;;  %v912_v24 = vld [vmem:[#allocation8 + $0xb98] sm:$0xff]  ;;  %v911_v27 = vld [vmem:[#allocation8 + $0xb90] sm:$0xff] }
 0x276   :  { %v509_v30 = vrot.slane %v508_v28, 4 }
 0x278   :  { %v510_v31 = vadd.f32 %v509_v30, %v508_v28  ;;  %v596_v28 = vld [vmem:[#allocation8 + $0x1b8] sm:$0xff]  ;;  %v595_v30 = vld [vmem:[#allocation8 + $0x1b0] sm:$0xff] }
 0x279   :  { %1472 = vmatprep.subr.mxu0 %v596_v28  ;;  %v858_v28 = vld [vmem:[#allocation8 + $0x9e8] sm:$0xff] }
 0x27a   :  { %v511_v39 = vrot.slane %v510_v31, 2  ;;  %1473 = vmatpush1.msra.mxu0 %v595_v30  ;;  %v860_v30 = vld [vmem:[#allocation8 + $0x9f8] sm:$0xff] }
 0x27c   :  { %v512_v40 = vadd.f32 %v511_v39, %v510_v31  ;;  %v698_v31 = vld [vmem:[#allocation8 + $0x4e8] sm:$0xff]  ;;  %v697_v39 = vld [vmem:[#allocation8 + $0x4e0] sm:$0xff] }
 0x27d   :  { %1397 = vmatprep.subr.mxu1 %v698_v31  ;;  %v857_v31 = vld [vmem:[#allocation8 + $0x9e0] sm:$0xff] }
 0x27e   :  { %v513_v41 = vrot.slane %v512_v40, 1  ;;  %1398 = vmatpush1.msra.mxu1 %v697_v39  ;;  %v859_v39 = vld [vmem:[#allocation8 + $0x9f0] sm:$0xff] }
 0x280   :  { %v514_v37 = vadd.f32 %v513_v41, %v512_v40  ;;  %v544_v40 = vld [vmem:[#allocation8 + $0x18] sm:$0xff]  ;;  %v543_v41 = vld [vmem:[#allocation8 + $0x10] sm:$0xff] }
 0x281   :  { %1474 = vmatprep.subr.mxu0 %v544_v40  ;;  %v806_v40 = vld [vmem:[#allocation8 + $0x848] sm:$0xff] }
 0x282   :  { %v5716_v38 = vmul.f32 0.14285715, %v514_v37  ;;  %v646_v37 = vld [vmem:[#allocation8 + $0x348] sm:$0xff]  ;;  %1475 = vmatpush1.msra.mxu0 %v543_v41  ;;  %v808_v41 = vld [vmem:[#allocation8 + $0x858] sm:$0xff] }
 0x283   :  { %1586 = vmatprep.subr.mxu0 %v1328_v43  ;;  %1399 = vmatprep.subr.mxu1 %v646_v37  ;;  %v805_v37 = vld [vmem:[#allocation8 + $0x840] sm:$0xff] }
 0x284   :  { %519 = vmax.xlane.f32.xlu1 %v5716_v38  ;;  %539 = vst [vmem:[#allocation2 + $0x3] sm:$0x1] %v5716_v38  ;;  %516 = vmin.xlane.f32.xlu0 %v5716_v38  ;;  %v753_v43 = vld [vmem:[#allocation8 + $0x6a0] sm:$0xff] }
 0x285   :  { %1400 = vmatpush1.msra.mxu1 %v645_v36  ;;  %v756_v36 = vld [vmem:[#allocation8 + $0x6b8] sm:$0xff] }
 0x286   :  { %1401 = vmatprep.subr.mxu1 %v594_v44  ;;  %v755_v44 = vld [vmem:[#allocation8 + $0x6b0] sm:$0xff] }
 0x287   :  { %1402 = vmatpush1.msra.mxu1 %v593_v33  ;;  %v702_v33 = vld [vmem:[#allocation8 + $0x508] sm:$0xff] }
 0x288   :  { %1403 = vmatprep.subr.mxu1 %v542_v34  ;;  %v704_v34 = vld [vmem:[#allocation8 + $0x518] sm:$0xff] }
 0x289   :  { %1404 = vmatpush1.msra.mxu1 %v541_v45  ;;  %v701_v45 = vld [vmem:[#allocation8 + $0x500] sm:$0xff] }
 0x28a   :  { %1515 = vmatprep.subr.mxu1 %v1326_v46  ;;  %v703_v46 = vld [vmem:[#allocation8 + $0x510] sm:$0xff] }
 0x30d   :  { %v520_v42 = vpop.xlane.xlu1 %519  ;;  %v517_v35 = vpop.xlane.xlu0 %516 }
 0x30e   :  { %5058 = vpush %v517_v35  ;;  %v754_v35 = vld [vmem:[#allocation8 + $0x6a8] sm:$0xff] }
 0x30f   :  { %5060 = vpush %v520_v42  ;;  %v807_v42 = vld [vmem:[#allocation8 + $0x850] sm:$0xff] }
 0x33f   :  { %s5059_s3 = spop %5058 }
 0x340   :  { %s5061_s6 = spop %5060  ;;  %v5721_v49 = vstv %s5059_s3 }
 0x341   :  { %s522_s27 = ssub.f32 %s5061_s6, %s5059_s3  ;;  %v528_v32 = vsub.f32 %v5716_v38, %v5721_v49  ;;  %v1273_v38 = vld [vmem:[#allocation8 + $0x16e0] sm:$0xff] }
 0x343   :  { %s523_s29 = smax.f32 %s5368_s28, %s522_s27 }
 0x344   :  { %v524_v47 = vstv %s523_s29 }
 0x345   :  { %5082 = vrcp.f32 %v524_v47  ;;  %v650_v47 = vld [vmem:[#allocation8 + $0x368] sm:$0xff] }
 0x352   :  { %v5083_v48 = vpop.eup %5082 }
 0x353   :  { %5062 = vpush %v5083_v48  ;;  %v652_v48 = vld [vmem:[#allocation8 + $0x378] sm:$0xff] }
 0x384   :  { %s5063_s30 = spop %5062 }
 0x385   :  { %v5725_v50 = vstv %s5063_s30 }
 0x386   :  { %v530_v29 = vmul.f32 %v5725_v50, %v528_v32  ;;  %v649_v32 = vld [vmem:[#allocation8 + $0x360] sm:$0xff] }
 0x388   :  { %v531_v51 = vsub.f32 1.0, %v530_v29  ;;  %v651_v29 = vld [vmem:[#allocation8 + $0x370] sm:$0xff] }
 0x38a   :  { %v532_v26 = vmul.f32 %v531_v51, %v5706_v20  ;;  %v1221_v20 = vld [vmem:[#allocation8 + $0x1540] sm:$0xff]  ;;  %v598_v51 = vld [vmem:[#allocation8 + $0x1c8] sm:$0xff] }
 0x38c   :  { %v535_v23 = vadd.f32 %v534_v52, %v532_v26  ;;  %v600_v52 = vld [vmem:[#allocation8 + $0x1d8] sm:$0xff]  ;;  %v597_v26 = vld [vmem:[#allocation8 + $0x1c0] sm:$0xff] }
 0x38e   :  { %537 = vst [vmem:[#allocation2 - $0x1] sm:$0x4] %v535_v23  ;;  %v599_v23 = vld [vmem:[#allocation8 + $0x1d0] sm:$0xff] }
 0x395   :  { %v5732_v55 = vld [vmem:[#allocation2] sm:$0xf] }
 0x396   :  { %1438 = vmatmul.mubr.f32.vlgmr.msra.gmra.mxu1 %v5732_v55  ;;  %1509 = vmatmul.mubr.f32.vlgmr.msra.gmra.mxu0 %v5732_v55 }
 0x397   :  { %1516 = vmatpush1.msra.mxu1 %v1325_v53  ;;  %1587 = vmatpush1.msra.mxu0 %v1327_v54  ;;  %v546_v53 = vld [vmem:[#allocation8 + $0x28] sm:$0xff]  ;;  %v548_v54 = vld [vmem:[#allocation8 + $0x38] sm:$0xff] }
 0x398   :  { %1517 = vmatprep.subr.mxu1 %v1274_v56  ;;  %1588 = vmatprep.subr.mxu0 %v1276_v57  ;;  %v545_v56 = vld [vmem:[#allocation8 + $0x20] sm:$0xff]  ;;  %v547_v57 = vld [vmem:[#allocation8 + $0x30] sm:$0xff] }
 0x399   :  { %1518 = vmatpush1.msra.mxu1 %v1273_v38  ;;  %1589 = vmatpush1.msra.mxu0 %v1275_v59  ;;  %v1330_v38 = vld [vmem:[#allocation8 + $0x18a8] sm:$0xff]  ;;  %v1332_v59 = vld [vmem:[#allocation8 + $0x18b8] sm:$0xff] }
 0x39a   :  { %1519 = vmatprep.subr.mxu1 %v1222_v60  ;;  %1590 = vmatprep.subr.mxu0 %v1224_v62  ;;  %v1329_v60 = vld [vmem:[#allocation8 + $0x18a0] sm:$0xff]  ;;  %v1331_v62 = vld [vmem:[#allocation8 + $0x18b0] sm:$0xff] }
 0x39b   :  { %1520 = vmatpush1.msra.mxu1 %v1221_v20  ;;  %1591 = vmatpush1.msra.mxu0 %v1223_v63  ;;  %v1278_v20 = vld [vmem:[#allocation8 + $0x1708] sm:$0xff]  ;;  %v1280_v63 = vld [vmem:[#allocation8 + $0x1718] sm:$0xff] }
 0x39c   :  { %1521 = vmatprep.subr.mxu1 %v1170_v0  ;;  %1592 = vmatprep.subr.mxu0 %v1172_v1  ;;  %v1277_v0 = vld [vmem:[#allocation8 + $0x1700] sm:$0xff]  ;;  %v1279_v1 = vld [vmem:[#allocation8 + $0x1710] sm:$0xff] }
 0x39d   :  { %1522 = vmatpush1.msra.mxu1 %v1169_v2  ;;  %1593 = vmatpush1.msra.mxu0 %v1171_v3  ;;  %v1226_v2 = vld [vmem:[#allocation8 + $0x1568] sm:$0xff]  ;;  %v1228_v3 = vld [vmem:[#allocation8 + $0x1578] sm:$0xff] }
 0x39e   :  { %1523 = vmatprep.subr.mxu1 %v1118_v4  ;;  %1594 = vmatprep.subr.mxu0 %v1120_v5  ;;  %v1225_v4 = vld [vmem:[#allocation8 + $0x1560] sm:$0xff]  ;;  %v1227_v5 = vld [vmem:[#allocation8 + $0x1570] sm:$0xff] }
 0x39f   :  { %1524 = vmatpush1.msra.mxu1 %v1117_v6  ;;  %1595 = vmatpush1.msra.mxu0 %v1119_v7  ;;  %v1174_v6 = vld [vmem:[#allocation8 + $0x13c8] sm:$0xff]  ;;  %v1176_v7 = vld [vmem:[#allocation8 + $0x13d8] sm:$0xff] }
 0x3a0   :  { %1525 = vmatprep.subr.mxu1 %v1066_v8  ;;  %1596 = vmatprep.subr.mxu0 %v1068_v9  ;;  %v1173_v8 = vld [vmem:[#allocation8 + $0x13c0] sm:$0xff]  ;;  %v1175_v9 = vld [vmem:[#allocation8 + $0x13d0] sm:$0xff] }
 0x3a1   :  { %1526 = vmatpush1.msra.mxu1 %v1065_v10  ;;  %1597 = vmatpush1.msra.mxu0 %v1067_v11  ;;  %v1122_v10 = vld [vmem:[#allocation8 + $0x1228] sm:$0xff]  ;;  %v1124_v11 = vld [vmem:[#allocation8 + $0x1238] sm:$0xff] }
 0x3a2   :  { %1527 = vmatprep.subr.mxu1 %v1014_v12  ;;  %1598 = vmatprep.subr.mxu0 %v1016_v13  ;;  %v1121_v12 = vld [vmem:[#allocation8 + $0x1220] sm:$0xff]  ;;  %v1123_v13 = vld [vmem:[#allocation8 + $0x1230] sm:$0xff] }
 0x3a3   :  { %1528 = vmatpush1.msra.mxu1 %v1013_v14  ;;  %1599 = vmatpush1.msra.mxu0 %v1015_v15  ;;  %v1070_v14 = vld [vmem:[#allocation8 + $0x1088] sm:$0xff]  ;;  %v1072_v15 = vld [vmem:[#allocation8 + $0x1098] sm:$0xff] }
 0x3a4   :  { %1529 = vmatprep.subr.mxu1 %v962_v16  ;;  %1600 = vmatprep.subr.mxu0 %v964_v18  ;;  %v1069_v16 = vld [vmem:[#allocation8 + $0x1080] sm:$0xff]  ;;  %v1071_v18 = vld [vmem:[#allocation8 + $0x1090] sm:$0xff] }
 0x3a5   :  { %1530 = vmatpush1.msra.mxu1 %v961_v19  ;;  %1601 = vmatpush1.msra.mxu0 %v963_v21  ;;  %v1018_v19 = vld [vmem:[#allocation8 + $0xee8] sm:$0xff]  ;;  %v1020_v21 = vld [vmem:[#allocation8 + $0xef8] sm:$0xff] }
 0x3a6   :  { %1531 = vmatprep.subr.mxu1 %v910_v22  ;;  %1602 = vmatprep.subr.mxu0 %v912_v24  ;;  %v1017_v22 = vld [vmem:[#allocation8 + $0xee0] sm:$0xff]  ;;  %v1019_v24 = vld [vmem:[#allocation8 + $0xef0] sm:$0xff] }
 0x3a7   :  { %1532 = vmatpush1.msra.mxu1 %v909_v25  ;;  %1603 = vmatpush1.msra.mxu0 %v911_v27  ;;  %v966_v25 = vld [vmem:[#allocation8 + $0xd48] sm:$0xff]  ;;  %v968_v27 = vld [vmem:[#allocation8 + $0xd58] sm:$0xff] }
 0x3a8   :  { %1533 = vmatprep.subr.mxu1 %v858_v28  ;;  %1604 = vmatprep.subr.mxu0 %v860_v30  ;;  %v965_v28 = vld [vmem:[#allocation8 + $0xd40] sm:$0xff]  ;;  %v967_v30 = vld [vmem:[#allocation8 + $0xd50] sm:$0xff] }
 0x3a9   :  { %1534 = vmatpush1.msra.mxu1 %v857_v31  ;;  %1605 = vmatpush1.msra.mxu0 %v859_v39  ;;  %v914_v31 = vld [vmem:[#allocation8 + $0xba8] sm:$0xff]  ;;  %v916_v39 = vld [vmem:[#allocation8 + $0xbb8] sm:$0xff] }
 0x3aa   :  { %1535 = vmatprep.subr.mxu1 %v806_v40  ;;  %1606 = vmatprep.subr.mxu0 %v808_v41  ;;  %v913_v40 = vld [vmem:[#allocation8 + $0xba0] sm:$0xff]  ;;  %v915_v41 = vld [vmem:[#allocation8 + $0xbb0] sm:$0xff] }
 0x3ab   :  { %1536 = vmatpush1.msra.mxu1 %v805_v37  ;;  %1607 = vmatpush1.msra.mxu0 %v807_v42  ;;  %v862_v37 = vld [vmem:[#allocation8 + $0xa08] sm:$0xff]  ;;  %v864_v42 = vld [vmem:[#allocation8 + $0xa18] sm:$0xff] }
 0x3ac   :  { %1537 = vmatprep.subr.mxu1 %v754_v35  ;;  %1608 = vmatprep.subr.mxu0 %v756_v36  ;;  %v861_v35 = vld [vmem:[#allocation8 + $0xa00] sm:$0xff]  ;;  %v863_v36 = vld [vmem:[#allocation8 + $0xa10] sm:$0xff] }
 0x3ad   :  { %1538 = vmatpush1.msra.mxu1 %v753_v43  ;;  %1609 = vmatpush1.msra.mxu0 %v755_v44  ;;  %v810_v43 = vld [vmem:[#allocation8 + $0x868] sm:$0xff]  ;;  %v812_v44 = vld [vmem:[#allocation8 + $0x878] sm:$0xff] }
 0x3ae   :  { %1539 = vmatprep.subr.mxu1 %v702_v33  ;;  %1610 = vmatprep.subr.mxu0 %v704_v34  ;;  %v809_v33 = vld [vmem:[#allocation8 + $0x860] sm:$0xff]  ;;  %v811_v34 = vld [vmem:[#allocation8 + $0x870] sm:$0xff] }
 0x3af   :  { %1540 = vmatpush1.msra.mxu1 %v701_v45  ;;  %1611 = vmatpush1.msra.mxu0 %v703_v46  ;;  %v758_v45 = vld [vmem:[#allocation8 + $0x6c8] sm:$0xff]  ;;  %v760_v46 = vld [vmem:[#allocation8 + $0x6d8] sm:$0xff] }
 0x3b0   :  { %1541 = vmatprep.subr.mxu1 %v650_v47  ;;  %1612 = vmatprep.subr.mxu0 %v652_v48  ;;  %v757_v47 = vld [vmem:[#allocation8 + $0x6c0] sm:$0xff]  ;;  %v759_v48 = vld [vmem:[#allocation8 + $0x6d0] sm:$0xff] }
 0x3b1   :  { %1542 = vmatpush1.msra.mxu1 %v649_v32  ;;  %1613 = vmatpush1.msra.mxu0 %v651_v29  ;;  %v706_v32 = vld [vmem:[#allocation8 + $0x528] sm:$0xff]  ;;  %v708_v29 = vld [vmem:[#allocation8 + $0x538] sm:$0xff] }
 0x3b2   :  { %1543 = vmatprep.subr.mxu1 %v598_v51  ;;  %1614 = vmatprep.subr.mxu0 %v600_v52  ;;  %v705_v51 = vld [vmem:[#allocation8 + $0x520] sm:$0xff]  ;;  %v707_v52 = vld [vmem:[#allocation8 + $0x530] sm:$0xff] }
 0x3b3   :  { %1544 = vmatpush1.msra.mxu1 %v597_v26  ;;  %1615 = vmatpush1.msra.mxu0 %v599_v23  ;;  %v654_v26 = vld [vmem:[#allocation8 + $0x388] sm:$0xff]  ;;  %v656_v23 = vld [vmem:[#allocation8 + $0x398] sm:$0xff] }
 0x3b4   :  { %1545 = vmatprep.subr.mxu1 %v546_v53  ;;  %1616 = vmatprep.subr.mxu0 %v548_v54  ;;  %v653_v53 = vld [vmem:[#allocation8 + $0x380] sm:$0xff]  ;;  %v655_v54 = vld [vmem:[#allocation8 + $0x390] sm:$0xff] }
 0x3b5   :  { %1546 = vmatpush1.msra.mxu1 %v545_v56  ;;  %1579 = vmatprep.mubr.f32.mxu1 %v5365_v17  ;;  %v602_v56 = vld [vmem:[#allocation8 + $0x1e8] sm:$0xff] }
 0x3b6   :  { %1617 = vmatpush1.msra.mxu0 %v547_v57  ;;  %1650 = vmatprep.mubr.f32.mxu0 %v5365_v17  ;;  %v604_v57 = vld [vmem:[#allocation8 + $0x1f8] sm:$0xff] }
 0x3b7   :  { %1580 = vmatmul.mubr.f32.vlgmr.msra.gmra.mxu1 %v5732_v55  ;;  %1651 = vmatmul.mubr.f32.vlgmr.msra.gmra.mxu0 %v5732_v55 }
 0x3b8   :  { %1657 = vmatprep.subr.mxu1 %v1330_v38  ;;  %1728 = vmatprep.subr.mxu0 %v1332_v59  ;;  %v601_v38 = vld [vmem:[#allocation8 + $0x1e0] sm:$0xff]  ;;  %v603_v59 = vld [vmem:[#allocation8 + $0x1f0] sm:$0xff] }
 0x3b9   :  { %1658 = vmatpush1.msra.mxu1 %v1329_v60  ;;  %1729 = vmatpush1.msra.mxu0 %v1331_v62  ;;  %v550_v60 = vld [vmem:[#allocation8 + $0x48] sm:$0xff]  ;;  %v552_v62 = vld [vmem:[#allocation8 + $0x58] sm:$0xff] }
 0x3ba   :  { %1659 = vmatprep.subr.mxu1 %v1278_v20  ;;  %1730 = vmatprep.subr.mxu0 %v1280_v63  ;;  %v549_v20 = vld [vmem:[#allocation8 + $0x40] sm:$0xff]  ;;  %v551_v63 = vld [vmem:[#allocation8 + $0x50] sm:$0xff] }
 0x3bb   :  { %1660 = vmatpush1.msra.mxu1 %v1277_v0  ;;  %1731 = vmatpush1.msra.mxu0 %v1279_v1  ;;  %v1334_v0 = vld [vmem:[#allocation8 + $0x18c8] sm:$0xff]  ;;  %v1336_v1 = vld [vmem:[#allocation8 + $0x18d8] sm:$0xff] }
 0x3bc   :  { %1661 = vmatprep.subr.mxu1 %v1226_v2  ;;  %1732 = vmatprep.subr.mxu0 %v1228_v3  ;;  %v1333_v2 = vld [vmem:[#allocation8 + $0x18c0] sm:$0xff]  ;;  %v1335_v3 = vld [vmem:[#allocation8 + $0x18d0] sm:$0xff] }
 0x3bd   :  { %1662 = vmatpush1.msra.mxu1 %v1225_v4  ;;  %1733 = vmatpush1.msra.mxu0 %v1227_v5  ;;  %v1282_v4 = vld [vmem:[#allocation8 + $0x1728] sm:$0xff]  ;;  %v1284_v5 = vld [vmem:[#allocation8 + $0x1738] sm:$0xff] }
 0x3be   :  { %1663 = vmatprep.subr.mxu1 %v1174_v6  ;;  %1734 = vmatprep.subr.mxu0 %v1176_v7  ;;  %v1281_v6 = vld [vmem:[#allocation8 + $0x1720] sm:$0xff]  ;;  %v1283_v7 = vld [vmem:[#allocation8 + $0x1730] sm:$0xff] }
 0x3bf   :  { %1664 = vmatpush1.msra.mxu1 %v1173_v8  ;;  %1735 = vmatpush1.msra.mxu0 %v1175_v9  ;;  %v1230_v8 = vld [vmem:[#allocation8 + $0x1588] sm:$0xff]  ;;  %v1232_v9 = vld [vmem:[#allocation8 + $0x1598] sm:$0xff] }
 0x3c0   :  { %1665 = vmatprep.subr.mxu1 %v1122_v10  ;;  %1736 = vmatprep.subr.mxu0 %v1124_v11  ;;  %v1229_v10 = vld [vmem:[#allocation8 + $0x1580] sm:$0xff]  ;;  %v1231_v11 = vld [vmem:[#allocation8 + $0x1590] sm:$0xff] }
 0x3c1   :  { %1666 = vmatpush1.msra.mxu1 %v1121_v12  ;;  %1737 = vmatpush1.msra.mxu0 %v1123_v13  ;;  %v1178_v12 = vld [vmem:[#allocation8 + $0x13e8] sm:$0xff]  ;;  %v1180_v13 = vld [vmem:[#allocation8 + $0x13f8] sm:$0xff] }
 0x3c2   :  { %1667 = vmatprep.subr.mxu1 %v1070_v14  ;;  %1738 = vmatprep.subr.mxu0 %v1072_v15  ;;  %v1177_v14 = vld [vmem:[#allocation8 + $0x13e0] sm:$0xff]  ;;  %v1179_v15 = vld [vmem:[#allocation8 + $0x13f0] sm:$0xff] }
 0x3c3   :  { %1668 = vmatpush1.msra.mxu1 %v1069_v16  ;;  %1739 = vmatpush1.msra.mxu0 %v1071_v18  ;;  %v1126_v16 = vld [vmem:[#allocation8 + $0x1248] sm:$0xff]  ;;  %v1128_v18 = vld [vmem:[#allocation8 + $0x1258] sm:$0xff] }
 0x3c4   :  { %1669 = vmatprep.subr.mxu1 %v1018_v19  ;;  %1740 = vmatprep.subr.mxu0 %v1020_v21  ;;  %v1125_v19 = vld [vmem:[#allocation8 + $0x1240] sm:$0xff]  ;;  %v1127_v21 = vld [vmem:[#allocation8 + $0x1250] sm:$0xff] }
 0x3c5   :  { %1670 = vmatpush1.msra.mxu1 %v1017_v22  ;;  %1741 = vmatpush1.msra.mxu0 %v1019_v24  ;;  %v1074_v22 = vld [vmem:[#allocation8 + $0x10a8] sm:$0xff]  ;;  %v1076_v24 = vld [vmem:[#allocation8 + $0x10b8] sm:$0xff] }
 0x3c6   :  { %1671 = vmatprep.subr.mxu1 %v966_v25  ;;  %1742 = vmatprep.subr.mxu0 %v968_v27  ;;  %v1073_v25 = vld [vmem:[#allocation8 + $0x10a0] sm:$0xff]  ;;  %v1075_v27 = vld [vmem:[#allocation8 + $0x10b0] sm:$0xff] }
 0x3c7   :  { %1672 = vmatpush1.msra.mxu1 %v965_v28  ;;  %1743 = vmatpush1.msra.mxu0 %v967_v30  ;;  %v1022_v28 = vld [vmem:[#allocation8 + $0xf08] sm:$0xff]  ;;  %v1024_v30 = vld [vmem:[#allocation8 + $0xf18] sm:$0xff] }
 0x3c8   :  { %1673 = vmatprep.subr.mxu1 %v914_v31  ;;  %1744 = vmatprep.subr.mxu0 %v916_v39  ;;  %v1021_v31 = vld [vmem:[#allocation8 + $0xf00] sm:$0xff]  ;;  %v1023_v39 = vld [vmem:[#allocation8 + $0xf10] sm:$0xff] }
 0x3c9   :  { %1674 = vmatpush1.msra.mxu1 %v913_v40  ;;  %1745 = vmatpush1.msra.mxu0 %v915_v41  ;;  %v970_v40 = vld [vmem:[#allocation8 + $0xd68] sm:$0xff]  ;;  %v972_v41 = vld [vmem:[#allocation8 + $0xd78] sm:$0xff] }
 0x3ca   :  { %1675 = vmatprep.subr.mxu1 %v862_v37  ;;  %1746 = vmatprep.subr.mxu0 %v864_v42  ;;  %v969_v37 = vld [vmem:[#allocation8 + $0xd60] sm:$0xff]  ;;  %v971_v42 = vld [vmem:[#allocation8 + $0xd70] sm:$0xff] }
 0x3cb   :  { %1676 = vmatpush1.msra.mxu1 %v861_v35  ;;  %1747 = vmatpush1.msra.mxu0 %v863_v36  ;;  %v918_v35 = vld [vmem:[#allocation8 + $0xbc8] sm:$0xff]  ;;  %v920_v36 = vld [vmem:[#allocation8 + $0xbd8] sm:$0xff] }
 0x3cc   :  { %1677 = vmatprep.subr.mxu1 %v810_v43  ;;  %1748 = vmatprep.subr.mxu0 %v812_v44  ;;  %v917_v43 = vld [vmem:[#allocation8 + $0xbc0] sm:$0xff]  ;;  %v919_v44 = vld [vmem:[#allocation8 + $0xbd0] sm:$0xff] }
 0x3cd   :  { %1678 = vmatpush1.msra.mxu1 %v809_v33  ;;  %1749 = vmatpush1.msra.mxu0 %v811_v34  ;;  %v866_v33 = vld [vmem:[#allocation8 + $0xa28] sm:$0xff]  ;;  %v868_v34 = vld [vmem:[#allocation8 + $0xa38] sm:$0xff] }
 0x3ce   :  { %1679 = vmatprep.subr.mxu1 %v758_v45  ;;  %1750 = vmatprep.subr.mxu0 %v760_v46  ;;  %v865_v45 = vld [vmem:[#allocation8 + $0xa20] sm:$0xff]  ;;  %v867_v46 = vld [vmem:[#allocation8 + $0xa30] sm:$0xff] }
 0x3cf   :  { %1680 = vmatpush1.msra.mxu1 %v757_v47  ;;  %1751 = vmatpush1.msra.mxu0 %v759_v48  ;;  %v814_v47 = vld [vmem:[#allocation8 + $0x888] sm:$0xff]  ;;  %v816_v48 = vld [vmem:[#allocation8 + $0x898] sm:$0xff] }
 0x3d0   :  { %1681 = vmatprep.subr.mxu1 %v706_v32  ;;  %1752 = vmatprep.subr.mxu0 %v708_v29  ;;  %v813_v32 = vld [vmem:[#allocation8 + $0x880] sm:$0xff]  ;;  %v815_v29 = vld [vmem:[#allocation8 + $0x890] sm:$0xff] }
 0x3d1   :  { %1682 = vmatpush1.msra.mxu1 %v705_v51  ;;  %1753 = vmatpush1.msra.mxu0 %v707_v52  ;;  %v762_v51 = vld [vmem:[#allocation8 + $0x6e8] sm:$0xff]  ;;  %v764_v52 = vld [vmem:[#allocation8 + $0x6f8] sm:$0xff] }
 0x3d2   :  { %1683 = vmatprep.subr.mxu1 %v654_v26  ;;  %1754 = vmatprep.subr.mxu0 %v656_v23  ;;  %v761_v26 = vld [vmem:[#allocation8 + $0x6e0] sm:$0xff]  ;;  %v763_v23 = vld [vmem:[#allocation8 + $0x6f0] sm:$0xff] }
 0x3d3   :  { %1684 = vmatpush1.msra.mxu1 %v653_v53  ;;  %1755 = vmatpush1.msra.mxu0 %v655_v54  ;;  %v710_v53 = vld [vmem:[#allocation8 + $0x548] sm:$0xff]  ;;  %v712_v54 = vld [vmem:[#allocation8 + $0x558] sm:$0xff] }
 0x3d4   :  { %1685 = vmatprep.subr.mxu1 %v602_v56  ;;  %1756 = vmatprep.subr.mxu0 %v604_v57  ;;  %v709_v56 = vld [vmem:[#allocation8 + $0x540] sm:$0xff]  ;;  %v711_v57 = vld [vmem:[#allocation8 + $0x550] sm:$0xff] }
 0x3d5   :  { %1686 = vmatpush1.msra.mxu1 %v601_v38  ;;  %1757 = vmatpush1.msra.mxu0 %v603_v59  ;;  %v658_v38 = vld [vmem:[#allocation8 + $0x3a8] sm:$0xff]  ;;  %v660_v59 = vld [vmem:[#allocation8 + $0x3b8] sm:$0xff] }
 0x3d6   :  { %1687 = vmatprep.subr.mxu1 %v550_v60  ;;  %1758 = vmatprep.subr.mxu0 %v552_v62  ;;  %v657_v60 = vld [vmem:[#allocation8 + $0x3a0] sm:$0xff]  ;;  %v659_v62 = vld [vmem:[#allocation8 + $0x3b0] sm:$0xff] }
 0x3d7   :  { %1688 = vmatpush1.msra.mxu1 %v549_v20  ;;  %1721 = vmatprep.mubr.f32.mxu1 %v5365_v17  ;;  %v606_v20 = vld [vmem:[#allocation8 + $0x208] sm:$0xff] }
 0x3d8   :  { %1759 = vmatpush1.msra.mxu0 %v551_v63  ;;  %1792 = vmatprep.mubr.f32.mxu0 %v5365_v17  ;;  %v608_v63 = vld [vmem:[#allocation8 + $0x218] sm:$0xff] }
 0x3d9   :  { %1722 = vmatmul.mubr.f32.vlgmr.msra.gmra.mxu1 %v5732_v55  ;;  %1793 = vmatmul.mubr.f32.vlgmr.msra.gmra.mxu0 %v5732_v55 }
 0x3da   :  { %1799 = vmatprep.subr.mxu1 %v1334_v0  ;;  %1870 = vmatprep.subr.mxu0 %v1336_v1  ;;  %v605_v0 = vld [vmem:[#allocation8 + $0x200] sm:$0xff]  ;;  %v607_v1 = vld [vmem:[#allocation8 + $0x210] sm:$0xff] }
 0x3db   :  { %1800 = vmatpush1.msra.mxu1 %v1333_v2  ;;  %1871 = vmatpush1.msra.mxu0 %v1335_v3  ;;  %v554_v2 = vld [vmem:[#allocation8 + $0x68] sm:$0xff]  ;;  %v556_v3 = vld [vmem:[#allocation8 + $0x78] sm:$0xff] }
 0x3dc   :  { %1801 = vmatprep.subr.mxu1 %v1282_v4  ;;  %1872 = vmatprep.subr.mxu0 %v1284_v5  ;;  %v553_v4 = vld [vmem:[#allocation8 + $0x60] sm:$0xff]  ;;  %v555_v5 = vld [vmem:[#allocation8 + $0x70] sm:$0xff] }
 0x3dd   :  { %1802 = vmatpush1.msra.mxu1 %v1281_v6  ;;  %1873 = vmatpush1.msra.mxu0 %v1283_v7  ;;  %v1338_v6 = vld [vmem:[#allocation8 + $0x18e8] sm:$0xff]  ;;  %v1340_v7 = vld [vmem:[#allocation8 + $0x18f8] sm:$0xff] }
 0x3de   :  { %1803 = vmatprep.subr.mxu1 %v1230_v8  ;;  %1874 = vmatprep.subr.mxu0 %v1232_v9  ;;  %v1337_v8 = vld [vmem:[#allocation8 + $0x18e0] sm:$0xff]  ;;  %v1339_v9 = vld [vmem:[#allocation8 + $0x18f0] sm:$0xff] }
 0x3df   :  { %1804 = vmatpush1.msra.mxu1 %v1229_v10  ;;  %1875 = vmatpush1.msra.mxu0 %v1231_v11  ;;  %v1286_v10 = vld [vmem:[#allocation8 + $0x1748] sm:$0xff]  ;;  %v1288_v11 = vld [vmem:[#allocation8 + $0x1758] sm:$0xff] }
 0x3e0   :  { %1805 = vmatprep.subr.mxu1 %v1178_v12  ;;  %1876 = vmatprep.subr.mxu0 %v1180_v13  ;;  %v1285_v12 = vld [vmem:[#allocation8 + $0x1740] sm:$0xff]  ;;  %v1287_v13 = vld [vmem:[#allocation8 + $0x1750] sm:$0xff] }
 0x3e1   :  { %1806 = vmatpush1.msra.mxu1 %v1177_v14  ;;  %1877 = vmatpush1.msra.mxu0 %v1179_v15  ;;  %v1234_v14 = vld [vmem:[#allocation8 + $0x15a8] sm:$0xff]  ;;  %v1236_v15 = vld [vmem:[#allocation8 + $0x15b8] sm:$0xff] }
 0x3e2   :  { %1807 = vmatprep.subr.mxu1 %v1126_v16  ;;  %1878 = vmatprep.subr.mxu0 %v1128_v18  ;;  %v1233_v16 = vld [vmem:[#allocation8 + $0x15a0] sm:$0xff]  ;;  %v1235_v18 = vld [vmem:[#allocation8 + $0x15b0] sm:$0xff] }
 0x3e3   :  { %1808 = vmatpush1.msra.mxu1 %v1125_v19  ;;  %1879 = vmatpush1.msra.mxu0 %v1127_v21  ;;  %v1182_v19 = vld [vmem:[#allocation8 + $0x1408] sm:$0xff]  ;;  %v1184_v21 = vld [vmem:[#allocation8 + $0x1418] sm:$0xff] }
 0x3e4   :  { %1809 = vmatprep.subr.mxu1 %v1074_v22  ;;  %1880 = vmatprep.subr.mxu0 %v1076_v24  ;;  %v1183_v22 = vld [vmem:[#allocation8 + $0x1410] sm:$0xff]  ;;  %v1130_v24 = vld [vmem:[#allocation8 + $0x1268] sm:$0xff] }
 0x3e5   :  { %1810 = vmatpush1.msra.mxu1 %v1073_v25  ;;  %1881 = vmatpush1.msra.mxu0 %v1075_v27  ;;  %v1132_v25 = vld [vmem:[#allocation8 + $0x1278] sm:$0xff]  ;;  %v1129_v27 = vld [vmem:[#allocation8 + $0x1260] sm:$0xff] }
 0x3e6   :  { %1811 = vmatprep.subr.mxu1 %v1022_v28  ;;  %1882 = vmatprep.subr.mxu0 %v1024_v30  ;;  %v1131_v28 = vld [vmem:[#allocation8 + $0x1270] sm:$0xff]  ;;  %v1078_v30 = vld [vmem:[#allocation8 + $0x10c8] sm:$0xff] }
 0x3e7   :  { %1812 = vmatpush1.msra.mxu1 %v1021_v31  ;;  %1883 = vmatpush1.msra.mxu0 %v1023_v39  ;;  %v1080_v31 = vld [vmem:[#allocation8 + $0x10d8] sm:$0xff]  ;;  %v1077_v39 = vld [vmem:[#allocation8 + $0x10c0] sm:$0xff] }
 0x3e8   :  { %1813 = vmatprep.subr.mxu1 %v970_v40  ;;  %1884 = vmatprep.subr.mxu0 %v972_v41  ;;  %v1079_v40 = vld [vmem:[#allocation8 + $0x10d0] sm:$0xff]  ;;  %v1026_v41 = vld [vmem:[#allocation8 + $0xf28] sm:$0xff] }
 0x3e9   :  { %1814 = vmatpush1.msra.mxu1 %v969_v37  ;;  %1885 = vmatpush1.msra.mxu0 %v971_v42  ;;  %v1028_v37 = vld [vmem:[#allocation8 + $0xf38] sm:$0xff]  ;;  %v1025_v42 = vld [vmem:[#allocation8 + $0xf20] sm:$0xff] }
 0x3ea   :  { %1815 = vmatprep.subr.mxu1 %v918_v35  ;;  %1886 = vmatprep.subr.mxu0 %v920_v36  ;;  %v1027_v35 = vld [vmem:[#allocation8 + $0xf30] sm:$0xff]  ;;  %v974_v36 = vld [vmem:[#allocation8 + $0xd88] sm:$0xff] }
 0x3eb   :  { %1816 = vmatpush1.msra.mxu1 %v917_v43  ;;  %1887 = vmatpush1.msra.mxu0 %v919_v44  ;;  %v976_v43 = vld [vmem:[#allocation8 + $0xd98] sm:$0xff]  ;;  %v973_v44 = vld [vmem:[#allocation8 + $0xd80] sm:$0xff] }
 0x3ec   :  { %1817 = vmatprep.subr.mxu1 %v866_v33  ;;  %1888 = vmatprep.subr.mxu0 %v868_v34  ;;  %v975_v33 = vld [vmem:[#allocation8 + $0xd90] sm:$0xff]  ;;  %v922_v34 = vld [vmem:[#allocation8 + $0xbe8] sm:$0xff] }
 0x3ed   :  { %1818 = vmatpush1.msra.mxu1 %v865_v45  ;;  %1889 = vmatpush1.msra.mxu0 %v867_v46  ;;  %v924_v45 = vld [vmem:[#allocation8 + $0xbf8] sm:$0xff]  ;;  %v921_v46 = vld [vmem:[#allocation8 + $0xbe0] sm:$0xff] }
 0x3ee   :  { %1819 = vmatprep.subr.mxu1 %v814_v47  ;;  %1890 = vmatprep.subr.mxu0 %v816_v48  ;;  %v923_v47 = vld [vmem:[#allocation8 + $0xbf0] sm:$0xff]  ;;  %v870_v48 = vld [vmem:[#allocation8 + $0xa48] sm:$0xff] }
 0x3ef   :  { %1820 = vmatpush1.msra.mxu1 %v813_v32  ;;  %1891 = vmatpush1.msra.mxu0 %v815_v29  ;;  %v872_v32 = vld [vmem:[#allocation8 + $0xa58] sm:$0xff]  ;;  %v869_v29 = vld [vmem:[#allocation8 + $0xa40] sm:$0xff] }
 0x3f0   :  { %1821 = vmatprep.subr.mxu1 %v762_v51  ;;  %1892 = vmatprep.subr.mxu0 %v764_v52  ;;  %v871_v51 = vld [vmem:[#allocation8 + $0xa50] sm:$0xff]  ;;  %v818_v52 = vld [vmem:[#allocation8 + $0x8a8] sm:$0xff] }
 0x3f1   :  { %1822 = vmatpush1.msra.mxu1 %v761_v26  ;;  %1893 = vmatpush1.msra.mxu0 %v763_v23  ;;  %v820_v26 = vld [vmem:[#allocation8 + $0x8b8] sm:$0xff]  ;;  %v817_v23 = vld [vmem:[#allocation8 + $0x8a0] sm:$0xff] }
 0x3f2   :  { %1823 = vmatprep.subr.mxu1 %v710_v53  ;;  %1894 = vmatprep.subr.mxu0 %v712_v54  ;;  %v819_v53 = vld [vmem:[#allocation8 + $0x8b0] sm:$0xff]  ;;  %v766_v54 = vld [vmem:[#allocation8 + $0x708] sm:$0xff] }
 0x3f3   :  { %1824 = vmatpush1.msra.mxu1 %v709_v56  ;;  %1895 = vmatpush1.msra.mxu0 %v711_v57  ;;  %v768_v56 = vld [vmem:[#allocation8 + $0x718] sm:$0xff]  ;;  %v765_v57 = vld [vmem:[#allocation8 + $0x700] sm:$0xff] }
 0x3f4   :  { %1825 = vmatprep.subr.mxu1 %v658_v38  ;;  %1896 = vmatprep.subr.mxu0 %v660_v59  ;;  %v767_v38 = vld [vmem:[#allocation8 + $0x710] sm:$0xff]  ;;  %v714_v59 = vld [vmem:[#allocation8 + $0x568] sm:$0xff] }
 0x3f5   :  { %1826 = vmatpush1.msra.mxu1 %v657_v60  ;;  %1897 = vmatpush1.msra.mxu0 %v659_v62  ;;  %v716_v60 = vld [vmem:[#allocation8 + $0x578] sm:$0xff]  ;;  %v713_v62 = vld [vmem:[#allocation8 + $0x560] sm:$0xff] }
 0x3f6   :  { %1827 = vmatprep.subr.mxu1 %v606_v20  ;;  %1898 = vmatprep.subr.mxu0 %v608_v63  ;;  %v715_v20 = vld [vmem:[#allocation8 + $0x570] sm:$0xff]  ;;  %v662_v63 = vld [vmem:[#allocation8 + $0x3c8] sm:$0xff] }
 0x3f7   :  { %1828 = vmatpush1.msra.mxu1 %v605_v0  ;;  %1899 = vmatpush1.msra.mxu0 %v607_v1  ;;  %v664_v0 = vld [vmem:[#allocation8 + $0x3d8] sm:$0xff]  ;;  %v661_v1 = vld [vmem:[#allocation8 + $0x3c0] sm:$0xff] }
 0x3f8   :  { %1829 = vmatprep.subr.mxu1 %v554_v2  ;;  %1900 = vmatprep.subr.mxu0 %v556_v3  ;;  %v663_v2 = vld [vmem:[#allocation8 + $0x3d0] sm:$0xff]  ;;  %v610_v3 = vld [vmem:[#allocation8 + $0x228] sm:$0xff] }
 0x3f9   :  { %1830 = vmatpush1.msra.mxu1 %v553_v4  ;;  %1863 = vmatprep.mubr.f32.mxu1 %v5365_v17  ;;  %v612_v4 = vld [vmem:[#allocation8 + $0x238] sm:$0xff] }
 0x3fa   :  { %1901 = vmatpush1.msra.mxu0 %v555_v5  ;;  %1934 = vmatprep.mubr.f32.mxu0 %v5365_v17  ;;  %v609_v5 = vld [vmem:[#allocation8 + $0x220] sm:$0xff] }
 0x3fb   :  { %1864 = vmatmul.mubr.f32.vlgmr.msra.gmra.mxu1 %v5732_v55  ;;  %1935 = vmatmul.mubr.f32.vlgmr.msra.gmra.mxu0 %v5732_v55  ;;  %v1181_v55 = vld [vmem:[#allocation8 + $0x1400] sm:$0xff] }
 0x3fc   :  { %1941 = vmatprep.subr.mxu1 %v1338_v6  ;;  %2012 = vmatprep.subr.mxu0 %v1340_v7  ;;  %v611_v6 = vld [vmem:[#allocation8 + $0x230] sm:$0xff]  ;;  %v558_v7 = vld [vmem:[#allocation8 + $0x88] sm:$0xff] }
 0x3fd   :  { %1942 = vmatpush1.msra.mxu1 %v1337_v8  ;;  %2013 = vmatpush1.msra.mxu0 %v1339_v9  ;;  %v560_v8 = vld [vmem:[#allocation8 + $0x98] sm:$0xff]  ;;  %v557_v9 = vld [vmem:[#allocation8 + $0x80] sm:$0xff] }
 0x3fe   :  { %1943 = vmatprep.subr.mxu1 %v1286_v10  ;;  %2014 = vmatprep.subr.mxu0 %v1288_v11  ;;  %v559_v10 = vld [vmem:[#allocation8 + $0x90] sm:$0xff]  ;;  %v1342_v11 = vld [vmem:[#allocation8 + $0x1908] sm:$0xff] }
 0x3ff   :  { %1944 = vmatpush1.msra.mxu1 %v1285_v12  ;;  %2015 = vmatpush1.msra.mxu0 %v1287_v13  ;;  %v1344_v12 = vld [vmem:[#allocation8 + $0x1918] sm:$0xff]  ;;  %v1341_v13 = vld [vmem:[#allocation8 + $0x1900] sm:$0xff] }
 0x400   :  { %1945 = vmatprep.subr.mxu1 %v1234_v14  ;;  %2016 = vmatprep.subr.mxu0 %v1236_v15  ;;  %v1343_v14 = vld [vmem:[#allocation8 + $0x1910] sm:$0xff] }
 0x401   :  { %1946 = vmatpush1.msra.mxu1 %v1233_v16  ;;  %2017 = vmatpush1.msra.mxu0 %v1235_v18  ;;  %v5750_v15 = vld [vmem:[#allocation2] sm:$0xf]  ;;  %v1290_v16 = vld [vmem:[#allocation8 + $0x1768] sm:$0xff]  ;;  %v1292_v18 = vld [vmem:[#allocation8 + $0x1778] sm:$0xff] }
 0x402   :  { %1947 = vmatprep.subr.mxu1 %v1182_v19  ;;  %2018 = vmatprep.subr.mxu0 %v1184_v21  ;;  %v1289_v19 = vld [vmem:[#allocation8 + $0x1760] sm:$0xff]  ;;  %v1291_v21 = vld [vmem:[#allocation8 + $0x1770] sm:$0xff] }
 0x403   :  { %1948 = vmatpush1.msra.mxu1 %v1181_v55  ;;  %2019 = vmatpush1.msra.mxu0 %v1183_v22  ;;  %v1238_v55 = vld [vmem:[#allocation8 + $0x15c8] sm:$0xff]  ;;  %v1240_v22 = vld [vmem:[#allocation8 + $0x15d8] sm:$0xff] }
 0x404   :  { %1949 = vmatprep.subr.mxu1 %v1130_v24  ;;  %2020 = vmatprep.subr.mxu0 %v1132_v25  ;;  %v1237_v24 = vld [vmem:[#allocation8 + $0x15c0] sm:$0xff]  ;;  %v1239_v25 = vld [vmem:[#allocation8 + $0x15d0] sm:$0xff] }
 0x405   :  { %1950 = vmatpush1.msra.mxu1 %v1129_v27  ;;  %2021 = vmatpush1.msra.mxu0 %v1131_v28  ;;  %v1186_v27 = vld [vmem:[#allocation8 + $0x1428] sm:$0xff]  ;;  %v1188_v28 = vld [vmem:[#allocation8 + $0x1438] sm:$0xff] }
 0x406   :  { %1951 = vmatprep.subr.mxu1 %v1078_v30  ;;  %2022 = vmatprep.subr.mxu0 %v1080_v31  ;;  %v1185_v30 = vld [vmem:[#allocation8 + $0x1420] sm:$0xff]  ;;  %v1187_v31 = vld [vmem:[#allocation8 + $0x1430] sm:$0xff] }
 0x407   :  { %1952 = vmatpush1.msra.mxu1 %v1077_v39  ;;  %2023 = vmatpush1.msra.mxu0 %v1079_v40  ;;  %v1134_v39 = vld [vmem:[#allocation8 + $0x1288] sm:$0xff]  ;;  %v1136_v40 = vld [vmem:[#allocation8 + $0x1298] sm:$0xff] }
 0x408   :  { %1953 = vmatprep.subr.mxu1 %v1026_v41  ;;  %2024 = vmatprep.subr.mxu0 %v1028_v37  ;;  %v1133_v41 = vld [vmem:[#allocation8 + $0x1280] sm:$0xff]  ;;  %v1135_v37 = vld [vmem:[#allocation8 + $0x1290] sm:$0xff] }
 0x409   :  { %1954 = vmatpush1.msra.mxu1 %v1025_v42  ;;  %2025 = vmatpush1.msra.mxu0 %v1027_v35  ;;  %v1082_v42 = vld [vmem:[#allocation8 + $0x10e8] sm:$0xff]  ;;  %v1084_v35 = vld [vmem:[#allocation8 + $0x10f8] sm:$0xff] }
 0x40a   :  { %1955 = vmatprep.subr.mxu1 %v974_v36  ;;  %2026 = vmatprep.subr.mxu0 %v976_v43  ;;  %v1081_v36 = vld [vmem:[#allocation8 + $0x10e0] sm:$0xff]  ;;  %v1083_v43 = vld [vmem:[#allocation8 + $0x10f0] sm:$0xff] }
 0x40b   :  { %1956 = vmatpush1.msra.mxu1 %v973_v44  ;;  %2027 = vmatpush1.msra.mxu0 %v975_v33  ;;  %v1030_v44 = vld [vmem:[#allocation8 + $0xf48] sm:$0xff]  ;;  %v1032_v33 = vld [vmem:[#allocation8 + $0xf58] sm:$0xff] }
 0x40c   :  { %1957 = vmatprep.subr.mxu1 %v922_v34  ;;  %2028 = vmatprep.subr.mxu0 %v924_v45  ;;  %v1029_v34 = vld [vmem:[#allocation8 + $0xf40] sm:$0xff]  ;;  %v1031_v45 = vld [vmem:[#allocation8 + $0xf50] sm:$0xff] }
 0x40d   :  { %1958 = vmatpush1.msra.mxu1 %v921_v46  ;;  %2029 = vmatpush1.msra.mxu0 %v923_v47  ;;  %v978_v46 = vld [vmem:[#allocation8 + $0xda8] sm:$0xff]  ;;  %v980_v47 = vld [vmem:[#allocation8 + $0xdb8] sm:$0xff] }
 0x40e   :  { %1959 = vmatprep.subr.mxu1 %v870_v48  ;;  %2030 = vmatprep.subr.mxu0 %v872_v32  ;;  %v977_v48 = vld [vmem:[#allocation8 + $0xda0] sm:$0xff]  ;;  %v979_v32 = vld [vmem:[#allocation8 + $0xdb0] sm:$0xff] }
 0x40f   :  { %1960 = vmatpush1.msra.mxu1 %v869_v29  ;;  %2031 = vmatpush1.msra.mxu0 %v871_v51  ;;  %v926_v29 = vld [vmem:[#allocation8 + $0xc08] sm:$0xff]  ;;  %v928_v51 = vld [vmem:[#allocation8 + $0xc18] sm:$0xff] }
 0x410   :  { %1961 = vmatprep.subr.mxu1 %v818_v52  ;;  %2032 = vmatprep.subr.mxu0 %v820_v26  ;;  %v925_v52 = vld [vmem:[#allocation8 + $0xc00] sm:$0xff]  ;;  %v927_v26 = vld [vmem:[#allocation8 + $0xc10] sm:$0xff] }
 0x411   :  { %1962 = vmatpush1.msra.mxu1 %v817_v23  ;;  %2033 = vmatpush1.msra.mxu0 %v819_v53  ;;  %v874_v23 = vld [vmem:[#allocation8 + $0xa68] sm:$0xff]  ;;  %v876_v53 = vld [vmem:[#allocation8 + $0xa78] sm:$0xff] }
 0x412   :  { %1963 = vmatprep.subr.mxu1 %v766_v54  ;;  %2034 = vmatprep.subr.mxu0 %v768_v56  ;;  %v873_v54 = vld [vmem:[#allocation8 + $0xa60] sm:$0xff]  ;;  %v875_v56 = vld [vmem:[#allocation8 + $0xa70] sm:$0xff] }
 0x413   :  { %1964 = vmatpush1.msra.mxu1 %v765_v57  ;;  %2035 = vmatpush1.msra.mxu0 %v767_v38  ;;  %v822_v57 = vld [vmem:[#allocation8 + $0x8c8] sm:$0xff]  ;;  %v824_v38 = vld [vmem:[#allocation8 + $0x8d8] sm:$0xff] }
 0x414   :  { %1965 = vmatprep.subr.mxu1 %v714_v59  ;;  %2036 = vmatprep.subr.mxu0 %v716_v60  ;;  %v821_v59 = vld [vmem:[#allocation8 + $0x8c0] sm:$0xff]  ;;  %v823_v60 = vld [vmem:[#allocation8 + $0x8d0] sm:$0xff] }
 0x415   :  { %1966 = vmatpush1.msra.mxu1 %v713_v62  ;;  %2037 = vmatpush1.msra.mxu0 %v715_v20  ;;  %v770_v62 = vld [vmem:[#allocation8 + $0x728] sm:$0xff]  ;;  %v772_v20 = vld [vmem:[#allocation8 + $0x738] sm:$0xff] }
 0x416   :  { %1967 = vmatprep.subr.mxu1 %v662_v63  ;;  %2038 = vmatprep.subr.mxu0 %v664_v0  ;;  %v769_v63 = vld [vmem:[#allocation8 + $0x720] sm:$0xff]  ;;  %v771_v0 = vld [vmem:[#allocation8 + $0x730] sm:$0xff] }
 0x417   :  { %1968 = vmatpush1.msra.mxu1 %v661_v1  ;;  %2039 = vmatpush1.msra.mxu0 %v663_v2  ;;  %v718_v1 = vld [vmem:[#allocation8 + $0x588] sm:$0xff]  ;;  %v720_v2 = vld [vmem:[#allocation8 + $0x598] sm:$0xff] }
 0x418   :  { %1969 = vmatprep.subr.mxu1 %v610_v3  ;;  %2040 = vmatprep.subr.mxu0 %v612_v4  ;;  %v717_v3 = vld [vmem:[#allocation8 + $0x580] sm:$0xff]  ;;  %v719_v4 = vld [vmem:[#allocation8 + $0x590] sm:$0xff] }
 0x419   :  { %1970 = vmatpush1.msra.mxu1 %v609_v5  ;;  %2041 = vmatpush1.msra.mxu0 %v611_v6  ;;  %v666_v5 = vld [vmem:[#allocation8 + $0x3e8] sm:$0xff]  ;;  %v668_v6 = vld [vmem:[#allocation8 + $0x3f8] sm:$0xff] }
 0x41a   :  { %1971 = vmatprep.subr.mxu1 %v558_v7  ;;  %2042 = vmatprep.subr.mxu0 %v560_v8  ;;  %v665_v7 = vld [vmem:[#allocation8 + $0x3e0] sm:$0xff]  ;;  %v667_v8 = vld [vmem:[#allocation8 + $0x3f0] sm:$0xff] }
 0x41b   :  { %1972 = vmatpush1.msra.mxu1 %v557_v9  ;;  %2005 = vmatprep.mubr.f32.mxu1 %v5365_v17  ;;  %v614_v9 = vld [vmem:[#allocation8 + $0x248] sm:$0xff] }
 0x41c   :  { %2043 = vmatpush1.msra.mxu0 %v559_v10  ;;  %2076 = vmatprep.mubr.f32.mxu0 %v5365_v17  ;;  %v616_v10 = vld [vmem:[#allocation8 + $0x258] sm:$0xff] }
 0x41d   :  { %2006 = vmatmul.mubr.f32.vlgmr.msra.gmra.mxu1 %v5750_v15  ;;  %2077 = vmatmul.mubr.f32.vlgmr.msra.gmra.mxu0 %v5750_v15 }
 0x41e   :  { %2083 = vmatprep.subr.mxu1 %v1342_v11  ;;  %2154 = vmatprep.subr.mxu0 %v1344_v12  ;;  %v613_v11 = vld [vmem:[#allocation8 + $0x240] sm:$0xff]  ;;  %v615_v12 = vld [vmem:[#allocation8 + $0x250] sm:$0xff] }
 0x41f   :  { %2084 = vmatpush1.msra.mxu1 %v1341_v13  ;;  %2155 = vmatpush1.msra.mxu0 %v1343_v14  ;;  %v562_v13 = vld [vmem:[#allocation8 + $0xa8] sm:$0xff]  ;;  %v564_v14 = vld [vmem:[#allocation8 + $0xb8] sm:$0xff] }
 0x420   :  { %2085 = vmatprep.subr.mxu1 %v1290_v16  ;;  %2156 = vmatprep.subr.mxu0 %v1292_v18  ;;  %v561_v16 = vld [vmem:[#allocation8 + $0xa0] sm:$0xff]  ;;  %v563_v18 = vld [vmem:[#allocation8 + $0xb0] sm:$0xff] }
 0x421   :  { %2086 = vmatpush1.msra.mxu1 %v1289_v19  ;;  %2157 = vmatpush1.msra.mxu0 %v1291_v21  ;;  %v1346_v19 = vld [vmem:[#allocation8 + $0x1928] sm:$0xff]  ;;  %v1348_v21 = vld [vmem:[#allocation8 + $0x1938] sm:$0xff] }
 0x422   :  { %2087 = vmatprep.subr.mxu1 %v1238_v55  ;;  %2158 = vmatprep.subr.mxu0 %v1240_v22  ;;  %v1345_v55 = vld [vmem:[#allocation8 + $0x1920] sm:$0xff]  ;;  %v1347_v22 = vld [vmem:[#allocation8 + $0x1930] sm:$0xff] }
 0x423   :  { %2088 = vmatpush1.msra.mxu1 %v1237_v24  ;;  %2159 = vmatpush1.msra.mxu0 %v1239_v25  ;;  %v1294_v24 = vld [vmem:[#allocation8 + $0x1788] sm:$0xff]  ;;  %v1296_v25 = vld [vmem:[#allocation8 + $0x1798] sm:$0xff] }
 0x424   :  { %2089 = vmatprep.subr.mxu1 %v1186_v27  ;;  %2160 = vmatprep.subr.mxu0 %v1188_v28  ;;  %v1293_v27 = vld [vmem:[#allocation8 + $0x1780] sm:$0xff]  ;;  %v1295_v28 = vld [vmem:[#allocation8 + $0x1790] sm:$0xff] }
 0x425   :  { %2090 = vmatpush1.msra.mxu1 %v1185_v30  ;;  %2161 = vmatpush1.msra.mxu0 %v1187_v31  ;;  %v1242_v30 = vld [vmem:[#allocation8 + $0x15e8] sm:$0xff]  ;;  %v1244_v31 = vld [vmem:[#allocation8 + $0x15f8] sm:$0xff] }
 0x426   :  { %2091 = vmatprep.subr.mxu1 %v1134_v39  ;;  %2162 = vmatprep.subr.mxu0 %v1136_v40  ;;  %v1241_v39 = vld [vmem:[#allocation8 + $0x15e0] sm:$0xff]  ;;  %v1243_v40 = vld [vmem:[#allocation8 + $0x15f0] sm:$0xff] }
 0x427   :  { %2092 = vmatpush1.msra.mxu1 %v1133_v41  ;;  %2163 = vmatpush1.msra.mxu0 %v1135_v37  ;;  %v1190_v41 = vld [vmem:[#allocation8 + $0x1448] sm:$0xff]  ;;  %v1192_v37 = vld [vmem:[#allocation8 + $0x1458] sm:$0xff] }
 0x428   :  { %2093 = vmatprep.subr.mxu1 %v1082_v42  ;;  %2164 = vmatprep.subr.mxu0 %v1084_v35  ;;  %v1189_v42 = vld [vmem:[#allocation8 + $0x1440] sm:$0xff]  ;;  %v1191_v35 = vld [vmem:[#allocation8 + $0x1450] sm:$0xff] }
 0x429   :  { %2094 = vmatpush1.msra.mxu1 %v1081_v36  ;;  %2165 = vmatpush1.msra.mxu0 %v1083_v43  ;;  %v1138_v36 = vld [vmem:[#allocation8 + $0x12a8] sm:$0xff]  ;;  %v1140_v43 = vld [vmem:[#allocation8 + $0x12b8] sm:$0xff] }
 0x42a   :  { %2095 = vmatprep.subr.mxu1 %v1030_v44  ;;  %2166 = vmatprep.subr.mxu0 %v1032_v33  ;;  %v1137_v44 = vld [vmem:[#allocation8 + $0x12a0] sm:$0xff]  ;;  %v1139_v33 = vld [vmem:[#allocation8 + $0x12b0] sm:$0xff] }
 0x42b   :  { %2096 = vmatpush1.msra.mxu1 %v1029_v34  ;;  %2167 = vmatpush1.msra.mxu0 %v1031_v45  ;;  %v1086_v34 = vld [vmem:[#allocation8 + $0x1108] sm:$0xff]  ;;  %v1088_v45 = vld [vmem:[#allocation8 + $0x1118] sm:$0xff] }
 0x42c   :  { %2097 = vmatprep.subr.mxu1 %v978_v46  ;;  %2168 = vmatprep.subr.mxu0 %v980_v47  ;;  %v1085_v46 = vld [vmem:[#allocation8 + $0x1100] sm:$0xff]  ;;  %v1087_v47 = vld [vmem:[#allocation8 + $0x1110] sm:$0xff] }
 0x42d   :  { %2098 = vmatpush1.msra.mxu1 %v977_v48  ;;  %2169 = vmatpush1.msra.mxu0 %v979_v32  ;;  %v1034_v48 = vld [vmem:[#allocation8 + $0xf68] sm:$0xff]  ;;  %v1036_v32 = vld [vmem:[#allocation8 + $0xf78] sm:$0xff] }
 0x42e   :  { %2099 = vmatprep.subr.mxu1 %v926_v29  ;;  %2170 = vmatprep.subr.mxu0 %v928_v51  ;;  %v1033_v29 = vld [vmem:[#allocation8 + $0xf60] sm:$0xff]  ;;  %v1035_v51 = vld [vmem:[#allocation8 + $0xf70] sm:$0xff] }
 0x42f   :  { %2100 = vmatpush1.msra.mxu1 %v925_v52  ;;  %2171 = vmatpush1.msra.mxu0 %v927_v26  ;;  %v982_v52 = vld [vmem:[#allocation8 + $0xdc8] sm:$0xff]  ;;  %v984_v26 = vld [vmem:[#allocation8 + $0xdd8] sm:$0xff] }
 0x430   :  { %2101 = vmatprep.subr.mxu1 %v874_v23  ;;  %2172 = vmatprep.subr.mxu0 %v876_v53  ;;  %v981_v23 = vld [vmem:[#allocation8 + $0xdc0] sm:$0xff]  ;;  %v983_v53 = vld [vmem:[#allocation8 + $0xdd0] sm:$0xff] }
 0x431   :  { %2102 = vmatpush1.msra.mxu1 %v873_v54  ;;  %2173 = vmatpush1.msra.mxu0 %v875_v56  ;;  %v930_v54 = vld [vmem:[#allocation8 + $0xc28] sm:$0xff]  ;;  %v932_v56 = vld [vmem:[#allocation8 + $0xc38] sm:$0xff] }
 0x432   :  { %2103 = vmatprep.subr.mxu1 %v822_v57  ;;  %2174 = vmatprep.subr.mxu0 %v824_v38  ;;  %v929_v57 = vld [vmem:[#allocation8 + $0xc20] sm:$0xff]  ;;  %v931_v38 = vld [vmem:[#allocation8 + $0xc30] sm:$0xff] }
 0x433   :  { %2104 = vmatpush1.msra.mxu1 %v821_v59  ;;  %2175 = vmatpush1.msra.mxu0 %v823_v60  ;;  %v878_v59 = vld [vmem:[#allocation8 + $0xa88] sm:$0xff]  ;;  %v880_v60 = vld [vmem:[#allocation8 + $0xa98] sm:$0xff] }
 0x434   :  { %2105 = vmatprep.subr.mxu1 %v770_v62  ;;  %2176 = vmatprep.subr.mxu0 %v772_v20  ;;  %v877_v62 = vld [vmem:[#allocation8 + $0xa80] sm:$0xff]  ;;  %v879_v20 = vld [vmem:[#allocation8 + $0xa90] sm:$0xff] }
 0x435   :  { %2106 = vmatpush1.msra.mxu1 %v769_v63  ;;  %2177 = vmatpush1.msra.mxu0 %v771_v0  ;;  %v826_v63 = vld [vmem:[#allocation8 + $0x8e8] sm:$0xff]  ;;  %v828_v0 = vld [vmem:[#allocation8 + $0x8f8] sm:$0xff] }
 0x436   :  { %2107 = vmatprep.subr.mxu1 %v718_v1  ;;  %2178 = vmatprep.subr.mxu0 %v720_v2  ;;  %v825_v1 = vld [vmem:[#allocation8 + $0x8e0] sm:$0xff]  ;;  %v827_v2 = vld [vmem:[#allocation8 + $0x8f0] sm:$0xff] }
 0x437   :  { %2108 = vmatpush1.msra.mxu1 %v717_v3  ;;  %2179 = vmatpush1.msra.mxu0 %v719_v4  ;;  %v774_v3 = vld [vmem:[#allocation8 + $0x748] sm:$0xff]  ;;  %v776_v4 = vld [vmem:[#allocation8 + $0x758] sm:$0xff] }
 0x438   :  { %2109 = vmatprep.subr.mxu1 %v666_v5  ;;  %2180 = vmatprep.subr.mxu0 %v668_v6  ;;  %v773_v5 = vld [vmem:[#allocation8 + $0x740] sm:$0xff]  ;;  %v775_v6 = vld [vmem:[#allocation8 + $0x750] sm:$0xff] }
 0x439   :  { %2110 = vmatpush1.msra.mxu1 %v665_v7  ;;  %2181 = vmatpush1.msra.mxu0 %v667_v8  ;;  %v722_v7 = vld [vmem:[#allocation8 + $0x5a8] sm:$0xff]  ;;  %v724_v8 = vld [vmem:[#allocation8 + $0x5b8] sm:$0xff] }
 0x43a   :  { %2111 = vmatprep.subr.mxu1 %v614_v9  ;;  %2182 = vmatprep.subr.mxu0 %v616_v10  ;;  %v721_v9 = vld [vmem:[#allocation8 + $0x5a0] sm:$0xff]  ;;  %v723_v10 = vld [vmem:[#allocation8 + $0x5b0] sm:$0xff] }
 0x43b   :  { %2112 = vmatpush1.msra.mxu1 %v613_v11  ;;  %2183 = vmatpush1.msra.mxu0 %v615_v12  ;;  %v670_v11 = vld [vmem:[#allocation8 + $0x408] sm:$0xff]  ;;  %v672_v12 = vld [vmem:[#allocation8 + $0x418] sm:$0xff] }
 0x43c   :  { %2113 = vmatprep.subr.mxu1 %v562_v13  ;;  %2184 = vmatprep.subr.mxu0 %v564_v14  ;;  %v669_v13 = vld [vmem:[#allocation8 + $0x400] sm:$0xff]  ;;  %v671_v14 = vld [vmem:[#allocation8 + $0x410] sm:$0xff] }
 0x43d   :  { %2114 = vmatpush1.msra.mxu1 %v561_v16  ;;  %2147 = vmatprep.mubr.f32.mxu1 %v5365_v17  ;;  %v618_v16 = vld [vmem:[#allocation8 + $0x268] sm:$0xff] }
 0x43e   :  { %2185 = vmatpush1.msra.mxu0 %v563_v18  ;;  %2218 = vmatprep.mubr.f32.mxu0 %v5365_v17  ;;  %v620_v18 = vld [vmem:[#allocation8 + $0x278] sm:$0xff] }
 0x43f   :  { %2148 = vmatmul.mubr.f32.vlgmr.msra.gmra.mxu1 %v5750_v15  ;;  %2219 = vmatmul.mubr.f32.vlgmr.msra.gmra.mxu0 %v5750_v15 }
 0x440   :  { %2225 = vmatprep.subr.mxu1 %v1346_v19  ;;  %2296 = vmatprep.subr.mxu0 %v1348_v21  ;;  %v617_v19 = vld [vmem:[#allocation8 + $0x260] sm:$0xff]  ;;  %v619_v21 = vld [vmem:[#allocation8 + $0x270] sm:$0xff] }
 0x441   :  { %2226 = vmatpush1.msra.mxu1 %v1345_v55  ;;  %2297 = vmatpush1.msra.mxu0 %v1347_v22  ;;  %v566_v55 = vld [vmem:[#allocation8 + $0xc8] sm:$0xff]  ;;  %v568_v22 = vld [vmem:[#allocation8 + $0xd8] sm:$0xff] }
 0x442   :  { %2227 = vmatprep.subr.mxu1 %v1294_v24  ;;  %2298 = vmatprep.subr.mxu0 %v1296_v25  ;;  %v565_v24 = vld [vmem:[#allocation8 + $0xc0] sm:$0xff]  ;;  %v567_v25 = vld [vmem:[#allocation8 + $0xd0] sm:$0xff] }
 0x443   :  { %2228 = vmatpush1.msra.mxu1 %v1293_v27  ;;  %2299 = vmatpush1.msra.mxu0 %v1295_v28  ;;  %v1350_v27 = vld [vmem:[#allocation8 + $0x1948] sm:$0xff]  ;;  %v1352_v28 = vld [vmem:[#allocation8 + $0x1958] sm:$0xff] }
 0x444   :  { %2229 = vmatprep.subr.mxu1 %v1242_v30  ;;  %2300 = vmatprep.subr.mxu0 %v1244_v31  ;;  %v1349_v30 = vld [vmem:[#allocation8 + $0x1940] sm:$0xff]  ;;  %v1351_v31 = vld [vmem:[#allocation8 + $0x1950] sm:$0xff] }
 0x445   :  { %2230 = vmatpush1.msra.mxu1 %v1241_v39  ;;  %2301 = vmatpush1.msra.mxu0 %v1243_v40  ;;  %v1298_v39 = vld [vmem:[#allocation8 + $0x17a8] sm:$0xff]  ;;  %v1300_v40 = vld [vmem:[#allocation8 + $0x17b8] sm:$0xff] }
 0x446   :  { %2231 = vmatprep.subr.mxu1 %v1190_v41  ;;  %2302 = vmatprep.subr.mxu0 %v1192_v37  ;;  %v1297_v41 = vld [vmem:[#allocation8 + $0x17a0] sm:$0xff]  ;;  %v1299_v37 = vld [vmem:[#allocation8 + $0x17b0] sm:$0xff] }
 0x447   :  { %2232 = vmatpush1.msra.mxu1 %v1189_v42  ;;  %2303 = vmatpush1.msra.mxu0 %v1191_v35  ;;  %v1246_v42 = vld [vmem:[#allocation8 + $0x1608] sm:$0xff]  ;;  %v1248_v35 = vld [vmem:[#allocation8 + $0x1618] sm:$0xff] }
 0x448   :  { %2233 = vmatprep.subr.mxu1 %v1138_v36  ;;  %2304 = vmatprep.subr.mxu0 %v1140_v43  ;;  %v1245_v36 = vld [vmem:[#allocation8 + $0x1600] sm:$0xff]  ;;  %v1247_v43 = vld [vmem:[#allocation8 + $0x1610] sm:$0xff] }
 0x449   :  { %2234 = vmatpush1.msra.mxu1 %v1137_v44  ;;  %2305 = vmatpush1.msra.mxu0 %v1139_v33  ;;  %v1194_v44 = vld [vmem:[#allocation8 + $0x1468] sm:$0xff]  ;;  %v1196_v33 = vld [vmem:[#allocation8 + $0x1478] sm:$0xff] }
 0x44a   :  { %2235 = vmatprep.subr.mxu1 %v1086_v34  ;;  %2306 = vmatprep.subr.mxu0 %v1088_v45  ;;  %v1193_v45 = vld [vmem:[#allocation8 + $0x1460] sm:$0xff] }
 0x44b   :  { %2236 = vmatpush1.msra.mxu1 %v1085_v46  ;;  %2307 = vmatpush1.msra.mxu0 %v1087_v47  ;;  %v1195_v46 = vld [vmem:[#allocation8 + $0x1470] sm:$0xff] }
 0x44c   :  { %2237 = vmatprep.subr.mxu1 %v1034_v48  ;;  %2308 = vmatprep.subr.mxu0 %v1036_v32  ;;  %v1142_v48 = vld [vmem:[#allocation8 + $0x12c8] sm:$0xff]  ;;  %v1144_v32 = vld [vmem:[#allocation8 + $0x12d8] sm:$0xff] }
 0x44d   :  { %2238 = vmatpush1.msra.mxu1 %v1033_v29  ;;  %2309 = vmatpush1.msra.mxu0 %v1035_v51  ;;  %v1141_v29 = vld [vmem:[#allocation8 + $0x12c0] sm:$0xff]  ;;  %v1143_v51 = vld [vmem:[#allocation8 + $0x12d0] sm:$0xff] }
 0x44e   :  { %2239 = vmatprep.subr.mxu1 %v982_v52  ;;  %2310 = vmatprep.subr.mxu0 %v984_v26  ;;  %v1090_v52 = vld [vmem:[#allocation8 + $0x1128] sm:$0xff]  ;;  %v1092_v26 = vld [vmem:[#allocation8 + $0x1138] sm:$0xff] }
 0x44f   :  { %2240 = vmatpush1.msra.mxu1 %v981_v23  ;;  %2311 = vmatpush1.msra.mxu0 %v983_v53  ;;  %v1089_v53 = vld [vmem:[#allocation8 + $0x1120] sm:$0xff] }
 0x450   :  { %2241 = vmatprep.subr.mxu1 %v930_v54  ;;  %2312 = vmatprep.subr.mxu0 %v932_v56  ;;  %v1091_v54 = vld [vmem:[#allocation8 + $0x1130] sm:$0xff] }
 0x451   :  { %2242 = vmatpush1.msra.mxu1 %v929_v57  ;;  %2313 = vmatpush1.msra.mxu0 %v931_v38  ;;  %v1038_v57 = vld [vmem:[#allocation8 + $0xf88] sm:$0xff]  ;;  %v1040_v38 = vld [vmem:[#allocation8 + $0xf98] sm:$0xff] }
 0x452   :  { %2243 = vmatprep.subr.mxu1 %v878_v59  ;;  %2314 = vmatprep.subr.mxu0 %v880_v60  ;;  %v1037_v59 = vld [vmem:[#allocation8 + $0xf80] sm:$0xff]  ;;  %v1039_v60 = vld [vmem:[#allocation8 + $0xf90] sm:$0xff] }
 0x453   :  { %2244 = vmatpush1.msra.mxu1 %v877_v62  ;;  %2315 = vmatpush1.msra.mxu0 %v879_v20  ;;  %v986_v20 = vld [vmem:[#allocation8 + $0xde8] sm:$0xff] }
 0x454   :  { %2245 = vmatprep.subr.mxu1 %v826_v63  ;;  %2316 = vmatprep.subr.mxu0 %v828_v0  ;;  %v988_v63 = vld [vmem:[#allocation8 + $0xdf8] sm:$0xff] }
 0x455   :  { %2246 = vmatpush1.msra.mxu1 %v825_v1  ;;  %2317 = vmatpush1.msra.mxu0 %v827_v2  ;;  %v985_v1 = vld [vmem:[#allocation8 + $0xde0] sm:$0xff]  ;;  %v987_v2 = vld [vmem:[#allocation8 + $0xdf0] sm:$0xff] }
 0x456   :  { %2247 = vmatprep.subr.mxu1 %v774_v3  ;;  %2318 = vmatprep.subr.mxu0 %v776_v4  ;;  %v5762_v34 = vpop.f32.mrf.mxu1  ;;  %v5764_v47 = vpop.f32.mrf.mxu0  ;;  %v934_v4 = vld [vmem:[#allocation8 + $0xc48] sm:$0xff] }
 0x457   :  { %2248 = vmatpush1.msra.mxu1 %v773_v5  ;;  %2319 = vmatpush1.msra.mxu0 %v775_v6  ;;  %v4853_v3 = vmul.f32 -1.442695, %v5762_v34  ;;  %v936_v5 = vld [vmem:[#allocation8 + $0xc58] sm:$0xff]  ;;  %v4855_v6 = vmul.f32 -1.442695, %v5764_v47 }
 0x458   :  { %2249 = vmatprep.subr.mxu1 %v722_v7  ;;  %2320 = vmatprep.subr.mxu0 %v724_v8  ;;  %v5766_v23 = vpop.f32.mrf.mxu1  ;;  %v5768_v56 = vpop.f32.mrf.mxu0  ;;  %v933_v7 = vld [vmem:[#allocation8 + $0xc40] sm:$0xff]  ;;  %v935_v8 = vld [vmem:[#allocation8 + $0xc50] sm:$0xff] }
 0x459   :  { %2250 = vmatpush1.msra.mxu1 %v721_v9  ;;  %2321 = vmatpush1.msra.mxu0 %v723_v10  ;;  %v4854_v62 = vmul.f32 -1.442695, %v5766_v23  ;;  %v4856_v0 = vmul.f32 -1.442695, %v5768_v56  ;;  %v4345_v9 = vsub.f32 %v5766_v23, %v5721_v49  ;;  %v882_v10 = vld [vmem:[#allocation8 + $0xaa8] sm:$0xff] }
 0x45a   :  { %2251 = vmatprep.subr.mxu1 %v670_v11  ;;  %2322 = vmatprep.subr.mxu0 %v672_v12  ;;  %v884_v11 = vld [vmem:[#allocation8 + $0xab8] sm:$0xff]  ;;  %v4347_v12 = vsub.f32 %v5768_v56, %v5721_v49 }
 0x45b   :  { %2252 = vmatpush1.msra.mxu1 %v669_v13  ;;  %2323 = vmatpush1.msra.mxu0 %v671_v14  ;;  %5084 = vpow2.f32 %v4854_v62  ;;  %v881_v13 = vld [vmem:[#allocation8 + $0xaa0] sm:$0xff]  ;;  %v883_v14 = vld [vmem:[#allocation8 + $0xab0] sm:$0xff] }
 0x45c   :  { %2253 = vmatprep.subr.mxu1 %v618_v16  ;;  %2324 = vmatprep.subr.mxu0 %v620_v18  ;;  %5086 = vpow2.f32 %v4856_v0  ;;  %v4344_v16 = vsub.f32 %v5762_v34, %v5721_v49  ;;  %v4346_v18 = vsub.f32 %v5764_v47, %v5721_v49 }
 0x45d   :  { %2254 = vmatpush1.msra.mxu1 %v617_v19  ;;  %2325 = vmatpush1.msra.mxu0 %v619_v21  ;;  %5088 = vpow2.f32 %v4853_v3  ;;  %v830_v19 = vld [vmem:[#allocation8 + $0x908] sm:$0xff]  ;;  %v832_v21 = vld [vmem:[#allocation8 + $0x918] sm:$0xff] }
 0x45e   :  { %2255 = vmatprep.subr.mxu1 %v566_v55  ;;  %2326 = vmatprep.subr.mxu0 %v568_v22  ;;  %5090 = vpow2.f32 %v4855_v6  ;;  %v3271_v55 = vcombine.low %v5762_v34, %v5766_v23  ;;  %v3272_v22 = vcombine.low %v5764_v47, %v5768_v56  ;;  %v725_v34 = vld [vmem:[#allocation8 + $0x5c0] sm:$0xff]  ;;  %v622_v56 = vld [vmem:[#allocation8 + $0x288] sm:$0xff] }
 0x45f   :  { %2256 = vmatpush1.msra.mxu1 %v565_v24  ;;  %2289 = vmatprep.mubr.f32.mxu1 %v5365_v17  ;;  %v829_v24 = vld [vmem:[#allocation8 + $0x900] sm:$0xff] }
 0x460   :  { %2327 = vmatpush1.msra.mxu0 %v567_v25  ;;  %2360 = vmatprep.mubr.f32.mxu0 %v5365_v17  ;;  %v831_v25 = vld [vmem:[#allocation8 + $0x910] sm:$0xff]  ;;  %v673_v23 = vld [vmem:[#allocation8 + $0x420] sm:$0xff] }
 0x461   :  { %2290 = vmatmul.mubr.f32.vlgmr.msra.gmra.mxu1 %v5750_v15  ;;  %2361 = vmatmul.mubr.f32.vlgmr.msra.gmra.mxu0 %v5750_v15 }
 0x462   :  { %2367 = vmatprep.subr.mxu1 %v1350_v27  ;;  %2438 = vmatprep.subr.mxu0 %v1352_v28  ;;  %v4397_v27 = vmul.f32 %v4345_v9, %v5725_v50  ;;  %v778_v28 = vld [vmem:[#allocation8 + $0x768] sm:$0xff]  ;;  %v569_v9 = vld [vmem:[#allocation8 + $0xe0] sm:$0xff] }
 0x463   :  { %2368 = vmatpush1.msra.mxu1 %v1349_v30  ;;  %2439 = vmatpush1.msra.mxu0 %v1351_v31  ;;  %v780_v30 = vld [vmem:[#allocation8 + $0x778] sm:$0xff]  ;;  %v5788_v31 = vmul.f32 %v4347_v12, %v5725_v50 }
 0x464   :  { %2369 = vmatprep.subr.mxu1 %v1298_v39  ;;  %2440 = vmatprep.subr.mxu0 %v1300_v40  ;;  %v777_v39 = vld [vmem:[#allocation8 + $0x760] sm:$0xff]  ;;  %v779_v40 = vld [vmem:[#allocation8 + $0x770] sm:$0xff] }
 0x465   :  { %2370 = vmatpush1.msra.mxu1 %v1297_v41  ;;  %2441 = vmatpush1.msra.mxu0 %v1299_v37  ;;  %v4396_v41 = vmul.f32 %v4344_v16, %v5725_v50  ;;  %v5792_v37 = vmul.f32 %v4346_v18, %v5725_v50  ;;  %v571_v16 = vld [vmem:[#allocation8 + $0xf0] sm:$0xff] }
 0x466   :  { %2371 = vmatprep.subr.mxu1 %v1246_v42  ;;  %2442 = vmatprep.subr.mxu0 %v1248_v35  ;;  %v726_v42 = vld [vmem:[#allocation8 + $0x5c8] sm:$0xff]  ;;  %v728_v35 = vld [vmem:[#allocation8 + $0x5d8] sm:$0xff] }
 0x467   :  { %2372 = vmatpush1.msra.mxu1 %v1245_v36  ;;  %2443 = vmatpush1.msra.mxu0 %v1247_v43 }
 0x468   :  { %2373 = vmatprep.subr.mxu1 %v1194_v44  ;;  %2444 = vmatprep.subr.mxu0 %v1196_v33  ;;  %v5795_v44 = vrot.slane %v3271_v55, %v5710_v61  ;;  %v5798_v33 = vrot.slane %v3272_v22, %v5710_v61 }
 0x469   :  { %2374 = vmatpush1.msra.mxu1 %v1193_v45  ;;  %2445 = vmatpush1.msra.mxu0 %v1195_v46  ;;  %v727_v45 = vld [vmem:[#allocation8 + $0x5d0] sm:$0xff] }
 0x46a   :  { %2375 = vmatprep.subr.mxu1 %v1142_v48  ;;  %2446 = vmatprep.subr.mxu0 %v1144_v32  ;;  %v4500_v48 = vcombine.low %v4396_v41, %v4397_v27  ;;  %v674_v32 = vld [vmem:[#allocation8 + $0x428] sm:$0xff]  ;;  %v3303_v62 = vcombine.low %v5795_v44, %v5798_v33  ;;  %v1355_v41 = vld [vmem:[#allocation8 + $0x1970] sm:$0xff]  ;;  %v1304_v33 = vld [vmem:[#allocation8 + $0x17d8] sm:$0xff] }
 0x46b   :  { %2376 = vmatpush1.msra.mxu1 %v1141_v29  ;;  %2447 = vmatpush1.msra.mxu0 %v1143_v51  ;;  %v676_v29 = vld [vmem:[#allocation8 + $0x438] sm:$0xff]  ;;  %v1354_v27 = vld [vmem:[#allocation8 + $0x1968] sm:$0xff] }
 0x46c   :  { %2377 = vmatprep.subr.mxu1 %v1090_v52  ;;  %2448 = vmatprep.subr.mxu0 %v1092_v26  ;;  %v4501_v26 = vcombine.low %v5792_v37, %v5788_v31  ;;  %v5808_v3 = vrot.slane %v4500_v48, %v5710_v61  ;;  %v3311_v31 = vrot.slane %v3303_v62, %v5710_v61  ;;  %v1302_v44 = vld [vmem:[#allocation8 + $0x17c8] sm:$0xff]  ;;  %v1303_v48 = vld [vmem:[#allocation8 + $0x17d0] sm:$0xff] }
 0x46d   :  { %2378 = vmatpush1.msra.mxu1 %v1089_v53  ;;  %2449 = vmatpush1.msra.mxu0 %v1091_v54  ;;  %v675_v53 = vld [vmem:[#allocation8 + $0x430] sm:$0xff] }
 0x46e   :  { %2379 = vmatprep.subr.mxu1 %v1038_v57  ;;  %2450 = vmatprep.subr.mxu0 %v1040_v38  ;;  %v624_v57 = vld [vmem:[#allocation8 + $0x298] sm:$0xff] }
 0x46f   :  { %2380 = vmatpush1.msra.mxu1 %v1037_v59  ;;  %2451 = vmatpush1.msra.mxu0 %v1039_v60 }
 0x470   :  { %2381 = vmatprep.subr.mxu1 %v986_v20  ;;  %2452 = vmatprep.subr.mxu0 %v988_v63  ;;  %v621_v20 = vld [vmem:[#allocation8 + $0x280] sm:$0xff]  ;;  %v623_v63 = vld [vmem:[#allocation8 + $0x290] sm:$0xff] }
 0x471   :  { %2382 = vmatpush1.msra.mxu1 %v985_v1  ;;  %2453 = vmatpush1.msra.mxu0 %v987_v2 }
 0x472   :  { %2383 = vmatprep.subr.mxu1 %v934_v4  ;;  %2454 = vmatprep.subr.mxu0 %v936_v5  ;;  %v570_v4 = vld [vmem:[#allocation8 + $0xe8] sm:$0xff]  ;;  %v572_v5 = vld [vmem:[#allocation8 + $0xf8] sm:$0xff] }
 0x473   :  { %2384 = vmatpush1.msra.mxu1 %v933_v7  ;;  %2455 = vmatpush1.msra.mxu0 %v935_v8  ;;  %v5085_v8 = vpop.eup %5084 }
 0x474   :  { %2385 = vmatprep.subr.mxu1 %v882_v10  ;;  %2456 = vmatprep.subr.mxu0 %v884_v11 }
 0x475   :  { %2386 = vmatpush1.msra.mxu1 %v881_v13  ;;  %2457 = vmatpush1.msra.mxu0 %v883_v14  ;;  %v5087_v13 = vpop.eup %5086  ;;  %v4517_v14 = vrot.slane %v4501_v26, %v5710_v61 }
 0x476   :  { %2387 = vmatprep.subr.mxu1 %v830_v19  ;;  %2458 = vmatprep.subr.mxu0 %v832_v21  ;;  %v5089_v21 = vpop.eup %5088 }
 0x477   :  { %2388 = vmatpush1.msra.mxu1 %v829_v24  ;;  %2459 = vmatpush1.msra.mxu0 %v831_v25  ;;  %v1581_v36 = vpop.f32.mrf.mxu1  ;;  %v1652_v43 = vpop.f32.mrf.mxu0  ;;  %v3770_v25 = vadd.f32 1.0, %v5085_v8 }
 0x478   :  { %2389 = vmatprep.subr.mxu1 %v778_v28  ;;  %2460 = vmatprep.subr.mxu0 %v780_v30  ;;  %v4857_v46 = vmul.f32 -1.442695, %v1581_v36  ;;  %v4859_v47 = vmul.f32 -1.442695, %v1652_v43  ;;  %v4348_v54 = vsub.f32 %v1581_v36, %v5721_v49  ;;  %v4350_v38 = vsub.f32 %v1652_v43, %v5721_v49  ;;  %v5091_v24 = vpop.eup %5090  ;;  %v1356_v28 = vld [vmem:[#allocation8 + $0x1978] sm:$0xff] }
 0x479   :  { %2390 = vmatpush1.msra.mxu1 %v777_v39  ;;  %2461 = vmatpush1.msra.mxu0 %v779_v40  ;;  %v1583_v51 = vpop.f32.mrf.mxu1  ;;  %v1654_v52 = vpop.f32.mrf.mxu0  ;;  %v3772_v39 = vadd.f32 1.0, %v5087_v13  ;;  %v1353_v40 = vld [vmem:[#allocation8 + $0x1960] sm:$0xff] }
 0x47a   :  { %2391 = vmatprep.subr.mxu1 %v726_v42  ;;  %2462 = vmatprep.subr.mxu0 %v728_v35  ;;  %5092 = vpow2.f32 %v4857_v46  ;;  %v3273_v59 = vcombine.low %v1581_v36, %v1583_v51  ;;  %v4858_v60 = vmul.f32 -1.442695, %v1583_v51  ;;  %v4349_v0 = vsub.f32 %v1583_v51, %v5721_v49  ;;  %v1252_v51 = vld [vmem:[#allocation8 + $0x1638] sm:$0xff]  ;;  %v1041_v13 = vld [vmem:[#allocation8 + $0xfa0] sm:$0xff] }
 0x47b   :  { %2392 = vmatpush1.msra.mxu1 %v725_v34  ;;  %2463 = vmatpush1.msra.mxu0 %v727_v45  ;;  %5094 = vpow2.f32 %v4859_v47  ;;  %v3274_v1 = vcombine.low %v1652_v43, %v1654_v52  ;;  %v4860_v2 = vmul.f32 -1.442695, %v1654_v52  ;;  %v4351_v7 = vsub.f32 %v1654_v52, %v5721_v49  ;;  %v1301_v47 = vld [vmem:[#allocation8 + $0x17c0] sm:$0xff]  ;;  %v1251_v52 = vld [vmem:[#allocation8 + $0x1630] sm:$0xff] }
 0x47c   :  { %2393 = vmatprep.subr.mxu1 %v674_v32  ;;  %2464 = vmatprep.subr.mxu0 %v676_v29  ;;  %v3295_v6 = vrot.slane %v3273_v59, %v5710_v61  ;;  %5096 = vpow2.f32 %v4858_v60  ;;  %v4400_v10 = vmul.f32 %v4348_v54, %v5725_v50  ;;  %v4401_v11 = vmul.f32 %v4349_v0, %v5725_v50  ;;  %v1250_v29 = vld [vmem:[#allocation8 + $0x1628] sm:$0xff]  ;;  %v1197_v59 = vld [vmem:[#allocation8 + $0x1480] sm:$0xff]  ;;  %v1199_v60 = vld [vmem:[#allocation8 + $0x1490] sm:$0xff] }
 0x47d   :  { %2394 = vmatpush1.msra.mxu1 %v673_v23  ;;  %2465 = vmatpush1.msra.mxu0 %v675_v53  ;;  %v3302_v12 = vrot.slane %v3274_v1, %v5710_v61  ;;  %5098 = vpow2.f32 %v4860_v2  ;;  %v4402_v18 = vmul.f32 %v4350_v38, %v5725_v50  ;;  %v4403_v19 = vmul.f32 %v4351_v7, %v5725_v50  ;;  %v1198_v54 = vld [vmem:[#allocation8 + $0x1488] sm:$0xff]  ;;  %v1148_v0 = vld [vmem:[#allocation8 + $0x12f8] sm:$0xff]  ;;  %v1145_v2 = vld [vmem:[#allocation8 + $0x12e0] sm:$0xff] }
 0x47e   :  { %2395 = vmatprep.subr.mxu1 %v622_v56  ;;  %2466 = vmatprep.subr.mxu0 %v624_v57  ;;  %v4502_v55 = vcombine.low %v4400_v10, %v4401_v11  ;;  %v3769_v35 = vadd.f32 1.0, %v5089_v21  ;;  %v4532_v36 = vcombine.high %v5808_v3, %v4517_v14  ;;  %v3771_v34 = vadd.f32 1.0, %v5091_v24  ;;  %v1200_v56 = vld [vmem:[#allocation8 + $0x1498] sm:$0xff]  ;;  %v1147_v3 = vld [vmem:[#allocation8 + $0x12f0] sm:$0xff]  ;;  %v1042_v11 = vld [vmem:[#allocation8 + $0xfa8] sm:$0xff] }
 0x47f   :  { %2396 = vmatpush1.msra.mxu1 %v621_v20  ;;  %2467 = vmatpush1.msra.mxu0 %v623_v63  ;;  %v3304_v22 = vcombine.low %v3295_v6, %v3302_v12  ;;  %v4503_v30 = vcombine.low %v4402_v18, %v4403_v19  ;;  %5100 = vrcp.f32 %v3770_v25  ;;  %v1146_v63 = vld [vmem:[#allocation8 + $0x12e8] sm:$0xff]  ;;  %v1096_v7 = vld [vmem:[#allocation8 + $0x1158] sm:$0xff]  ;;  %v1095_v10 = vld [vmem:[#allocation8 + $0x1150] sm:$0xff] }
 0x480   :  { %2397 = vmatprep.subr.mxu1 %v570_v4  ;;  %2468 = vmatprep.subr.mxu0 %v572_v5  ;;  %v4524_v37 = vrot.slane %v4502_v55, %v5710_v61  ;;  %5102 = vrcp.f32 %v3772_v39  ;;  %v4540_v23 = vrot.slane %v4532_v36, %v5710_v61  ;;  %v1094_v6 = vld [vmem:[#allocation8 + $0x1148] sm:$0xff]  ;;  %v1044_v12 = vld [vmem:[#allocation8 + $0xfb8] sm:$0xff]  ;;  %v1043_v14 = vld [vmem:[#allocation8 + $0xfb0] sm:$0xff] }
 0x481   :  { %2398 = vmatpush1.msra.mxu1 %v569_v9  ;;  %2431 = vmatprep.mubr.f32.mxu1 %v5365_v17  ;;  %v3318_v42 = vrot.slane %v3304_v22, %v5710_v61  ;;  %v4531_v43 = vrot.slane %v4503_v30, %v5710_v61  ;;  %5104 = vrcp.f32 %v3769_v35  ;;  %v1093_v9 = vld [vmem:[#allocation8 + $0x1140] sm:$0xff]  ;;  %v992_v18 = vld [vmem:[#allocation8 + $0xe18] sm:$0xff]  ;;  %v991_v21 = vld [vmem:[#allocation8 + $0xe10] sm:$0xff] }
 0x482   :  { %2469 = vmatpush1.msra.mxu0 %v571_v16  ;;  %2502 = vmatprep.mubr.f32.mxu0 %v5365_v17  ;;  %5106 = vrcp.f32 %v3771_v34  ;;  %v990_v16 = vld [vmem:[#allocation8 + $0xe08] sm:$0xff]  ;;  %v989_v19 = vld [vmem:[#allocation8 + $0xe00] sm:$0xff]  ;;  %v940_v22 = vld [vmem:[#allocation8 + $0xc78] sm:$0xff] }
 0x483   :  { %2432 = vmatmul.mubr.f32.vlgmr.msra.gmra.mxu1 %v5750_v15  ;;  %2503 = vmatmul.mubr.f32.vlgmr.msra.gmra.mxu0 %v5750_v15  ;;  %v3319_v45 = vcombine.low %v3311_v31, %v3318_v42  ;;  %v4316_v46 = vcombine.high %v3311_v31, %v3318_v42  ;;  %v4533_v32 = vcombine.high %v4524_v37, %v4531_v43  ;;  %v1249_v15 = vld [vmem:[#allocation8 + $0x1620] sm:$0xff]  ;;  %v938_v55 = vld [vmem:[#allocation8 + $0xc68] sm:$0xff]  ;;  %v888_v31 = vld [vmem:[#allocation8 + $0xad8] sm:$0xff] }
 0x484   :  { %2509 = vmatprep.subr.mxu1 %v1354_v27  ;;  %2580 = vmatprep.subr.mxu0 %v1356_v28  ;;  %v937_v25 = vld [vmem:[#allocation8 + $0xc60] sm:$0xff]  ;;  %v939_v27 = vld [vmem:[#allocation8 + $0xc70] sm:$0xff]  ;;  %v886_v30 = vld [vmem:[#allocation8 + $0xac8] sm:$0xff] }
 0x485   :  { %2510 = vmatpush1.msra.mxu1 %v1353_v40  ;;  %2581 = vmatpush1.msra.mxu0 %v1355_v41  ;;  %3596 = vst [vmem:[%s6221_s8] ss:$4 sm:$0xff] %v3319_v45  ;;  %4912 = vst [vmem:[%s6221_s8 + $0x2] ss:$4 sm:$0xff] %v4316_v46  ;;  %v4547_v53 = vrot.slane %v4533_v32, %v5710_v61  ;;  %v885_v40 = vld [vmem:[#allocation8 + $0xac0] sm:$0xff]  ;;  %v887_v41 = vld [vmem:[#allocation8 + $0xad0] sm:$0xff] }
 0x486   :  { %2511 = vmatprep.subr.mxu1 %v1302_v44  ;;  %2582 = vmatprep.subr.mxu0 %v1304_v33  ;;  %v834_v42 = vld [vmem:[#allocation8 + $0x928] sm:$0xff]  ;;  %v836_v35 = vld [vmem:[#allocation8 + $0x938] sm:$0xff]  ;;  %v833_v44 = vld [vmem:[#allocation8 + $0x920] sm:$0xff] }
 0x487   :  { %v5093_v26 = vpop.eup %5092  ;;  %2512 = vmatpush1.msra.mxu1 %v1301_v47  ;;  %2583 = vmatpush1.msra.mxu0 %v1303_v48  ;;  %v4548_v20 = vcombine.high %v4540_v23, %v4547_v53  ;;  %v835_v33 = vld [vmem:[#allocation8 + $0x930] sm:$0xff]  ;;  %v782_v34 = vld [vmem:[#allocation8 + $0x788] sm:$0xff]  ;;  %v784_v45 = vld [vmem:[#allocation8 + $0x798] sm:$0xff] }
 0x488   :  { %v5095_v57 = vpop.eup %5094  ;;  %v3773_v38 = vadd.f32 1.0, %v5093_v26  ;;  %2513 = vmatprep.subr.mxu1 %v1250_v29  ;;  %2584 = vmatprep.subr.mxu0 %v1252_v51  ;;  %v781_v47 = vld [vmem:[#allocation8 + $0x780] sm:$0xff]  ;;  %v783_v48 = vld [vmem:[#allocation8 + $0x790] sm:$0xff]  ;;  %v730_v29 = vld [vmem:[#allocation8 + $0x5e8] sm:$0xff] }
 0x489   :  { %v3775_v62 = vadd.f32 1.0, %v5095_v57  ;;  %2514 = vmatpush1.msra.mxu1 %v1249_v15  ;;  %2585 = vmatpush1.msra.mxu0 %v1251_v52  ;;  %v5097_v1 = vpop.eup %5096  ;;  %4919 = vst [vmem:[%s6221_s8 + $0x3] ss:$4 sm:$0xff] %v4548_v20  ;;  %v732_v51 = vld [vmem:[#allocation8 + $0x5f8] sm:$0xff]  ;;  %v729_v23 = vld [vmem:[#allocation8 + $0x5e0] sm:$0xff]  ;;  %v731_v53 = vld [vmem:[#allocation8 + $0x5f0] sm:$0xff] }
 0x48a   :  { %2515 = vmatprep.subr.mxu1 %v1198_v54  ;;  %2586 = vmatprep.subr.mxu0 %v1200_v56  ;;  %v5099_v4 = vpop.eup %5098  ;;  %5108 = vrcp.f32 %v3773_v38  ;;  %v3774_v5 = vadd.f32 1.0, %v5097_v1  ;;  %v678_v57 = vld [vmem:[#allocation8 + $0x448] sm:$0xff]  ;;  %v680_v38 = vld [vmem:[#allocation8 + $0x458] sm:$0xff] }
 0x48b   :  { %2516 = vmatpush1.msra.mxu1 %v1197_v59  ;;  %2587 = vmatpush1.msra.mxu0 %v1199_v60  ;;  %5110 = vrcp.f32 %v3775_v62  ;;  %v3776_v8 = vadd.f32 1.0, %v5099_v4  ;;  %v677_v60 = vld [vmem:[#allocation8 + $0x440] sm:$0xff]  ;;  %v679_v62 = vld [vmem:[#allocation8 + $0x450] sm:$0xff] }
 0x48c   :  { %2517 = vmatprep.subr.mxu1 %v1146_v63  ;;  %2588 = vmatprep.subr.mxu0 %v1148_v0  ;;  %5112 = vrcp.f32 %v3774_v5  ;;  %v5101_v24 = vpop.eup %5100  ;;  %v626_v63 = vld [vmem:[#allocation8 + $0x2a8] sm:$0xff]  ;;  %v628_v0 = vld [vmem:[#allocation8 + $0x2b8] sm:$0xff]  ;;  %v627_v4 = vld [vmem:[#allocation8 + $0x2b0] sm:$0xff] }
 0x48d   :  { %2518 = vmatpush1.msra.mxu1 %v1145_v2  ;;  %2589 = vmatpush1.msra.mxu0 %v1147_v3  ;;  %5114 = vrcp.f32 %v3776_v8  ;;  %v5103_v28 = vpop.eup %5102  ;;  %v625_v3 = vld [vmem:[#allocation8 + $0x2a0] sm:$0xff]  ;;  %v574_v5 = vld [vmem:[#allocation8 + $0x108] sm:$0xff] }
 0x48e   :  { %2519 = vmatprep.subr.mxu1 %v1094_v6  ;;  %2590 = vmatprep.subr.mxu0 %v1096_v7  ;;  %v5105_v39 = vpop.eup %5104  ;;  %v576_v6 = vld [vmem:[#allocation8 + $0x118] sm:$0xff]  ;;  %v573_v8 = vld [vmem:[#allocation8 + $0x100] sm:$0xff] }
 0x48f   :  { %2520 = vmatpush1.msra.mxu1 %v1093_v9  ;;  %2591 = vmatpush1.msra.mxu0 %v1095_v10  ;;  %v5107_v37 = vpop.eup %5106  ;;  %v3977_v36 = vcombine.low %v5105_v39, %v5101_v24  ;;  %v575_v9 = vld [vmem:[#allocation8 + $0x110] sm:$0xff]  ;;  %v1204_v39 = vld [vmem:[#allocation8 + $0x14b8] sm:$0xff] }
 0x490   :  { %2521 = vmatprep.subr.mxu1 %v1042_v11  ;;  %2592 = vmatprep.subr.mxu0 %v1044_v12  ;;  %v3978_v43 = vcombine.low %v5107_v37, %v5103_v28  ;;  %v1358_v12 = vld [vmem:[#allocation8 + $0x1988] sm:$0xff]  ;;  %v1307_v24 = vld [vmem:[#allocation8 + $0x17f0] sm:$0xff]  ;;  %v1253_v28 = vld [vmem:[#allocation8 + $0x1640] sm:$0xff] }
 0x491   :  { %2522 = vmatpush1.msra.mxu1 %v1041_v13  ;;  %2593 = vmatpush1.msra.mxu0 %v1043_v14  ;;  %v3987_v52 = vrot.slane %v3977_v36, %v5710_v61  ;;  %v1360_v13 = vld [vmem:[#allocation8 + $0x1998] sm:$0xff]  ;;  %v1203_v37 = vld [vmem:[#allocation8 + $0x14b0] sm:$0xff] }
 0x492   :  { %2523 = vmatprep.subr.mxu1 %v990_v16  ;;  %2594 = vmatprep.subr.mxu0 %v992_v18  ;;  %v3994_v26 = vrot.slane %v3978_v43, %v5710_v61  ;;  %v1357_v16 = vld [vmem:[#allocation8 + $0x1980] sm:$0xff]  ;;  %v1359_v18 = vld [vmem:[#allocation8 + $0x1990] sm:$0xff]  ;;  %v1152_v36 = vld [vmem:[#allocation8 + $0x1318] sm:$0xff] }
 0x493   :  { %2524 = vmatpush1.msra.mxu1 %v989_v19  ;;  %2595 = vmatpush1.msra.mxu0 %v991_v21  ;;  %v5846_v19 = vld [vmem:[#allocation2] sm:$0xf]  ;;  %v1306_v21 = vld [vmem:[#allocation8 + $0x17e8] sm:$0xff]  ;;  %v1149_v43 = vld [vmem:[#allocation8 + $0x1300] sm:$0xff] }
 0x494   :  { %2525 = vmatprep.subr.mxu1 %v938_v55  ;;  %2596 = vmatprep.subr.mxu0 %v940_v22  ;;  %v4009_v1 = vcombine.high %v3987_v52, %v3994_v26  ;;  %v1308_v55 = vld [vmem:[#allocation8 + $0x17f8] sm:$0xff]  ;;  %v1305_v22 = vld [vmem:[#allocation8 + $0x17e0] sm:$0xff]  ;;  %v994_v26 = vld [vmem:[#allocation8 + $0xe28] sm:$0xff] }
 0x495   :  { %2526 = vmatpush1.msra.mxu1 %v937_v25  ;;  %2597 = vmatpush1.msra.mxu0 %v939_v27  ;;  %v1254_v25 = vld [vmem:[#allocation8 + $0x1648] sm:$0xff]  ;;  %v1256_v27 = vld [vmem:[#allocation8 + $0x1658] sm:$0xff] }
 0x496   :  { %2527 = vmatprep.subr.mxu1 %v886_v30  ;;  %2598 = vmatprep.subr.mxu0 %v888_v31  ;;  %v4017_v10 = vrot.slane %v4009_v1, %v5710_v61  ;;  %v1255_v30 = vld [vmem:[#allocation8 + $0x1650] sm:$0xff]  ;;  %v1202_v31 = vld [vmem:[#allocation8 + $0x14a8] sm:$0xff]  ;;  %v892_v1 = vld [vmem:[#allocation8 + $0xaf8] sm:$0xff] }
 0x497   :  { %2528 = vmatpush1.msra.mxu1 %v885_v40  ;;  %2599 = vmatpush1.msra.mxu0 %v887_v41  ;;  %v5109_v46 = vpop.eup %5108  ;;  %v1201_v41 = vld [vmem:[#allocation8 + $0x14a0] sm:$0xff] }
 0x498   :  { %2529 = vmatprep.subr.mxu1 %v834_v42  ;;  %2600 = vmatprep.subr.mxu0 %v836_v35  ;;  %v5111_v32 = vpop.eup %5110  ;;  %v1150_v35 = vld [vmem:[#allocation8 + $0x1308] sm:$0xff] }
 0x499   :  { %2530 = vmatpush1.msra.mxu1 %v833_v44  ;;  %2601 = vmatpush1.msra.mxu0 %v835_v33  ;;  %v5113_v15 = vpop.eup %5112  ;;  %v5853_v40 = vpop.f32.mrf.mxu1  ;;  %v1151_v44 = vld [vmem:[#allocation8 + $0x1310] sm:$0xff]  ;;  %v1098_v33 = vld [vmem:[#allocation8 + $0x1168] sm:$0xff] }
 0x49a   :  { %2531 = vmatprep.subr.mxu1 %v782_v34  ;;  %2602 = vmatprep.subr.mxu0 %v784_v45  ;;  %v5115_v54 = vpop.eup %5114  ;;  %v3979_v56 = vcombine.low %v5109_v46, %v5113_v15  ;;  %v5855_v42 = vpop.f32.mrf.mxu0  ;;  %v1100_v34 = vld [vmem:[#allocation8 + $0x1178] sm:$0xff]  ;;  %v1097_v46 = vld [vmem:[#allocation8 + $0x1160] sm:$0xff]  ;;  %v1047_v15 = vld [vmem:[#allocation8 + $0xfd0] sm:$0xff] }
 0x49b   :  { %2532 = vmatpush1.msra.mxu1 %v781_v47  ;;  %2603 = vmatpush1.msra.mxu0 %v783_v48  ;;  %v3980_v59 = vcombine.low %v5111_v32, %v5115_v54  ;;  %v5857_v45 = vpop.f32.mrf.mxu1  ;;  %v1099_v47 = vld [vmem:[#allocation8 + $0x1170] sm:$0xff]  ;;  %v1046_v32 = vld [vmem:[#allocation8 + $0xfc8] sm:$0xff]  ;;  %v993_v54 = vld [vmem:[#allocation8 + $0xe20] sm:$0xff] }
 0x49c   :  { %2533 = vmatprep.subr.mxu1 %v730_v29  ;;  %2604 = vmatprep.subr.mxu0 %v732_v51  ;;  %v4001_v20 = vrot.slane %v3979_v56, %v5710_v61  ;;  %v5859_v48 = vpop.f32.mrf.mxu0  ;;  %v1048_v29 = vld [vmem:[#allocation8 + $0xfd8] sm:$0xff]  ;;  %v1045_v51 = vld [vmem:[#allocation8 + $0xfc0] sm:$0xff]  ;;  %v4862_v52 = vmul.f32 -1.442695, %v5857_v45  ;;  %v995_v56 = vld [vmem:[#allocation8 + $0xe30] sm:$0xff] }
 0x49d   :  { %2534 = vmatpush1.msra.mxu1 %v729_v23  ;;  %2605 = vmatpush1.msra.mxu0 %v731_v53  ;;  %v4008_v2 = vrot.slane %v3980_v59, %v5710_v61  ;;  %v996_v23 = vld [vmem:[#allocation8 + $0xe38] sm:$0xff]  ;;  %v4864_v53 = vmul.f32 -1.442695, %v5859_v48 }
 0x49e   :  { %2535 = vmatprep.subr.mxu1 %v678_v57  ;;  %2606 = vmatprep.subr.mxu0 %v680_v38  ;;  %v4861_v57 = vmul.f32 -1.442695, %v5853_v40  ;;  %v942_v38 = vld [vmem:[#allocation8 + $0xc88] sm:$0xff]  ;;  %v944_v59 = vld [vmem:[#allocation8 + $0xc98] sm:$0xff]  ;;  %5116 = vpow2.f32 %v4862_v52 }
 0x49f   :  { %2536 = vmatpush1.msra.mxu1 %v677_v60  ;;  %2607 = vmatpush1.msra.mxu0 %v679_v62  ;;  %v4010_v7 = vcombine.high %v4001_v20, %v4008_v2  ;;  %v4863_v60 = vmul.f32 -1.442695, %v5855_v42  ;;  %v941_v62 = vld [vmem:[#allocation8 + $0xc80] sm:$0xff]  ;;  %v943_v20 = vld [vmem:[#allocation8 + $0xc90] sm:$0xff]  ;;  %5118 = vpow2.f32 %v4864_v53  ;;  %v4355_v2 = vsub.f32 %v5859_v48, %v5721_v49 }
 0x4a0   :  { %2537 = vmatprep.subr.mxu1 %v626_v63  ;;  %2608 = vmatprep.subr.mxu0 %v628_v0  ;;  %v4353_v63 = vsub.f32 %v5857_v45, %v5721_v49  ;;  %v890_v0 = vld [vmem:[#allocation8 + $0xae8] sm:$0xff]  ;;  %5120 = vpow2.f32 %v4861_v57 }
 0x4a1   :  { %2538 = vmatpush1.msra.mxu1 %v625_v3  ;;  %2609 = vmatpush1.msra.mxu0 %v627_v4  ;;  %v4024_v11 = vrot.slane %v4010_v7, %v5710_v61  ;;  %v889_v3 = vld [vmem:[#allocation8 + $0xae0] sm:$0xff]  ;;  %v891_v4 = vld [vmem:[#allocation8 + $0xaf0] sm:$0xff]  ;;  %v838_v7 = vld [vmem:[#allocation8 + $0x948] sm:$0xff]  ;;  %5122 = vpow2.f32 %v4863_v60 }
 0x4a2   :  { %2539 = vmatprep.subr.mxu1 %v574_v5  ;;  %2610 = vmatprep.subr.mxu0 %v576_v6  ;;  %v4352_v5 = vsub.f32 %v5853_v40, %v5721_v49  ;;  %v4354_v6 = vsub.f32 %v5855_v42, %v5721_v49 }
 0x4a3   :  { %2540 = vmatpush1.msra.mxu1 %v573_v8  ;;  %2573 = vmatprep.mubr.f32.mxu1 %v5365_v17  ;;  %v4025_v14 = vcombine.low %v4017_v10, %v4024_v11  ;;  %v840_v8 = vld [vmem:[#allocation8 + $0x958] sm:$0xff]  ;;  %v3321_v10 = vcombine.low %v5855_v42, %v5859_v48  ;;  %v837_v11 = vld [vmem:[#allocation8 + $0x940] sm:$0xff]  ;;  %v630_v48 = vld [vmem:[#allocation8 + $0x2c8] sm:$0xff] }
 0x4a4   :  { %2611 = vmatpush1.msra.mxu0 %v575_v9  ;;  %2644 = vmatprep.mubr.f32.mxu0 %v5365_v17  ;;  %v3320_v9 = vcombine.low %v5853_v40, %v5857_v45  ;;  %v733_v40 = vld [vmem:[#allocation8 + $0x600] sm:$0xff] }
 0x4a5   :  { %2574 = vmatmul.mubr.f32.vlgmr.msra.gmra.mxu1 %v5846_v19  ;;  %2645 = vmatmul.mubr.f32.vlgmr.msra.gmra.mxu0 %v5846_v19  ;;  %4905 = vst [vmem:[%s6221_s8 + $0x1] ss:$4 sm:$0xff] %v4025_v14  ;;  %v786_v14 = vld [vmem:[#allocation8 + $0x7a8] sm:$0xff]  ;;  %v681_v45 = vld [vmem:[#allocation8 + $0x460] sm:$0xff] }
 0x4a6   :  { %2651 = vmatprep.subr.mxu1 %v1358_v12  ;;  %2722 = vmatprep.subr.mxu0 %v1360_v13  ;;  %v839_v12 = vld [vmem:[#allocation8 + $0x950] sm:$0xff]  ;;  %v4405_v13 = vmul.f32 %v4353_v63, %v5725_v50  ;;  %v577_v63 = vld [vmem:[#allocation8 + $0x120] sm:$0xff] }
 0x4a7   :  { %2652 = vmatpush1.msra.mxu1 %v1357_v16  ;;  %2723 = vmatpush1.msra.mxu0 %v1359_v18  ;;  %v788_v16 = vld [vmem:[#allocation8 + $0x7b8] sm:$0xff]  ;;  %v5879_v18 = vmul.f32 %v4355_v2, %v5725_v50 }
 0x4a8   :  { %2653 = vmatprep.subr.mxu1 %v1306_v21  ;;  %2724 = vmatprep.subr.mxu0 %v1308_v55  ;;  %v785_v21 = vld [vmem:[#allocation8 + $0x7a0] sm:$0xff]  ;;  %v787_v55 = vld [vmem:[#allocation8 + $0x7b0] sm:$0xff] }
 0x4a9   :  { %2654 = vmatpush1.msra.mxu1 %v1305_v22  ;;  %2725 = vmatpush1.msra.mxu0 %v1307_v24  ;;  %v4404_v22 = vmul.f32 %v4352_v5, %v5725_v50  ;;  %v5883_v24 = vmul.f32 %v4354_v6, %v5725_v50  ;;  %v579_v5 = vld [vmem:[#allocation8 + $0x130] sm:$0xff] }
 0x4aa   :  { %2655 = vmatprep.subr.mxu1 %v1254_v25  ;;  %2726 = vmatprep.subr.mxu0 %v1256_v27  ;;  %v734_v25 = vld [vmem:[#allocation8 + $0x608] sm:$0xff]  ;;  %v736_v27 = vld [vmem:[#allocation8 + $0x618] sm:$0xff] }
 0x4ab   :  { %2656 = vmatpush1.msra.mxu1 %v1253_v28  ;;  %2727 = vmatpush1.msra.mxu0 %v1255_v30 }
 0x4ac   :  { %2657 = vmatprep.subr.mxu1 %v1202_v31  ;;  %2728 = vmatprep.subr.mxu0 %v1204_v39  ;;  %v5886_v31 = vrot.slane %v3320_v9, %v5710_v61  ;;  %v5889_v39 = vrot.slane %v3321_v10, %v5710_v61 }
 0x4ad   :  { %2658 = vmatpush1.msra.mxu1 %v1201_v41  ;;  %2729 = vmatpush1.msra.mxu0 %v1203_v37  ;;  %v735_v41 = vld [vmem:[#allocation8 + $0x610] sm:$0xff] }
 0x4ae   :  { %2659 = vmatprep.subr.mxu1 %v1150_v35  ;;  %2730 = vmatprep.subr.mxu0 %v1152_v36  ;;  %v4549_v35 = vcombine.low %v4404_v22, %v4405_v13  ;;  %v682_v36 = vld [vmem:[#allocation8 + $0x468] sm:$0xff]  ;;  %v3352_v52 = vcombine.low %v5886_v31, %v5889_v39  ;;  %v1363_v22 = vld [vmem:[#allocation8 + $0x19b0] sm:$0xff]  ;;  %v1312_v39 = vld [vmem:[#allocation8 + $0x1818] sm:$0xff] }
 0x4af   :  { %2660 = vmatpush1.msra.mxu1 %v1149_v43  ;;  %2731 = vmatpush1.msra.mxu0 %v1151_v44  ;;  %v684_v43 = vld [vmem:[#allocation8 + $0x478] sm:$0xff]  ;;  %v1362_v13 = vld [vmem:[#allocation8 + $0x19a8] sm:$0xff] }
 0x4b0   :  { %2661 = vmatprep.subr.mxu1 %v1098_v33  ;;  %2732 = vmatprep.subr.mxu0 %v1100_v34  ;;  %v4550_v34 = vcombine.low %v5883_v24, %v5879_v18  ;;  %v5899_v57 = vrot.slane %v4549_v35, %v5710_v61  ;;  %v3360_v18 = vrot.slane %v3352_v52, %v5710_v61  ;;  %v1310_v31 = vld [vmem:[#allocation8 + $0x1808] sm:$0xff]  ;;  %v1311_v35 = vld [vmem:[#allocation8 + $0x1810] sm:$0xff] }
 0x4b1   :  { %2662 = vmatpush1.msra.mxu1 %v1097_v46  ;;  %2733 = vmatpush1.msra.mxu0 %v1099_v47  ;;  %v683_v46 = vld [vmem:[#allocation8 + $0x470] sm:$0xff] }
 0x4b2   :  { %2663 = vmatprep.subr.mxu1 %v1046_v32  ;;  %2734 = vmatprep.subr.mxu0 %v1048_v29  ;;  %v632_v32 = vld [vmem:[#allocation8 + $0x2d8] sm:$0xff]  ;;  %v1207_v52 = vld [vmem:[#allocation8 + $0x14d0] sm:$0xff] }
 0x4b3   :  { %2664 = vmatpush1.msra.mxu1 %v1045_v51  ;;  %2735 = vmatpush1.msra.mxu0 %v1047_v15 }
 0x4b4   :  { %2665 = vmatprep.subr.mxu1 %v994_v26  ;;  %2736 = vmatprep.subr.mxu0 %v996_v23  ;;  %v629_v26 = vld [vmem:[#allocation8 + $0x2c0] sm:$0xff]  ;;  %v631_v23 = vld [vmem:[#allocation8 + $0x2d0] sm:$0xff] }
 0x4b5   :  { %2666 = vmatpush1.msra.mxu1 %v993_v54  ;;  %2737 = vmatpush1.msra.mxu0 %v995_v56 }
 0x4b6   :  { %2667 = vmatprep.subr.mxu1 %v942_v38  ;;  %2738 = vmatprep.subr.mxu0 %v944_v59  ;;  %v578_v38 = vld [vmem:[#allocation8 + $0x128] sm:$0xff]  ;;  %v580_v59 = vld [vmem:[#allocation8 + $0x138] sm:$0xff] }
 0x4b7   :  { %2668 = vmatpush1.msra.mxu1 %v941_v62  ;;  %2739 = vmatpush1.msra.mxu0 %v943_v20  ;;  %v5117_v20 = vpop.eup %5116 }
 0x4b8   :  { %2669 = vmatprep.subr.mxu1 %v890_v0  ;;  %2740 = vmatprep.subr.mxu0 %v892_v1 }
 0x4b9   :  { %2670 = vmatpush1.msra.mxu1 %v889_v3  ;;  %2741 = vmatpush1.msra.mxu0 %v891_v4  ;;  %v5119_v3 = vpop.eup %5118  ;;  %v4566_v4 = vrot.slane %v4550_v34, %v5710_v61  ;;  %v1259_v34 = vld [vmem:[#allocation8 + $0x1670] sm:$0xff] }
 0x4ba   :  { %2671 = vmatprep.subr.mxu1 %v838_v7  ;;  %2742 = vmatprep.subr.mxu0 %v840_v8  ;;  %v5121_v8 = vpop.eup %5120 }
 0x4bb   :  { %2672 = vmatpush1.msra.mxu1 %v837_v11  ;;  %2743 = vmatpush1.msra.mxu0 %v839_v12  ;;  %v1865_v28 = vpop.f32.mrf.mxu1  ;;  %v1936_v30 = vpop.f32.mrf.mxu0  ;;  %v3778_v12 = vadd.f32 1.0, %v5117_v20  ;;  %v1104_v20 = vld [vmem:[#allocation8 + $0x1198] sm:$0xff] }
 0x4bc   :  { %2673 = vmatprep.subr.mxu1 %v786_v14  ;;  %2744 = vmatprep.subr.mxu0 %v788_v16  ;;  %v4865_v37 = vmul.f32 -1.442695, %v1865_v28  ;;  %v4867_v42 = vmul.f32 -1.442695, %v1936_v30  ;;  %v4356_v47 = vsub.f32 %v1865_v28, %v5721_v49  ;;  %v4358_v29 = vsub.f32 %v1936_v30, %v5721_v49  ;;  %v5123_v11 = vpop.eup %5122  ;;  %v1364_v14 = vld [vmem:[#allocation8 + $0x19b8] sm:$0xff] }
 0x4bd   :  { %2674 = vmatpush1.msra.mxu1 %v785_v21  ;;  %2745 = vmatpush1.msra.mxu0 %v787_v55  ;;  %v1867_v44 = vpop.f32.mrf.mxu1  ;;  %v1938_v33 = vpop.f32.mrf.mxu0  ;;  %v3780_v21 = vadd.f32 1.0, %v5119_v3  ;;  %v1361_v55 = vld [vmem:[#allocation8 + $0x19a0] sm:$0xff]  ;;  %v1052_v3 = vld [vmem:[#allocation8 + $0xff8] sm:$0xff] }
 0x4be   :  { %2675 = vmatprep.subr.mxu1 %v734_v25  ;;  %2746 = vmatprep.subr.mxu0 %v736_v27  ;;  %5124 = vpow2.f32 %v4865_v37  ;;  %v3322_v51 = vcombine.low %v1865_v28, %v1867_v44  ;;  %v4866_v15 = vmul.f32 -1.442695, %v1867_v44  ;;  %v4357_v53 = vsub.f32 %v1867_v44, %v5721_v49  ;;  %v1260_v44 = vld [vmem:[#allocation8 + $0x1678] sm:$0xff] }
 0x4bf   :  { %2676 = vmatpush1.msra.mxu1 %v733_v40  ;;  %2747 = vmatpush1.msra.mxu0 %v735_v41  ;;  %5126 = vpow2.f32 %v4867_v42  ;;  %v3323_v54 = vcombine.low %v1936_v30, %v1938_v33  ;;  %v4868_v56 = vmul.f32 -1.442695, %v1938_v33  ;;  %v4359_v62 = vsub.f32 %v1938_v33, %v5721_v49  ;;  %v1309_v42 = vld [vmem:[#allocation8 + $0x1800] sm:$0xff] }
 0x4c0   :  { %2677 = vmatprep.subr.mxu1 %v682_v36  ;;  %2748 = vmatprep.subr.mxu0 %v684_v43  ;;  %v3344_v60 = vrot.slane %v3322_v51, %v5710_v61  ;;  %5128 = vpow2.f32 %v4866_v15  ;;  %v4408_v0 = vmul.f32 %v4356_v47, %v5725_v50  ;;  %v4409_v1 = vmul.f32 %v4357_v53, %v5725_v50  ;;  %v1258_v43 = vld [vmem:[#allocation8 + $0x1668] sm:$0xff]  ;;  %v1257_v33 = vld [vmem:[#allocation8 + $0x1660] sm:$0xff] }
 0x4c1   :  { %2678 = vmatpush1.msra.mxu1 %v681_v45  ;;  %2749 = vmatpush1.msra.mxu0 %v683_v46  ;;  %v3351_v2 = vrot.slane %v3323_v54, %v5710_v61  ;;  %5130 = vpow2.f32 %v4868_v56  ;;  %v4410_v6 = vmul.f32 %v4358_v29, %v5725_v50  ;;  %v4411_v7 = vmul.f32 %v4359_v62, %v5725_v50  ;;  %v1205_v15 = vld [vmem:[#allocation8 + $0x14c0] sm:$0xff]  ;;  %v1154_v53 = vld [vmem:[#allocation8 + $0x1328] sm:$0xff]  ;;  %v1156_v54 = vld [vmem:[#allocation8 + $0x1338] sm:$0xff] }
 0x4c2   :  { %2679 = vmatprep.subr.mxu1 %v630_v48  ;;  %2750 = vmatprep.subr.mxu0 %v632_v32  ;;  %v4551_v9 = vcombine.low %v4408_v0, %v4409_v1  ;;  %v3777_v27 = vadd.f32 1.0, %v5121_v8  ;;  %v4581_v28 = vcombine.high %v5899_v57, %v4566_v4  ;;  %v3779_v40 = vadd.f32 1.0, %v5123_v11  ;;  %v1206_v48 = vld [vmem:[#allocation8 + $0x14c8] sm:$0xff]  ;;  %v1208_v32 = vld [vmem:[#allocation8 + $0x14d8] sm:$0xff]  ;;  %v1153_v57 = vld [vmem:[#allocation8 + $0x1320] sm:$0xff] }
 0x4c3   :  { %2680 = vmatpush1.msra.mxu1 %v629_v26  ;;  %2751 = vmatpush1.msra.mxu0 %v631_v23  ;;  %v3353_v10 = vcombine.low %v3344_v60, %v3351_v2  ;;  %v4552_v16 = vcombine.low %v4410_v6, %v4411_v7  ;;  %5132 = vrcp.f32 %v3778_v12  ;;  %v1102_v62 = vld [vmem:[#allocation8 + $0x1188] sm:$0xff]  ;;  %v1101_v0 = vld [vmem:[#allocation8 + $0x1180] sm:$0xff]  ;;  %v1103_v1 = vld [vmem:[#allocation8 + $0x1190] sm:$0xff] }
 0x4c4   :  { %2681 = vmatprep.subr.mxu1 %v578_v38  ;;  %2752 = vmatprep.subr.mxu0 %v580_v59  ;;  %v4573_v24 = vrot.slane %v4551_v9, %v5710_v61  ;;  %5134 = vrcp.f32 %v3780_v21  ;;  %v4589_v46 = vrot.slane %v4581_v28, %v5710_v61  ;;  %v1155_v38 = vld [vmem:[#allocation8 + $0x1330] sm:$0xff]  ;;  %v1050_v2 = vld [vmem:[#allocation8 + $0xfe8] sm:$0xff]  ;;  %v1049_v4 = vld [vmem:[#allocation8 + $0xfe0] sm:$0xff] }
 0x4c5   :  { %2682 = vmatpush1.msra.mxu1 %v577_v63  ;;  %2715 = vmatprep.mubr.f32.mxu1 %v5365_v17  ;;  %v3367_v25 = vrot.slane %v3353_v10, %v5710_v61  ;;  %v4580_v30 = vrot.slane %v4552_v16, %v5710_v61  ;;  %5136 = vrcp.f32 %v3777_v27  ;;  %v998_v6 = vld [vmem:[#allocation8 + $0xe48] sm:$0xff]  ;;  %v1000_v7 = vld [vmem:[#allocation8 + $0xe58] sm:$0xff]  ;;  %v997_v8 = vld [vmem:[#allocation8 + $0xe40] sm:$0xff] }
 0x4c6   :  { %2753 = vmatpush1.msra.mxu0 %v579_v5  ;;  %2786 = vmatprep.mubr.f32.mxu0 %v5365_v17  ;;  %5138 = vrcp.f32 %v3779_v40  ;;  %v1051_v5 = vld [vmem:[#allocation8 + $0xff0] sm:$0xff]  ;;  %v946_v10 = vld [vmem:[#allocation8 + $0xca8] sm:$0xff]  ;;  %v948_v11 = vld [vmem:[#allocation8 + $0xcb8] sm:$0xff] }
 0x4c7   :  { %2716 = vmatmul.mubr.f32.vlgmr.msra.gmra.mxu1 %v5846_v19  ;;  %2787 = vmatmul.mubr.f32.vlgmr.msra.gmra.mxu0 %v5846_v19  ;;  %v3368_v41 = vcombine.low %v3360_v18, %v3367_v25  ;;  %v4317_v37 = vcombine.high %v3360_v18, %v3367_v25  ;;  %v4582_v36 = vcombine.high %v4573_v24, %v4580_v30  ;;  %v999_v9 = vld [vmem:[#allocation8 + $0xe50] sm:$0xff]  ;;  %v894_v18 = vld [vmem:[#allocation8 + $0xb08] sm:$0xff]  ;;  %v896_v21 = vld [vmem:[#allocation8 + $0xb18] sm:$0xff] }
 0x4c8   :  { %2793 = vmatprep.subr.mxu1 %v1362_v13  ;;  %2864 = vmatprep.subr.mxu0 %v1364_v14  ;;  %v945_v13 = vld [vmem:[#allocation8 + $0xca0] sm:$0xff]  ;;  %v947_v14 = vld [vmem:[#allocation8 + $0xcb0] sm:$0xff]  ;;  %v842_v27 = vld [vmem:[#allocation8 + $0x968] sm:$0xff] }
 0x4c9   :  { %2794 = vmatpush1.msra.mxu1 %v1361_v55  ;;  %2865 = vmatpush1.msra.mxu0 %v1363_v22  ;;  %4847 = vst [vmem:[%s6221_s8 + $0x20] ss:$4 sm:$0xff] %v3368_v41  ;;  %4913 = vst [vmem:[%s6221_s8 + $0x22] ss:$4 sm:$0xff] %v4317_v37  ;;  %v4596_v47 = vrot.slane %v4582_v36, %v5710_v61  ;;  %v893_v22 = vld [vmem:[#allocation8 + $0xb00] sm:$0xff]  ;;  %v895_v24 = vld [vmem:[#allocation8 + $0xb10] sm:$0xff] }
 0x4ca   :  { %2795 = vmatprep.subr.mxu1 %v1310_v31  ;;  %2866 = vmatprep.subr.mxu0 %v1312_v39  ;;  %v844_v28 = vld [vmem:[#allocation8 + $0x978] sm:$0xff]  ;;  %v841_v39 = vld [vmem:[#allocation8 + $0x960] sm:$0xff]  ;;  %v843_v40 = vld [vmem:[#allocation8 + $0x970] sm:$0xff] }
 0x4cb   :  { %v5125_v45 = vpop.eup %5124  ;;  %2796 = vmatpush1.msra.mxu1 %v1309_v42  ;;  %2867 = vmatpush1.msra.mxu0 %v1311_v35  ;;  %v4597_v23 = vcombine.high %v4589_v46, %v4596_v47  ;;  %v790_v41 = vld [vmem:[#allocation8 + $0x7c8] sm:$0xff]  ;;  %v792_v37 = vld [vmem:[#allocation8 + $0x7d8] sm:$0xff]  ;;  %v789_v35 = vld [vmem:[#allocation8 + $0x7c0] sm:$0xff] }
 0x4cc   :  { %v5127_v29 = vpop.eup %5126  ;;  %v3781_v51 = vadd.f32 1.0, %v5125_v45  ;;  %2797 = vmatprep.subr.mxu1 %v1258_v43  ;;  %2868 = vmatprep.subr.mxu0 %v1260_v44  ;;  %v791_v36 = vld [vmem:[#allocation8 + $0x7d0] sm:$0xff]  ;;  %v738_v44 = vld [vmem:[#allocation8 + $0x628] sm:$0xff]  ;;  %v737_v47 = vld [vmem:[#allocation8 + $0x620] sm:$0xff] }
 0x4cd   :  { %v3783_v26 = vadd.f32 1.0, %v5127_v29  ;;  %2798 = vmatpush1.msra.mxu1 %v1257_v33  ;;  %2869 = vmatpush1.msra.mxu0 %v1259_v34  ;;  %v5129_v56 = vpop.eup %5128  ;;  %4920 = vst [vmem:[%s6221_s8 + $0x23] ss:$4 sm:$0xff] %v4597_v23  ;;  %v740_v33 = vld [vmem:[#allocation8 + $0x638] sm:$0xff]  ;;  %v687_v23 = vld [vmem:[#allocation8 + $0x490] sm:$0xff] }
 0x4ce   :  { %2799 = vmatprep.subr.mxu1 %v1206_v48  ;;  %2870 = vmatprep.subr.mxu0 %v1208_v32  ;;  %v5131_v59 = vpop.eup %5130  ;;  %5140 = vrcp.f32 %v3781_v51  ;;  %v3782_v60 = vadd.f32 1.0, %v5129_v56  ;;  %v739_v48 = vld [vmem:[#allocation8 + $0x630] sm:$0xff]  ;;  %v686_v51 = vld [vmem:[#allocation8 + $0x488] sm:$0xff]  ;;  %v636_v56 = vld [vmem:[#allocation8 + $0x2f8] sm:$0xff] }
 0x4cf   :  { %2800 = vmatpush1.msra.mxu1 %v1205_v15  ;;  %2871 = vmatpush1.msra.mxu0 %v1207_v52  ;;  %5142 = vrcp.f32 %v3783_v26  ;;  %v3784_v63 = vadd.f32 1.0, %v5131_v59  ;;  %v688_v15 = vld [vmem:[#allocation8 + $0x498] sm:$0xff]  ;;  %v685_v26 = vld [vmem:[#allocation8 + $0x480] sm:$0xff] }
 0x4d0   :  { %2801 = vmatprep.subr.mxu1 %v1154_v53  ;;  %2872 = vmatprep.subr.mxu0 %v1156_v54  ;;  %5144 = vrcp.f32 %v3782_v60  ;;  %v5133_v12 = vpop.eup %5132  ;;  %v634_v54 = vld [vmem:[#allocation8 + $0x2e8] sm:$0xff]  ;;  %v633_v59 = vld [vmem:[#allocation8 + $0x2e0] sm:$0xff]  ;;  %v635_v60 = vld [vmem:[#allocation8 + $0x2f0] sm:$0xff] }
 0x4d1   :  { %2802 = vmatpush1.msra.mxu1 %v1153_v57  ;;  %2873 = vmatpush1.msra.mxu0 %v1155_v38  ;;  %5146 = vrcp.f32 %v3784_v63  ;;  %v5135_v16 = vpop.eup %5134 }
 0x4d2   :  { %2803 = vmatprep.subr.mxu1 %v1102_v62  ;;  %2874 = vmatprep.subr.mxu0 %v1104_v20  ;;  %v5137_v55 = vpop.eup %5136  ;;  %v582_v62 = vld [vmem:[#allocation8 + $0x148] sm:$0xff]  ;;  %v584_v20 = vld [vmem:[#allocation8 + $0x158] sm:$0xff] }
 0x4d3   :  { %2804 = vmatpush1.msra.mxu1 %v1101_v0  ;;  %2875 = vmatpush1.msra.mxu0 %v1103_v1  ;;  %v5139_v25 = vpop.eup %5138  ;;  %v4026_v30 = vcombine.low %v5137_v55, %v5133_v12  ;;  %v581_v0 = vld [vmem:[#allocation8 + $0x140] sm:$0xff]  ;;  %v583_v1 = vld [vmem:[#allocation8 + $0x150] sm:$0xff] }
 0x4d4   :  { %2805 = vmatprep.subr.mxu1 %v1050_v2  ;;  %2876 = vmatprep.subr.mxu0 %v1052_v3  ;;  %v4027_v31 = vcombine.low %v5139_v25, %v5135_v16  ;;  %v1315_v12 = vld [vmem:[#allocation8 + $0x1830] sm:$0xff]  ;;  %v1261_v16 = vld [vmem:[#allocation8 + $0x1680] sm:$0xff] }
 0x4d5   :  { %2806 = vmatpush1.msra.mxu1 %v1049_v4  ;;  %2877 = vmatpush1.msra.mxu0 %v1051_v5  ;;  %v4036_v45 = vrot.slane %v4026_v30, %v5710_v61  ;;  %v1366_v4 = vld [vmem:[#allocation8 + $0x19c8] sm:$0xff]  ;;  %v1368_v5 = vld [vmem:[#allocation8 + $0x19d8] sm:$0xff]  ;;  %v1157_v30 = vld [vmem:[#allocation8 + $0x1340] sm:$0xff] }
 0x4d6   :  { %2807 = vmatprep.subr.mxu1 %v998_v6  ;;  %2878 = vmatprep.subr.mxu0 %v1000_v7  ;;  %v4043_v46 = vrot.slane %v4027_v31, %v5710_v61  ;;  %v1365_v7 = vld [vmem:[#allocation8 + $0x19c0] sm:$0xff]  ;;  %v1159_v31 = vld [vmem:[#allocation8 + $0x1350] sm:$0xff] }
 0x4d7   :  { %2808 = vmatpush1.msra.mxu1 %v997_v8  ;;  %2879 = vmatpush1.msra.mxu0 %v999_v9  ;;  %v1367_v8 = vld [vmem:[#allocation8 + $0x19d0] sm:$0xff]  ;;  %v1314_v9 = vld [vmem:[#allocation8 + $0x1828] sm:$0xff] }
 0x4d8   :  { %2809 = vmatprep.subr.mxu1 %v946_v10  ;;  %2880 = vmatprep.subr.mxu0 %v948_v11  ;;  %v4058_v57 = vcombine.high %v4036_v45, %v4043_v46  ;;  %v1316_v10 = vld [vmem:[#allocation8 + $0x1838] sm:$0xff]  ;;  %v1313_v11 = vld [vmem:[#allocation8 + $0x1820] sm:$0xff]  ;;  %v1002_v45 = vld [vmem:[#allocation8 + $0xe68] sm:$0xff] }
 0x4d9   :  { %2810 = vmatpush1.msra.mxu1 %v945_v13  ;;  %2881 = vmatpush1.msra.mxu0 %v947_v14  ;;  %v1262_v13 = vld [vmem:[#allocation8 + $0x1688] sm:$0xff]  ;;  %v1264_v14 = vld [vmem:[#allocation8 + $0x1698] sm:$0xff] }
 0x4da   :  { %2811 = vmatprep.subr.mxu1 %v894_v18  ;;  %2882 = vmatprep.subr.mxu0 %v896_v21  ;;  %v4066_v2 = vrot.slane %v4058_v57, %v5710_v61  ;;  %v1263_v18 = vld [vmem:[#allocation8 + $0x1690] sm:$0xff]  ;;  %v1212_v21 = vld [vmem:[#allocation8 + $0x14f8] sm:$0xff] }
 0x4db   :  { %2812 = vmatpush1.msra.mxu1 %v893_v22  ;;  %2883 = vmatpush1.msra.mxu0 %v895_v24  ;;  %v5141_v42 = vpop.eup %5140  ;;  %v1209_v22 = vld [vmem:[#allocation8 + $0x14e0] sm:$0xff]  ;;  %v1211_v24 = vld [vmem:[#allocation8 + $0x14f0] sm:$0xff]  ;;  %v1004_v46 = vld [vmem:[#allocation8 + $0xe78] sm:$0xff] }
 0x4dc   :  { %2813 = vmatprep.subr.mxu1 %v842_v27  ;;  %2884 = vmatprep.subr.mxu0 %v844_v28  ;;  %v5143_v43 = vpop.eup %5142  ;;  %v1158_v27 = vld [vmem:[#allocation8 + $0x1348] sm:$0xff]  ;;  %v1160_v28 = vld [vmem:[#allocation8 + $0x1358] sm:$0xff] }
 0x4dd   :  { %2814 = vmatpush1.msra.mxu1 %v841_v39  ;;  %2885 = vmatpush1.msra.mxu0 %v843_v40  ;;  %v5145_v34 = vpop.eup %5144  ;;  %v5942_v55 = vpop.f32.mrf.mxu1  ;;  %v1106_v39 = vld [vmem:[#allocation8 + $0x11a8] sm:$0xff]  ;;  %v1108_v40 = vld [vmem:[#allocation8 + $0x11b8] sm:$0xff] }
 0x4de   :  { %2815 = vmatprep.subr.mxu1 %v790_v41  ;;  %2886 = vmatprep.subr.mxu0 %v792_v37  ;;  %v5147_v32 = vpop.eup %5146  ;;  %v4028_v29 = vcombine.low %v5141_v42, %v5145_v34  ;;  %v5944_v25 = vpop.f32.mrf.mxu0  ;;  %v1105_v37 = vld [vmem:[#allocation8 + $0x11a0] sm:$0xff]  ;;  %v1107_v42 = vld [vmem:[#allocation8 + $0x11b0] sm:$0xff] }
 0x4df   :  { %2816 = vmatpush1.msra.mxu1 %v789_v35  ;;  %2887 = vmatpush1.msra.mxu0 %v791_v36  ;;  %v4029_v52 = vcombine.low %v5143_v43, %v5147_v32  ;;  %v5946_v41 = vpop.f32.mrf.mxu1  ;;  %v1054_v36 = vld [vmem:[#allocation8 + $0x1008] sm:$0xff]  ;;  %v1056_v43 = vld [vmem:[#allocation8 + $0x1018] sm:$0xff]  ;;  %v1003_v32 = vld [vmem:[#allocation8 + $0xe70] sm:$0xff] }
 0x4e0   :  { %2817 = vmatprep.subr.mxu1 %v738_v44  ;;  %2888 = vmatprep.subr.mxu0 %v740_v33  ;;  %v4050_v53 = vrot.slane %v4028_v29, %v5710_v61  ;;  %v5948_v35 = vpop.f32.mrf.mxu0  ;;  %v1053_v44 = vld [vmem:[#allocation8 + $0x1000] sm:$0xff]  ;;  %v1055_v33 = vld [vmem:[#allocation8 + $0x1010] sm:$0xff]  ;;  %v4870_v34 = vmul.f32 -1.442695, %v5946_v41  ;;  %v4869_v29 = vmul.f32 -1.442695, %v5942_v55 }
 0x4e1   :  { %2818 = vmatpush1.msra.mxu1 %v737_v47  ;;  %2889 = vmatpush1.msra.mxu0 %v739_v48  ;;  %v4057_v38 = vrot.slane %v4029_v52, %v5710_v61  ;;  %v4872_v47 = vmul.f32 -1.442695, %v5948_v35  ;;  %v1001_v48 = vld [vmem:[#allocation8 + $0xe60] sm:$0xff]  ;;  %v4871_v52 = vmul.f32 -1.442695, %v5944_v25  ;;  %v4363_v57 = vsub.f32 %v5948_v35, %v5721_v49 }
 0x4e2   :  { %2819 = vmatprep.subr.mxu1 %v686_v51  ;;  %2890 = vmatprep.subr.mxu0 %v688_v15  ;;  %v950_v51 = vld [vmem:[#allocation8 + $0xcc8] sm:$0xff]  ;;  %v952_v15 = vld [vmem:[#allocation8 + $0xcd8] sm:$0xff]  ;;  %5148 = vpow2.f32 %v4870_v34  ;;  %v637_v34 = vld [vmem:[#allocation8 + $0x300] sm:$0xff] }
 0x4e3   :  { %2820 = vmatpush1.msra.mxu1 %v685_v26  ;;  %2891 = vmatpush1.msra.mxu0 %v687_v23  ;;  %v4059_v63 = vcombine.high %v4050_v53, %v4057_v38  ;;  %v949_v26 = vld [vmem:[#allocation8 + $0xcc0] sm:$0xff]  ;;  %v951_v23 = vld [vmem:[#allocation8 + $0xcd0] sm:$0xff]  ;;  %v4361_v53 = vsub.f32 %v5946_v41, %v5721_v49  ;;  %5150 = vpow2.f32 %v4872_v47 }
 0x4e4   :  { %2821 = vmatprep.subr.mxu1 %v634_v54  ;;  %2892 = vmatprep.subr.mxu0 %v636_v56  ;;  %v898_v54 = vld [vmem:[#allocation8 + $0xb28] sm:$0xff]  ;;  %v900_v56 = vld [vmem:[#allocation8 + $0xb38] sm:$0xff]  ;;  %v897_v38 = vld [vmem:[#allocation8 + $0xb20] sm:$0xff]  ;;  %5152 = vpow2.f32 %v4869_v29 }
 0x4e5   :  { %2822 = vmatpush1.msra.mxu1 %v633_v59  ;;  %2893 = vmatpush1.msra.mxu0 %v635_v60  ;;  %v4073_v3 = vrot.slane %v4059_v63, %v5710_v61  ;;  %v899_v59 = vld [vmem:[#allocation8 + $0xb30] sm:$0xff]  ;;  %v4360_v60 = vsub.f32 %v5942_v55, %v5721_v49  ;;  %v848_v63 = vld [vmem:[#allocation8 + $0x998] sm:$0xff]  ;;  %5154 = vpow2.f32 %v4871_v52  ;;  %v586_v29 = vld [vmem:[#allocation8 + $0x168] sm:$0xff] }
 0x4e6   :  { %2823 = vmatprep.subr.mxu1 %v582_v62  ;;  %2894 = vmatprep.subr.mxu0 %v584_v20  ;;  %v4362_v62 = vsub.f32 %v5944_v25, %v5721_v49  ;;  %v846_v20 = vld [vmem:[#allocation8 + $0x988] sm:$0xff] }
 0x4e7   :  { %2824 = vmatpush1.msra.mxu1 %v581_v0  ;;  %2857 = vmatprep.mubr.f32.mxu1 %v5365_v17  ;;  %v4074_v6 = vcombine.low %v4066_v2, %v4073_v3  ;;  %v3369_v0 = vcombine.low %v5942_v55, %v5946_v41  ;;  %v845_v2 = vld [vmem:[#allocation8 + $0x980] sm:$0xff]  ;;  %v847_v3 = vld [vmem:[#allocation8 + $0x990] sm:$0xff] }
 0x4e8   :  { %2895 = vmatpush1.msra.mxu0 %v583_v1  ;;  %2928 = vmatprep.mubr.f32.mxu0 %v5365_v17  ;;  %v3370_v1 = vcombine.low %v5944_v25, %v5948_v35  ;;  %v743_v55 = vld [vmem:[#allocation8 + $0x650] sm:$0xff]  ;;  %v640_v35 = vld [vmem:[#allocation8 + $0x318] sm:$0xff] }
 0x4e9   :  { %2858 = vmatmul.mubr.f32.vlgmr.msra.gmra.mxu1 %v5846_v19  ;;  %2929 = vmatmul.mubr.f32.vlgmr.msra.gmra.mxu0 %v5846_v19  ;;  %4906 = vst [vmem:[%s6221_s8 + $0x21] ss:$4 sm:$0xff] %v4074_v6  ;;  %v1210_v19 = vld [vmem:[#allocation8 + $0x14e8] sm:$0xff]  ;;  %v796_v6 = vld [vmem:[#allocation8 + $0x7f8] sm:$0xff]  ;;  %v691_v41 = vld [vmem:[#allocation8 + $0x4b0] sm:$0xff] }
 0x4ea   :  { %2935 = vmatprep.subr.mxu1 %v1366_v4  ;;  %3006 = vmatprep.subr.mxu0 %v1368_v5  ;;  %v4413_v4 = vmul.f32 %v4361_v53, %v5725_v50  ;;  %v794_v5 = vld [vmem:[#allocation8 + $0x7e8] sm:$0xff] }
 0x4eb   :  { %2936 = vmatpush1.msra.mxu1 %v1365_v7  ;;  %3007 = vmatpush1.msra.mxu0 %v1367_v8  ;;  %v5968_v7 = vmul.f32 %v4363_v57, %v5725_v50  ;;  %v793_v8 = vld [vmem:[#allocation8 + $0x7e0] sm:$0xff] }
 0x4ec   :  { %2937 = vmatprep.subr.mxu1 %v1314_v9  ;;  %3008 = vmatprep.subr.mxu0 %v1316_v10  ;;  %v795_v9 = vld [vmem:[#allocation8 + $0x7f0] sm:$0xff]  ;;  %v4412_v10 = vmul.f32 %v4360_v60, %v5725_v50 }
 0x4ed   :  { %2938 = vmatpush1.msra.mxu1 %v1313_v11  ;;  %3009 = vmatpush1.msra.mxu0 %v1315_v12  ;;  %v5972_v11 = vmul.f32 %v4362_v62, %v5725_v50  ;;  %v742_v12 = vld [vmem:[#allocation8 + $0x648] sm:$0xff] }
 0x4ee   :  { %2939 = vmatprep.subr.mxu1 %v1262_v13  ;;  %3010 = vmatprep.subr.mxu0 %v1264_v14  ;;  %v744_v13 = vld [vmem:[#allocation8 + $0x658] sm:$0xff]  ;;  %v4598_v25 = vcombine.low %v4412_v10, %v4413_v4 }
 0x4ef   :  { %2940 = vmatpush1.msra.mxu1 %v1261_v16  ;;  %3011 = vmatpush1.msra.mxu0 %v1263_v18  ;;  %v5975_v18 = vrot.slane %v3369_v0, %v5710_v61  ;;  %v1372_v4 = vld [vmem:[#allocation8 + $0x19f8] sm:$0xff] }
 0x4f0   :  { %2941 = vmatprep.subr.mxu1 %v1210_v19  ;;  %3012 = vmatprep.subr.mxu0 %v1212_v21  ;;  %v5978_v19 = vrot.slane %v3370_v1, %v5710_v61  ;;  %v741_v21 = vld [vmem:[#allocation8 + $0x640] sm:$0xff] }
 0x4f1   :  { %2942 = vmatpush1.msra.mxu1 %v1209_v22  ;;  %3013 = vmatpush1.msra.mxu0 %v1211_v24 }
 0x4f2   :  { %2943 = vmatprep.subr.mxu1 %v1158_v27  ;;  %3014 = vmatprep.subr.mxu0 %v1160_v28  ;;  %v690_v27 = vld [vmem:[#allocation8 + $0x4a8] sm:$0xff]  ;;  %v692_v28 = vld [vmem:[#allocation8 + $0x4b8] sm:$0xff] }
 0x4f3   :  { %2944 = vmatpush1.msra.mxu1 %v1157_v30  ;;  %3015 = vmatpush1.msra.mxu0 %v1159_v31 }
 0x4f4   :  { %2945 = vmatprep.subr.mxu1 %v1106_v39  ;;  %3016 = vmatprep.subr.mxu0 %v1108_v40  ;;  %v4599_v39 = vcombine.low %v5972_v11, %v5968_v7  ;;  %v689_v40 = vld [vmem:[#allocation8 + $0x4a0] sm:$0xff] }
 0x4f5   :  { %2946 = vmatpush1.msra.mxu1 %v1105_v37  ;;  %3017 = vmatpush1.msra.mxu0 %v1107_v42  ;;  %v638_v42 = vld [vmem:[#allocation8 + $0x308] sm:$0xff] }
 0x4f6   :  { %2947 = vmatprep.subr.mxu1 %v1054_v36  ;;  %3018 = vmatprep.subr.mxu0 %v1056_v43 }
 0x4f7   :  { %2948 = vmatpush1.msra.mxu1 %v1053_v44  ;;  %3019 = vmatpush1.msra.mxu0 %v1055_v33  ;;  %v3401_v33 = vcombine.low %v5975_v18, %v5978_v19  ;;  %v1318_v18 = vld [vmem:[#allocation8 + $0x1848] sm:$0xff]  ;;  %v1320_v19 = vld [vmem:[#allocation8 + $0x1858] sm:$0xff] }
 0x4f8   :  { %2949 = vmatprep.subr.mxu1 %v1002_v45  ;;  %3020 = vmatprep.subr.mxu0 %v1004_v46  ;;  %v639_v45 = vld [vmem:[#allocation8 + $0x310] sm:$0xff] }
 0x4f9   :  { %2950 = vmatpush1.msra.mxu1 %v1001_v48  ;;  %3021 = vmatpush1.msra.mxu0 %v1003_v32  ;;  %v5988_v32 = vrot.slane %v4598_v25, %v5710_v61  ;;  %v1319_v25 = vld [vmem:[#allocation8 + $0x1850] sm:$0xff] }
 0x4fa   :  { %2951 = vmatprep.subr.mxu1 %v950_v51  ;;  %3022 = vmatprep.subr.mxu0 %v952_v15  ;;  %v588_v51 = vld [vmem:[#allocation8 + $0x178] sm:$0xff] }
 0x4fb   :  { %2952 = vmatpush1.msra.mxu1 %v949_v26  ;;  %3023 = vmatpush1.msra.mxu0 %v951_v23  ;;  %v5149_v26 = vpop.eup %5148  ;;  %v585_v23 = vld [vmem:[#allocation8 + $0x160] sm:$0xff] }
 0x4fc   :  { %2953 = vmatprep.subr.mxu1 %v898_v54  ;;  %3024 = vmatprep.subr.mxu0 %v900_v56  ;;  %v5151_v57 = vpop.eup %5150 }
 0x4fd   :  { %2954 = vmatpush1.msra.mxu1 %v897_v38  ;;  %3025 = vmatpush1.msra.mxu0 %v899_v59  ;;  %v4615_v38 = vrot.slane %v4599_v39, %v5710_v61  ;;  %v587_v59 = vld [vmem:[#allocation8 + $0x170] sm:$0xff]  ;;  %v3788_v7 = vadd.f32 1.0, %v5151_v57  ;;  %v1060_v57 = vld [vmem:[#allocation8 + $0x1038] sm:$0xff] }
 0x4fe   :  { %2955 = vmatprep.subr.mxu1 %v846_v20  ;;  %3026 = vmatprep.subr.mxu0 %v848_v63  ;;  %v5153_v20 = vpop.eup %5152  ;;  %v1267_v39 = vld [vmem:[#allocation8 + $0x16b0] sm:$0xff] }
 0x4ff   :  { %2956 = vmatpush1.msra.mxu1 %v845_v2  ;;  %3027 = vmatpush1.msra.mxu0 %v847_v3  ;;  %v2149_v14 = vpop.f32.mrf.mxu1  ;;  %v2220_v16 = vpop.f32.mrf.mxu0  ;;  %v3786_v2 = vadd.f32 1.0, %v5149_v26  ;;  %v1370_v3 = vld [vmem:[#allocation8 + $0x19e8] sm:$0xff]  ;;  %v1112_v26 = vld [vmem:[#allocation8 + $0x11d8] sm:$0xff] }
 0x500   :  { %2957 = vmatprep.subr.mxu1 %v794_v5  ;;  %3028 = vmatprep.subr.mxu0 %v796_v6  ;;  %v4873_v22 = vmul.f32 -1.442695, %v2149_v14  ;;  %v4875_v24 = vmul.f32 -1.442695, %v2220_v16  ;;  %v4364_v37 = vsub.f32 %v2149_v14, %v5721_v49  ;;  %v4366_v36 = vsub.f32 %v2220_v16, %v5721_v49  ;;  %v5155_v1 = vpop.eup %5154 }
 0x501   :  { %2958 = vmatpush1.msra.mxu1 %v793_v8  ;;  %3029 = vmatpush1.msra.mxu0 %v795_v9  ;;  %v2151_v30 = vpop.f32.mrf.mxu1  ;;  %v2222_v31 = vpop.f32.mrf.mxu0  ;;  %v3409_v6 = vrot.slane %v3401_v33, %v5710_v61  ;;  %v1369_v8 = vld [vmem:[#allocation8 + $0x19e0] sm:$0xff]  ;;  %v1371_v9 = vld [vmem:[#allocation8 + $0x19f0] sm:$0xff] }
 0x502   :  { %2959 = vmatprep.subr.mxu1 %v742_v12  ;;  %3030 = vmatprep.subr.mxu0 %v744_v13  ;;  %5156 = vpow2.f32 %v4873_v22  ;;  %v3371_v43 = vcombine.low %v2149_v14, %v2151_v30  ;;  %v4874_v44 = vmul.f32 -1.442695, %v2151_v30  ;;  %v4365_v46 = vsub.f32 %v2151_v30, %v5721_v49  ;;  %v6004_v14 = vld [vmem:[#allocation2] sm:$0xf]  ;;  %v1268_v30 = vld [vmem:[#allocation8 + $0x16b8] sm:$0xff] }
 0x503   :  { %2960 = vmatpush1.msra.mxu1 %v741_v21  ;;  %3031 = vmatpush1.msra.mxu0 %v743_v55  ;;  %5158 = vpow2.f32 %v4875_v24  ;;  %v3372_v47 = vcombine.low %v2220_v16, %v2222_v31  ;;  %v4876_v48 = vmul.f32 -1.442695, %v2222_v31  ;;  %v4367_v52 = vsub.f32 %v2222_v31, %v5721_v49  ;;  %v1317_v24 = vld [vmem:[#allocation8 + $0x1840] sm:$0xff]  ;;  %v1215_v33 = vld [vmem:[#allocation8 + $0x1510] sm:$0xff] }
 0x504   :  { %2961 = vmatprep.subr.mxu1 %v690_v27  ;;  %3032 = vmatprep.subr.mxu0 %v692_v28  ;;  %v3393_v15 = vrot.slane %v3371_v43, %v5710_v61  ;;  %5160 = vpow2.f32 %v4874_v44  ;;  %v4416_v53 = vmul.f32 %v4364_v37, %v5725_v50  ;;  %v4417_v54 = vmul.f32 %v4365_v46, %v5725_v50  ;;  %v1266_v28 = vld [vmem:[#allocation8 + $0x16a8] sm:$0xff]  ;;  %v1265_v31 = vld [vmem:[#allocation8 + $0x16a0] sm:$0xff] }
 0x505   :  { %2962 = vmatpush1.msra.mxu1 %v689_v40  ;;  %3033 = vmatpush1.msra.mxu0 %v691_v41  ;;  %v3400_v56 = vrot.slane %v3372_v47, %v5710_v61  ;;  %5162 = vpow2.f32 %v4876_v48  ;;  %v4418_v60 = vmul.f32 %v4366_v36, %v5725_v50  ;;  %v4419_v62 = vmul.f32 %v4367_v52, %v5725_v50  ;;  %v1213_v44 = vld [vmem:[#allocation8 + $0x1500] sm:$0xff]  ;;  %v1162_v46 = vld [vmem:[#allocation8 + $0x1368] sm:$0xff]  ;;  %v1164_v47 = vld [vmem:[#allocation8 + $0x1378] sm:$0xff] }
 0x506   :  { %2963 = vmatprep.subr.mxu1 %v638_v42  ;;  %3034 = vmatprep.subr.mxu0 %v640_v35  ;;  %v4600_v63 = vcombine.low %v4416_v53, %v4417_v54  ;;  %v3785_v12 = vadd.f32 1.0, %v5153_v20  ;;  %v4630_v13 = vcombine.high %v5988_v32, %v4615_v38  ;;  %v3787_v21 = vadd.f32 1.0, %v5155_v1  ;;  %v1214_v42 = vld [vmem:[#allocation8 + $0x1508] sm:$0xff]  ;;  %v1216_v35 = vld [vmem:[#allocation8 + $0x1518] sm:$0xff]  ;;  %v1161_v32 = vld [vmem:[#allocation8 + $0x1360] sm:$0xff] }
 0x507   :  { %2964 = vmatpush1.msra.mxu1 %v637_v34  ;;  %3035 = vmatpush1.msra.mxu0 %v639_v45  ;;  %v3402_v0 = vcombine.low %v3393_v15, %v3400_v56  ;;  %v4601_v5 = vcombine.low %v4418_v60, %v4419_v62  ;;  %5164 = vrcp.f32 %v3786_v2  ;;  %v1110_v52 = vld [vmem:[#allocation8 + $0x11c8] sm:$0xff]  ;;  %v1109_v53 = vld [vmem:[#allocation8 + $0x11c0] sm:$0xff]  ;;  %v1111_v54 = vld [vmem:[#allocation8 + $0x11d0] sm:$0xff] }
 0x508   :  { %2965 = vmatprep.subr.mxu1 %v586_v29  ;;  %3036 = vmatprep.subr.mxu0 %v588_v51  ;;  %v4622_v10 = vrot.slane %v4600_v63, %v5710_v61  ;;  %5166 = vrcp.f32 %v3788_v7  ;;  %v4638_v41 = vrot.slane %v4630_v13, %v5710_v61  ;;  %v1163_v29 = vld [vmem:[#allocation8 + $0x1370] sm:$0xff]  ;;  %v1058_v56 = vld [vmem:[#allocation8 + $0x1028] sm:$0xff]  ;;  %v1057_v38 = vld [vmem:[#allocation8 + $0x1020] sm:$0xff] }
 0x509   :  { %2966 = vmatpush1.msra.mxu1 %v585_v23  ;;  %2999 = vmatprep.mubr.f32.mxu1 %v5365_v17  ;;  %v3416_v11 = vrot.slane %v3402_v0, %v5710_v61  ;;  %v4629_v16 = vrot.slane %v4601_v5, %v5710_v61  ;;  %5168 = vrcp.f32 %v3785_v12  ;;  %v1006_v60 = vld [vmem:[#allocation8 + $0xe88] sm:$0xff]  ;;  %v1008_v62 = vld [vmem:[#allocation8 + $0xe98] sm:$0xff]  ;;  %v1005_v20 = vld [vmem:[#allocation8 + $0xe80] sm:$0xff] }
 0x50a   :  { %3037 = vmatpush1.msra.mxu0 %v587_v59  ;;  %3070 = vmatprep.mubr.f32.mxu0 %v5365_v17  ;;  %5170 = vrcp.f32 %v3787_v21  ;;  %v1059_v59 = vld [vmem:[#allocation8 + $0x1030] sm:$0xff]  ;;  %v954_v0 = vld [vmem:[#allocation8 + $0xce8] sm:$0xff]  ;;  %v956_v1 = vld [vmem:[#allocation8 + $0xcf8] sm:$0xff] }
 0x50b   :  { %3000 = vmatmul.mubr.f32.vlgmr.msra.gmra.mxu1 %v6004_v14  ;;  %3071 = vmatmul.mubr.f32.vlgmr.msra.gmra.mxu0 %v6004_v14  ;;  %v3417_v55 = vcombine.low %v3409_v6, %v3416_v11  ;;  %v4318_v22 = vcombine.high %v3409_v6, %v3416_v11  ;;  %v4631_v27 = vcombine.high %v4622_v10, %v4629_v16  ;;  %v1007_v63 = vld [vmem:[#allocation8 + $0xe90] sm:$0xff]  ;;  %v902_v6 = vld [vmem:[#allocation8 + $0xb48] sm:$0xff]  ;;  %v904_v7 = vld [vmem:[#allocation8 + $0xb58] sm:$0xff] }
 0x50c   :  { %3077 = vmatprep.subr.mxu1 %v1370_v3  ;;  %3148 = vmatprep.subr.mxu0 %v1372_v4  ;;  %v953_v3 = vld [vmem:[#allocation8 + $0xce0] sm:$0xff]  ;;  %v955_v4 = vld [vmem:[#allocation8 + $0xcf0] sm:$0xff]  ;;  %v850_v12 = vld [vmem:[#allocation8 + $0x9a8] sm:$0xff] }
 0x50d   :  { %3078 = vmatpush1.msra.mxu1 %v1369_v8  ;;  %3149 = vmatpush1.msra.mxu0 %v1371_v9  ;;  %4848 = vst [vmem:[%s6221_s8 + $0x40] ss:$4 sm:$0xff] %v3417_v55  ;;  %4914 = vst [vmem:[%s6221_s8 + $0x42] ss:$4 sm:$0xff] %v4318_v22  ;;  %v4645_v37 = vrot.slane %v4631_v27, %v5710_v61  ;;  %v901_v9 = vld [vmem:[#allocation8 + $0xb40] sm:$0xff]  ;;  %v903_v10 = vld [vmem:[#allocation8 + $0xb50] sm:$0xff] }
 0x50e   :  { %3079 = vmatprep.subr.mxu1 %v1318_v18  ;;  %3150 = vmatprep.subr.mxu0 %v1320_v19  ;;  %v852_v13 = vld [vmem:[#allocation8 + $0x9b8] sm:$0xff]  ;;  %v849_v19 = vld [vmem:[#allocation8 + $0x9a0] sm:$0xff]  ;;  %v851_v21 = vld [vmem:[#allocation8 + $0x9b0] sm:$0xff] }
 0x50f   :  { %v5157_v40 = vpop.eup %5156  ;;  %3080 = vmatpush1.msra.mxu1 %v1317_v24  ;;  %3151 = vmatpush1.msra.mxu0 %v1319_v25  ;;  %v4646_v45 = vcombine.high %v4638_v41, %v4645_v37  ;;  %v798_v55 = vld [vmem:[#allocation8 + $0x808] sm:$0xff]  ;;  %v800_v22 = vld [vmem:[#allocation8 + $0x818] sm:$0xff]  ;;  %v797_v25 = vld [vmem:[#allocation8 + $0x800] sm:$0xff] }
 0x510   :  { %v5159_v36 = vpop.eup %5158  ;;  %v3789_v43 = vadd.f32 1.0, %v5157_v40  ;;  %3081 = vmatprep.subr.mxu1 %v1266_v28  ;;  %3152 = vmatprep.subr.mxu0 %v1268_v30  ;;  %v799_v27 = vld [vmem:[#allocation8 + $0x810] sm:$0xff]  ;;  %v746_v30 = vld [vmem:[#allocation8 + $0x668] sm:$0xff]  ;;  %v745_v37 = vld [vmem:[#allocation8 + $0x660] sm:$0xff] }
 0x511   :  { %v3791_v34 = vadd.f32 1.0, %v5159_v36  ;;  %3082 = vmatpush1.msra.mxu1 %v1265_v31  ;;  %3153 = vmatpush1.msra.mxu0 %v1267_v39  ;;  %v5161_v48 = vpop.eup %5160  ;;  %4921 = vst [vmem:[%s6221_s8 + $0x43] ss:$4 sm:$0xff] %v4646_v45  ;;  %v748_v31 = vld [vmem:[#allocation8 + $0x678] sm:$0xff]  ;;  %v695_v45 = vld [vmem:[#allocation8 + $0x4d0] sm:$0xff] }
 0x512   :  { %3083 = vmatprep.subr.mxu1 %v1214_v42  ;;  %3154 = vmatprep.subr.mxu0 %v1216_v35  ;;  %v5163_v51 = vpop.eup %5162  ;;  %5172 = vrcp.f32 %v3789_v43  ;;  %v3790_v15 = vadd.f32 1.0, %v5161_v48  ;;  %v747_v42 = vld [vmem:[#allocation8 + $0x670] sm:$0xff]  ;;  %v694_v43 = vld [vmem:[#allocation8 + $0x4c8] sm:$0xff]  ;;  %v644_v48 = vld [vmem:[#allocation8 + $0x338] sm:$0xff] }
 0x513   :  { %3084 = vmatpush1.msra.mxu1 %v1213_v44  ;;  %3155 = vmatpush1.msra.mxu0 %v1215_v33  ;;  %5174 = vrcp.f32 %v3791_v34  ;;  %v3792_v23 = vadd.f32 1.0, %v5163_v51  ;;  %v696_v44 = vld [vmem:[#allocation8 + $0x4d8] sm:$0xff]  ;;  %v693_v34 = vld [vmem:[#allocation8 + $0x4c0] sm:$0xff] }
 0x514   :  { %3085 = vmatprep.subr.mxu1 %v1162_v46  ;;  %3156 = vmatprep.subr.mxu0 %v1164_v47  ;;  %5176 = vrcp.f32 %v3790_v15  ;;  %v5165_v2 = vpop.eup %5164  ;;  %v642_v47 = vld [vmem:[#allocation8 + $0x328] sm:$0xff]  ;;  %v641_v51 = vld [vmem:[#allocation8 + $0x320] sm:$0xff]  ;;  %v643_v15 = vld [vmem:[#allocation8 + $0x330] sm:$0xff] }
 0x515   :  { %3086 = vmatpush1.msra.mxu1 %v1161_v32  ;;  %3157 = vmatpush1.msra.mxu0 %v1163_v29  ;;  %5178 = vrcp.f32 %v3792_v23  ;;  %v5167_v5 = vpop.eup %5166 }
 0x516   :  { %3087 = vmatprep.subr.mxu1 %v1110_v52  ;;  %3158 = vmatprep.subr.mxu0 %v1112_v26  ;;  %v5169_v8 = vpop.eup %5168  ;;  %v590_v52 = vld [vmem:[#allocation8 + $0x188] sm:$0xff]  ;;  %v592_v26 = vld [vmem:[#allocation8 + $0x198] sm:$0xff] }
 0x517   :  { %3088 = vmatpush1.msra.mxu1 %v1109_v53  ;;  %3159 = vmatpush1.msra.mxu0 %v1111_v54  ;;  %v5171_v11 = vpop.eup %5170  ;;  %v4075_v16 = vcombine.low %v5169_v8, %v5165_v2  ;;  %v589_v53 = vld [vmem:[#allocation8 + $0x180] sm:$0xff]  ;;  %v591_v54 = vld [vmem:[#allocation8 + $0x190] sm:$0xff] }
 0x518   :  { %3089 = vmatprep.subr.mxu1 %v1058_v56  ;;  %3160 = vmatprep.subr.mxu0 %v1060_v57  ;;  %v4076_v18 = vcombine.low %v5171_v11, %v5167_v5 }
 0x519   :  { %3090 = vmatpush1.msra.mxu1 %v1057_v38  ;;  %3161 = vmatpush1.msra.mxu0 %v1059_v59  ;;  %v4085_v40 = vrot.slane %v4075_v16, %v5710_v61 }
 0x51a   :  { %3091 = vmatprep.subr.mxu1 %v1006_v60  ;;  %3162 = vmatprep.subr.mxu0 %v1008_v62  ;;  %v4092_v41 = vrot.slane %v4076_v18, %v5710_v61 }
 0x51b   :  { %3092 = vmatpush1.msra.mxu1 %v1005_v20  ;;  %3163 = vmatpush1.msra.mxu0 %v1007_v63 }
 0x51c   :  { %3093 = vmatprep.subr.mxu1 %v954_v0  ;;  %3164 = vmatprep.subr.mxu0 %v956_v1  ;;  %v4107_v32 = vcombine.high %v4085_v40, %v4092_v41 }
 0x51d   :  { %3094 = vmatpush1.msra.mxu1 %v953_v3  ;;  %3165 = vmatpush1.msra.mxu0 %v955_v4 }
 0x51e   :  { %3095 = vmatprep.subr.mxu1 %v902_v6  ;;  %3166 = vmatprep.subr.mxu0 %v904_v7  ;;  %v4115_v56 = vrot.slane %v4107_v32, %v5710_v61 }
 0x51f   :  { %3096 = vmatpush1.msra.mxu1 %v901_v9  ;;  %3167 = vmatpush1.msra.mxu0 %v903_v10  ;;  %v5173_v24 = vpop.eup %5172 }
 0x520   :  { %3097 = vmatprep.subr.mxu1 %v850_v12  ;;  %3168 = vmatprep.subr.mxu0 %v852_v13  ;;  %v5175_v28 = vpop.eup %5174 }
 0x521   :  { %3098 = vmatpush1.msra.mxu1 %v849_v19  ;;  %3169 = vmatpush1.msra.mxu0 %v851_v21  ;;  %v5177_v39 = vpop.eup %5176  ;;  %v2291_v59 = vpop.f32.mrf.mxu1 }
 0x522   :  { %3099 = vmatprep.subr.mxu1 %v798_v55  ;;  %3170 = vmatprep.subr.mxu0 %v800_v22  ;;  %v5179_v35 = vpop.eup %5178  ;;  %v4077_v36 = vcombine.low %v5173_v24, %v5177_v39  ;;  %v2362_v60 = vpop.f32.mrf.mxu0  ;;  %v4877_v1 = vmul.f32 -1.442695, %v2291_v59 }
 0x523   :  { %3100 = vmatpush1.msra.mxu1 %v797_v25  ;;  %3171 = vmatpush1.msra.mxu0 %v799_v27  ;;  %v4078_v33 = vcombine.low %v5175_v28, %v5179_v35  ;;  %v2293_v62 = vpop.f32.mrf.mxu1  ;;  %v4879_v2 = vmul.f32 -1.442695, %v2362_v60  ;;  %v4370_v4 = vsub.f32 %v2362_v60, %v5721_v49 }
 0x524   :  { %3101 = vmatprep.subr.mxu1 %v746_v30  ;;  %3172 = vmatprep.subr.mxu0 %v748_v31  ;;  %v4099_v46 = vrot.slane %v4077_v36, %v5710_v61  ;;  %v2364_v20 = vpop.f32.mrf.mxu0  ;;  %v4878_v63 = vmul.f32 -1.442695, %v2293_v62  ;;  %v4369_v3 = vsub.f32 %v2293_v62, %v5721_v49  ;;  %v3418_v5 = vcombine.low %v2291_v59, %v2293_v62 }
 0x525   :  { %3102 = vmatpush1.msra.mxu1 %v745_v37  ;;  %3173 = vmatpush1.msra.mxu0 %v747_v42  ;;  %v4106_v29 = vrot.slane %v4078_v33, %v5710_v61  ;;  %v4880_v0 = vmul.f32 -1.442695, %v2364_v20  ;;  %v3419_v6 = vcombine.low %v2362_v60, %v2364_v20  ;;  %v4422_v12 = vmul.f32 %v4370_v4, %v5725_v50 }
 0x526   :  { %3103 = vmatprep.subr.mxu1 %v694_v43  ;;  %3174 = vmatprep.subr.mxu0 %v696_v44  ;;  %5180 = vpow2.f32 %v4878_v63  ;;  %v4421_v7 = vmul.f32 %v4369_v3, %v5725_v50  ;;  %v3428_v18 = vrot.slane %v3418_v5, %v5710_v61 }
 0x527   :  { %3104 = vmatpush1.msra.mxu1 %v693_v34  ;;  %3175 = vmatpush1.msra.mxu0 %v695_v45  ;;  %v4108_v23 = vcombine.high %v4099_v46, %v4106_v29  ;;  %5182 = vpow2.f32 %v4880_v0  ;;  %v3435_v19 = vrot.slane %v3419_v6, %v5710_v61 }
 0x528   :  { %3105 = vmatprep.subr.mxu1 %v642_v47  ;;  %3176 = vmatprep.subr.mxu0 %v644_v48  ;;  %5184 = vpow2.f32 %v4877_v1 }
 0x529   :  { %3106 = vmatpush1.msra.mxu1 %v641_v51  ;;  %3177 = vmatpush1.msra.mxu0 %v643_v15  ;;  %v4122_v57 = vrot.slane %v4108_v23, %v5710_v61  ;;  %5186 = vpow2.f32 %v4879_v2  ;;  %v3450_v41 = vcombine.low %v3428_v18, %v3435_v19 }
 0x52a   :  { %3107 = vmatprep.subr.mxu1 %v590_v52  ;;  %3178 = vmatprep.subr.mxu0 %v592_v26 }
 0x52b   :  { %3108 = vmatpush1.msra.mxu1 %v589_v53  ;;  %3141 = vmatprep.mubr.f32.mxu1 %v5365_v17  ;;  %v4123_v38 = vcombine.low %v4115_v56, %v4122_v57  ;;  %v3458_v26 = vrot.slane %v3450_v41, %v5710_v61 }
 0x52c   :  { %3179 = vmatpush1.msra.mxu0 %v591_v54  ;;  %3212 = vmatprep.mubr.f32.mxu0 %v5365_v17  ;;  %v4371_v17 = vsub.f32 %v2364_v20, %v5721_v49 }
 0x52d   :  { %3142 = vmatmul.mubr.f32.vlgmr.msra.gmra.mxu1 %v6004_v14  ;;  %3213 = vmatmul.mubr.f32.vlgmr.msra.gmra.mxu0 %v6004_v14  ;;  %4907 = vst [vmem:[%s6221_s8 + $0x41] ss:$4 sm:$0xff] %v4123_v38  ;;  %v4368_v14 = vsub.f32 %v2291_v59, %v5721_v49 }
 0x52e   :  { %v4423_v8 = vmul.f32 %v4371_v17, %v5725_v50 }
 0x52f   :  { %v4420_v11 = vmul.f32 %v4368_v14, %v5725_v50 }
 0x530   :  { %v4648_v24 = vcombine.low %v4422_v12, %v4423_v8 }
 0x531   :  { %v4647_v22 = vcombine.low %v4420_v11, %v4421_v7 }
 0x532   :  { %v4664_v45 = vrot.slane %v4648_v24, %v5710_v61 }
 0x533   :  { %v5181_v35 = vpop.eup %5180  ;;  %v4657_v34 = vrot.slane %v4647_v22, %v5710_v61 }
 0x534   :  { %v5183_v33 = vpop.eup %5182  ;;  %v3794_v15 = vadd.f32 1.0, %v5181_v35 }
 0x535   :  { %v5185_v48 = vpop.eup %5184  ;;  %v3796_v23 = vadd.f32 1.0, %v5183_v33  ;;  %v4679_v57 = vcombine.high %v4657_v34, %v4664_v45 }
 0x536   :  { %v5187_v51 = vpop.eup %5186  ;;  %v3793_v56 = vadd.f32 1.0, %v5185_v48 }
 0x537   :  { %v3795_v59 = vadd.f32 1.0, %v5187_v51  ;;  %v4687_v0 = vrot.slane %v4679_v57, %v5710_v61 }
 0x543   :  { %v2433_v9 = vpop.f32.mrf.mxu1  ;;  %v2504_v10 = vpop.f32.mrf.mxu0 }
 0x544   :  { %v4881_v13 = vmul.f32 -1.442695, %v2433_v9  ;;  %v4883_v16 = vmul.f32 -1.442695, %v2504_v10  ;;  %v4372_v25 = vsub.f32 %v2433_v9, %v5721_v49  ;;  %v4374_v27 = vsub.f32 %v2504_v10, %v5721_v49 }
 0x545   :  { %v2435_v21 = vpop.f32.mrf.mxu1  ;;  %v2506_v55 = vpop.f32.mrf.mxu0 }
 0x546   :  { %5188 = vpow2.f32 %v4881_v13  ;;  %v3420_v28 = vcombine.low %v2433_v9, %v2435_v21  ;;  %v4882_v30 = vmul.f32 -1.442695, %v2435_v21  ;;  %v4373_v31 = vsub.f32 %v2435_v21, %v5721_v49 }
 0x547   :  { %5190 = vpow2.f32 %v4883_v16  ;;  %v3421_v39 = vcombine.low %v2504_v10, %v2506_v55  ;;  %v4884_v40 = vmul.f32 -1.442695, %v2506_v55  ;;  %v4375_v42 = vsub.f32 %v2506_v55, %v5721_v49 }
 0x548   :  { %v3442_v37 = vrot.slane %v3420_v28, %v5710_v61  ;;  %5192 = vpow2.f32 %v4882_v30  ;;  %v4424_v36 = vmul.f32 %v4372_v25, %v5725_v50  ;;  %v4425_v43 = vmul.f32 %v4373_v31, %v5725_v50 }
 0x549   :  { %v3449_v44 = vrot.slane %v3421_v39, %v5710_v61  ;;  %5194 = vpow2.f32 %v4884_v40  ;;  %v4426_v46 = vmul.f32 %v4374_v27, %v5725_v50  ;;  %v4427_v47 = vmul.f32 %v4375_v42, %v5725_v50 }
 0x54a   :  { %v4649_v32 = vcombine.low %v4424_v36, %v4425_v43  ;;  %5196 = vrcp.f32 %v3794_v15 }
 0x54b   :  { %v3451_v29 = vcombine.low %v3442_v37, %v3449_v44  ;;  %v4650_v52 = vcombine.low %v4426_v46, %v4427_v47  ;;  %5198 = vrcp.f32 %v3796_v23 }
 0x54c   :  { %v4671_v53 = vrot.slane %v4649_v32, %v5710_v61  ;;  %5200 = vrcp.f32 %v3793_v56 }
 0x54d   :  { %v3465_v54 = vrot.slane %v3451_v29, %v5710_v61  ;;  %v4678_v38 = vrot.slane %v4650_v52, %v5710_v61  ;;  %5202 = vrcp.f32 %v3795_v59 }
 0x54f   :  { %v3466_v60 = vcombine.low %v3458_v26, %v3465_v54  ;;  %v4319_v62 = vcombine.high %v3458_v26, %v3465_v54  ;;  %v4680_v20 = vcombine.high %v4671_v53, %v4678_v38 }
 0x551   :  { %4849 = vst [vmem:[%s6221_s8 + $0x60] ss:$4 sm:$0xff] %v3466_v60  ;;  %4915 = vst [vmem:[%s6221_s8 + $0x62] ss:$4 sm:$0xff] %v4319_v62  ;;  %v4694_v1 = vrot.slane %v4680_v20, %v5710_v61 }
 0x553   :  { %v5189_v63 = vpop.eup %5188  ;;  %v4695_v14 = vcombine.high %v4687_v0, %v4694_v1 }
 0x554   :  { %v5191_v2 = vpop.eup %5190  ;;  %v3797_v3 = vadd.f32 1.0, %v5189_v63 }
 0x555   :  { %v3799_v17 = vadd.f32 1.0, %v5191_v2  ;;  %v5193_v4 = vpop.eup %5192  ;;  %4922 = vst [vmem:[%s6221_s8 + $0x63] ss:$4 sm:$0xff] %v4695_v14 }
 0x556   :  { %v5195_v5 = vpop.eup %5194  ;;  %5204 = vrcp.f32 %v3797_v3  ;;  %v3798_v6 = vadd.f32 1.0, %v5193_v4 }
 0x557   :  { %5206 = vrcp.f32 %v3799_v17  ;;  %v3800_v7 = vadd.f32 1.0, %v5195_v5  ;;  %v5197_v8 = vpop.eup %5196 }
 0x558   :  { %5208 = vrcp.f32 %v3798_v6  ;;  %v5199_v9 = vpop.eup %5198 }
 0x559   :  { %5210 = vrcp.f32 %v3800_v7  ;;  %v5201_v10 = vpop.eup %5200 }
 0x55a   :  { %v5203_v11 = vpop.eup %5202  ;;  %v4124_v12 = vcombine.low %v5201_v10, %v5197_v8 }
 0x55b   :  { %v4125_v13 = vcombine.low %v5203_v11, %v5199_v9 }
 0x55c   :  { %v4134_v21 = vrot.slane %v4124_v12, %v5710_v61 }
 0x55d   :  { %v4141_v55 = vrot.slane %v4125_v13, %v5710_v61 }
 0x55f   :  { %v4156_v28 = vcombine.high %v4134_v21, %v4141_v55 }
 0x561   :  { %v4164_v39 = vrot.slane %v4156_v28, %v5710_v61 }
 0x563   :  { %v5205_v16 = vpop.eup %5204 }
 0x564   :  { %v5207_v18 = vpop.eup %5206 }
 0x565   :  { %v5209_v19 = vpop.eup %5208  ;;  %v2575_v37 = vpop.f32.mrf.mxu1 }
 0x566   :  { %v5211_v22 = vpop.eup %5210  ;;  %v4126_v24 = vcombine.low %v5205_v16, %v5209_v19  ;;  %v2646_v42 = vpop.f32.mrf.mxu0  ;;  %v4885_v33 = vmul.f32 -1.442695, %v2575_v37  ;;  %v4376_v47 = vsub.f32 %v2575_v37, %v5721_v49 }
 0x567   :  { %v4127_v25 = vcombine.low %v5207_v18, %v5211_v22  ;;  %v2577_v35 = vpop.f32.mrf.mxu1  ;;  %v4887_v34 = vmul.f32 -1.442695, %v2646_v42  ;;  %v4378_v48 = vsub.f32 %v2646_v42, %v5721_v49 }
 0x568   :  { %v4148_v27 = vrot.slane %v4126_v24, %v5710_v61  ;;  %v2648_v36 = vpop.f32.mrf.mxu0  ;;  %v4886_v43 = vmul.f32 -1.442695, %v2577_v35  ;;  %v4377_v45 = vsub.f32 %v2577_v35, %v5721_v49  ;;  %v3467_v32 = vcombine.low %v2575_v37, %v2577_v35 }
 0x569   :  { %v4155_v30 = vrot.slane %v4127_v25, %v5710_v61  ;;  %v4888_v44 = vmul.f32 -1.442695, %v2648_v36  ;;  %v4379_v46 = vsub.f32 %v2648_v36, %v5721_v49  ;;  %v3468_v29 = vcombine.low %v2646_v42, %v2648_v36 }
 0x56a   :  { %5212 = vpow2.f32 %v4886_v43  ;;  %v4429_v51 = vmul.f32 %v4377_v45, %v5725_v50  ;;  %v4428_v23 = vmul.f32 %v4376_v47, %v5725_v50  ;;  %v4430_v53 = vmul.f32 %v4378_v48, %v5725_v50 }
 0x56b   :  { %v4157_v31 = vcombine.high %v4148_v27, %v4155_v30  ;;  %5214 = vpow2.f32 %v4888_v44  ;;  %v4431_v15 = vmul.f32 %v4379_v46, %v5725_v50  ;;  %v3477_v57 = vrot.slane %v3467_v32, %v5710_v61 }
 0x56c   :  { %5216 = vpow2.f32 %v4885_v33  ;;  %v3484_v38 = vrot.slane %v3468_v29, %v5710_v61  ;;  %v4696_v62 = vcombine.low %v4428_v23, %v4429_v51 }
 0x56d   :  { %v4171_v40 = vrot.slane %v4157_v31, %v5710_v61  ;;  %5218 = vpow2.f32 %v4887_v34  ;;  %v4697_v20 = vcombine.low %v4430_v53, %v4431_v15 }
 0x56e   :  { %v3499_v4 = vcombine.low %v3477_v57, %v3484_v38  ;;  %v4706_v12 = vrot.slane %v4696_v62, %v5710_v61 }
 0x56f   :  { %v4172_v41 = vcombine.low %v4164_v39, %v4171_v40  ;;  %v4713_v13 = vrot.slane %v4697_v20, %v5710_v61 }
 0x570   :  { %v3507_v27 = vrot.slane %v3499_v4, %v5710_v61 }
 0x571   :  { %4908 = vst [vmem:[%s6221_s8 + $0x61] ss:$4 sm:$0xff] %v4172_v41  ;;  %v4728_v40 = vcombine.high %v4706_v12, %v4713_v13 }
 0x573   :  { %v4736_v44 = vrot.slane %v4728_v40, %v5710_v61 }
 0x577   :  { %v5213_v7 = vpop.eup %5212 }
 0x578   :  { %v5215_v11 = vpop.eup %5214  ;;  %v3802_v24 = vadd.f32 1.0, %v5213_v7 }
 0x579   :  { %v5217_v19 = vpop.eup %5216  ;;  %v3804_v28 = vadd.f32 1.0, %v5215_v11 }
 0x57a   :  { %v5219_v22 = vpop.eup %5218  ;;  %v3801_v39 = vadd.f32 1.0, %v5217_v19 }
 0x57b   :  { %v3803_v37 = vadd.f32 1.0, %v5219_v22 }
 0x587   :  { %v2717_v52 = vpop.f32.mrf.mxu1  ;;  %v2788_v26 = vpop.f32.mrf.mxu0 }
 0x588   :  { %v4889_v54 = vmul.f32 -1.442695, %v2717_v52  ;;  %v4891_v56 = vmul.f32 -1.442695, %v2788_v26  ;;  %v4380_v63 = vsub.f32 %v2717_v52, %v5721_v49  ;;  %v4382_v0 = vsub.f32 %v2788_v26, %v5721_v49 }
 0x589   :  { %v2719_v59 = vpop.f32.mrf.mxu1  ;;  %v2790_v60 = vpop.f32.mrf.mxu0 }
 0x58a   :  { %5220 = vpow2.f32 %v4889_v54  ;;  %v3469_v1 = vcombine.low %v2717_v52, %v2719_v59  ;;  %v4890_v2 = vmul.f32 -1.442695, %v2719_v59  ;;  %v4381_v3 = vsub.f32 %v2719_v59, %v5721_v49 }
 0x58b   :  { %5222 = vpow2.f32 %v4891_v56  ;;  %v3470_v17 = vcombine.low %v2788_v26, %v2790_v60  ;;  %v4892_v14 = vmul.f32 -1.442695, %v2790_v60  ;;  %v4383_v6 = vsub.f32 %v2790_v60, %v5721_v49 }
 0x58c   :  { %v3491_v5 = vrot.slane %v3469_v1, %v5710_v61  ;;  %5224 = vpow2.f32 %v4890_v2  ;;  %v4432_v8 = vmul.f32 %v4380_v63, %v5725_v50  ;;  %v4433_v9 = vmul.f32 %v4381_v3, %v5725_v50 }
 0x58d   :  { %v3498_v10 = vrot.slane %v3470_v17, %v5710_v61  ;;  %5226 = vpow2.f32 %v4892_v14  ;;  %v4434_v16 = vmul.f32 %v4382_v0, %v5725_v50  ;;  %v4435_v18 = vmul.f32 %v4383_v6, %v5725_v50 }
 0x58e   :  { %v4698_v21 = vcombine.low %v4432_v8, %v4433_v9  ;;  %5228 = vrcp.f32 %v3802_v24 }
 0x58f   :  { %v3500_v55 = vcombine.low %v3491_v5, %v3498_v10  ;;  %v4699_v25 = vcombine.low %v4434_v16, %v4435_v18  ;;  %5230 = vrcp.f32 %v3804_v28 }
 0x590   :  { %v4720_v30 = vrot.slane %v4698_v21, %v5710_v61  ;;  %5232 = vrcp.f32 %v3801_v39 }
 0x591   :  { %v3514_v31 = vrot.slane %v3500_v55, %v5710_v61  ;;  %v4727_v41 = vrot.slane %v4699_v25, %v5710_v61  ;;  %5234 = vrcp.f32 %v3803_v37 }
 0x593   :  { %v3515_v42 = vcombine.low %v3507_v27, %v3514_v31  ;;  %v4320_v35 = vcombine.high %v3507_v27, %v3514_v31  ;;  %v4729_v36 = vcombine.high %v4720_v30, %v4727_v41 }
 0x595   :  { %4850 = vst [vmem:[%s6221_s8 + $0x80] ss:$4 sm:$0xff] %v3515_v42  ;;  %4916 = vst [vmem:[%s6221_s8 + $0x82] ss:$4 sm:$0xff] %v4320_v35  ;;  %v4743_v33 = vrot.slane %v4729_v36, %v5710_v61 }
 0x597   :  { %v5221_v43 = vpop.eup %5220  ;;  %v4744_v47 = vcombine.high %v4736_v44, %v4743_v33 }
 0x598   :  { %v5223_v34 = vpop.eup %5222  ;;  %v3805_v45 = vadd.f32 1.0, %v5221_v43 }
 0x599   :  { %v3807_v46 = vadd.f32 1.0, %v5223_v34  ;;  %v5225_v48 = vpop.eup %5224  ;;  %4923 = vst [vmem:[%s6221_s8 + $0x83] ss:$4 sm:$0xff] %v4744_v47 }
 0x59a   :  { %v5227_v32 = vpop.eup %5226  ;;  %5236 = vrcp.f32 %v3805_v45  ;;  %v3806_v29 = vadd.f32 1.0, %v5225_v48 }
 0x59b   :  { %5238 = vrcp.f32 %v3807_v46  ;;  %v3808_v51 = vadd.f32 1.0, %v5227_v32  ;;  %v5229_v15 = vpop.eup %5228 }
 0x59c   :  { %5240 = vrcp.f32 %v3806_v29  ;;  %v5231_v52 = vpop.eup %5230 }
 0x59d   :  { %5242 = vrcp.f32 %v3808_v51  ;;  %v5233_v26 = vpop.eup %5232 }
 0x59e   :  { %v5235_v23 = vpop.eup %5234  ;;  %v4173_v53 = vcombine.low %v5233_v26, %v5229_v15 }
 0x59f   :  { %v4174_v54 = vcombine.low %v5235_v23, %v5231_v52 }
 0x5a0   :  { %v4183_v59 = vrot.slane %v4173_v53, %v5710_v61 }
 0x5a1   :  { %v4190_v60 = vrot.slane %v4174_v54, %v5710_v61 }
 0x5a3   :  { %v4205_v1 = vcombine.high %v4183_v59, %v4190_v60 }
 0x5a5   :  { %v4213_v17 = vrot.slane %v4205_v1, %v5710_v61 }
 0x5a7   :  { %v5237_v56 = vpop.eup %5236 }
 0x5a8   :  { %v5239_v57 = vpop.eup %5238 }
 0x5a9   :  { %v5241_v38 = vpop.eup %5240  ;;  %v2859_v5 = vpop.f32.mrf.mxu1 }
 0x5aa   :  { %v5243_v62 = vpop.eup %5242  ;;  %v4175_v20 = vcombine.low %v5237_v56, %v5241_v38  ;;  %v2930_v6 = vpop.f32.mrf.mxu0  ;;  %v4893_v11 = vmul.f32 -1.442695, %v2859_v5  ;;  %v4384_v18 = vsub.f32 %v2859_v5, %v5721_v49 }
 0x5ab   :  { %v4176_v63 = vcombine.low %v5239_v57, %v5243_v62  ;;  %v2861_v7 = vpop.f32.mrf.mxu1  ;;  %v4895_v12 = vmul.f32 -1.442695, %v2930_v6  ;;  %v4386_v19 = vsub.f32 %v2930_v6, %v5721_v49 }
 0x5ac   :  { %v4197_v0 = vrot.slane %v4175_v20, %v5710_v61  ;;  %v2932_v8 = vpop.f32.mrf.mxu0  ;;  %v4894_v9 = vmul.f32 -1.442695, %v2861_v7  ;;  %v4385_v13 = vsub.f32 %v2861_v7, %v5721_v49  ;;  %v3516_v21 = vcombine.low %v2859_v5, %v2861_v7 }
 0x5ad   :  { %v4204_v2 = vrot.slane %v4176_v63, %v5710_v61  ;;  %v4896_v10 = vmul.f32 -1.442695, %v2932_v8  ;;  %v4387_v16 = vsub.f32 %v2932_v8, %v5721_v49  ;;  %v3517_v55 = vcombine.low %v2930_v6, %v2932_v8 }
 0x5ae   :  { %5244 = vpow2.f32 %v4894_v9  ;;  %v4437_v22 = vmul.f32 %v4385_v13, %v5725_v50  ;;  %v4436_v25 = vmul.f32 %v4384_v18, %v5725_v50  ;;  %v4438_v27 = vmul.f32 %v4386_v19, %v5725_v50 }
 0x5af   :  { %v4206_v3 = vcombine.high %v4197_v0, %v4204_v2  ;;  %5246 = vpow2.f32 %v4896_v10  ;;  %v4439_v24 = vmul.f32 %v4387_v16, %v5725_v50  ;;  %v3526_v31 = vrot.slane %v3516_v21, %v5710_v61 }
 0x5b0   :  { %5248 = vpow2.f32 %v4893_v11  ;;  %v3533_v39 = vrot.slane %v3517_v55, %v5710_v61  ;;  %v4745_v37 = vcombine.low %v4436_v25, %v4437_v22 }
 0x5b1   :  { %v4220_v14 = vrot.slane %v4206_v3, %v5710_v61  ;;  %5250 = vpow2.f32 %v4895_v12  ;;  %v4746_v36 = vcombine.low %v4438_v27, %v4439_v24 }
 0x5b2   :  { %v3548_v46 = vcombine.low %v3526_v31, %v3533_v39  ;;  %v4755_v51 = vrot.slane %v4745_v37, %v5710_v61 }
 0x5b3   :  { %v4221_v4 = vcombine.low %v4213_v17, %v4220_v14  ;;  %v4762_v38 = vrot.slane %v4746_v36, %v5710_v61 }
 0x5b4   :  { %v3556_v3 = vrot.slane %v3548_v46, %v5710_v61 }
 0x5b5   :  { %4909 = vst [vmem:[%s6221_s8 + $0x81] ss:$4 sm:$0xff] %v4221_v4  ;;  %v4777_v4 = vcombine.high %v4755_v51, %v4762_v38 }
 0x5b7   :  { %v4785_v10 = vrot.slane %v4777_v4, %v5710_v61 }
 0x5bb   :  { %v5245_v45 = vpop.eup %5244 }
 0x5bc   :  { %v5247_v29 = vpop.eup %5246  ;;  %v3810_v57 = vadd.f32 1.0, %v5245_v45 }
 0x5bd   :  { %v5249_v26 = vpop.eup %5248  ;;  %v3812_v62 = vadd.f32 1.0, %v5247_v29 }
 0x5be   :  { %v5251_v56 = vpop.eup %5250  ;;  %v3809_v0 = vadd.f32 1.0, %v5249_v26 }
 0x5bf   :  { %v3811_v2 = vadd.f32 1.0, %v5251_v56 }
 0x5cb   :  { %v3001_v28 = vpop.f32.mrf.mxu1  ;;  %v3072_v30 = vpop.f32.mrf.mxu0 }
 0x5cc   :  { %v4897_v40 = vmul.f32 -1.442695, %v3001_v28  ;;  %v4899_v41 = vmul.f32 -1.442695, %v3072_v30  ;;  %v4388_v43 = vsub.f32 %v3001_v28, %v5721_v49  ;;  %v4390_v44 = vsub.f32 %v3072_v30, %v5721_v49 }
 0x5cd   :  { %v3003_v42 = vpop.f32.mrf.mxu1  ;;  %v3074_v35 = vpop.f32.mrf.mxu0 }
 0x5ce   :  { %5252 = vpow2.f32 %v4897_v40  ;;  %v3518_v33 = vcombine.low %v3001_v28, %v3003_v42  ;;  %v4898_v34 = vmul.f32 -1.442695, %v3003_v42  ;;  %v4389_v47 = vsub.f32 %v3003_v42, %v5721_v49 }
 0x5cf   :  { %5254 = vpow2.f32 %v4899_v41  ;;  %v3519_v48 = vcombine.low %v3072_v30, %v3074_v35  ;;  %v4900_v32 = vmul.f32 -1.442695, %v3074_v35  ;;  %v4391_v52 = vsub.f32 %v3074_v35, %v5721_v49 }
 0x5d0   :  { %v3540_v15 = vrot.slane %v3518_v33, %v5710_v61  ;;  %5256 = vpow2.f32 %v4898_v34  ;;  %v4440_v23 = vmul.f32 %v4388_v43, %v5725_v50  ;;  %v4441_v53 = vmul.f32 %v4389_v47, %v5725_v50 }
 0x5d1   :  { %v3547_v54 = vrot.slane %v3519_v48, %v5710_v61  ;;  %5258 = vpow2.f32 %v4900_v32  ;;  %v4442_v59 = vmul.f32 %v4390_v44, %v5725_v50  ;;  %v4443_v60 = vmul.f32 %v4391_v52, %v5725_v50 }
 0x5d2   :  { %v4747_v20 = vcombine.low %v4440_v23, %v4441_v53  ;;  %5260 = vrcp.f32 %v3810_v57 }
 0x5d3   :  { %v3549_v63 = vcombine.low %v3540_v15, %v3547_v54  ;;  %v4748_v1 = vcombine.low %v4442_v59, %v4443_v60  ;;  %5262 = vrcp.f32 %v3812_v62 }
 0x5d4   :  { %v4769_v17 = vrot.slane %v4747_v20, %v5710_v61  ;;  %5264 = vrcp.f32 %v3809_v0 }
 0x5d5   :  { %v3563_v14 = vrot.slane %v3549_v63, %v5710_v61  ;;  %v4776_v5 = vrot.slane %v4748_v1, %v5710_v61  ;;  %5266 = vrcp.f32 %v3811_v2 }
 0x5d7   :  { %v3564_v6 = vcombine.low %v3556_v3, %v3563_v14  ;;  %v4321_v7 = vcombine.high %v3556_v3, %v3563_v14  ;;  %v4778_v8 = vcombine.high %v4769_v17, %v4776_v5 }
 0x5d9   :  { %4851 = vst [vmem:[%s6221_s8 + $0xa0] ss:$4 sm:$0xff] %v3564_v6  ;;  %4917 = vst [vmem:[%s6221_s8 + $0xa2] ss:$4 sm:$0xff] %v4321_v7  ;;  %v4792_v11 = vrot.slane %v4778_v8, %v5710_v61 }
 0x5db   :  { %v5253_v9 = vpop.eup %5252  ;;  %v4793_v18 = vcombine.high %v4785_v10, %v4792_v11 }
 0x5dc   :  { %v5255_v12 = vpop.eup %5254  ;;  %v3813_v13 = vadd.f32 1.0, %v5253_v9 }
 0x5dd   :  { %v3815_v16 = vadd.f32 1.0, %v5255_v12  ;;  %v5257_v19 = vpop.eup %5256  ;;  %4924 = vst [vmem:[%s6221_s8 + $0xa3] ss:$4 sm:$0xff] %v4793_v18 }
 0x5de   :  { %v5259_v21 = vpop.eup %5258  ;;  %5268 = vrcp.f32 %v3813_v13  ;;  %v3814_v55 = vadd.f32 1.0, %v5257_v19 }
 0x5df   :  { %5270 = vrcp.f32 %v3815_v16  ;;  %v3816_v22 = vadd.f32 1.0, %v5259_v21  ;;  %v5261_v24 = vpop.eup %5260 }
 0x5e0   :  { %5272 = vrcp.f32 %v3814_v55  ;;  %v5263_v25 = vpop.eup %5262 }
 0x5e1   :  { %5274 = vrcp.f32 %v3816_v22  ;;  %v5265_v27 = vpop.eup %5264 }
 0x5e2   :  { %v5267_v28 = vpop.eup %5266  ;;  %v4222_v30 = vcombine.low %v5265_v27, %v5261_v24 }
 0x5e3   :  { %v4223_v31 = vcombine.low %v5267_v28, %v5263_v25 }
 0x5e4   :  { %v4232_v40 = vrot.slane %v4222_v30, %v5710_v61 }
 0x5e5   :  { %v4239_v41 = vrot.slane %v4223_v31, %v5710_v61 }
 0x5e7   :  { %v4254_v48 = vcombine.high %v4232_v40, %v4239_v41 }
 0x5e9   :  { %v4262_v0 = vrot.slane %v4254_v48, %v5710_v61 }
 0x5eb   :  { %v5269_v39 = vpop.eup %5268 }
 0x5ec   :  { %v5271_v37 = vpop.eup %5270 }
 0x5ed   :  { %v3143_v42 = vpop.f32.mrf.mxu1  ;;  %v3214_v35 = vpop.f32.mrf.mxu0 }
 0x5ee   :  { %v5273_v36 = vpop.eup %5272  ;;  %v4901_v43 = vmul.f32 -1.442695, %v3143_v42  ;;  %v4903_v44 = vmul.f32 -1.442695, %v3214_v35  ;;  %v4392_v45 = vsub.f32 %v3143_v42, %v5721_v49  ;;  %v4394_v29 = vsub.f32 %v3214_v35, %v5721_v49 }
 0x5ef   :  { %v5275_v33 = vpop.eup %5274  ;;  %v4224_v34 = vcombine.low %v5269_v39, %v5273_v36  ;;  %v3145_v46 = vpop.f32.mrf.mxu1 }
 0x5f0   :  { %v3216_v47 = vpop.f32.mrf.mxu0  ;;  %v4225_v32 = vcombine.low %v5271_v37, %v5275_v33  ;;  %5276 = vpow2.f32 %v4901_v43  ;;  %v3565_v15 = vcombine.low %v3143_v42, %v3145_v46  ;;  %v4902_v52 = vmul.f32 -1.442695, %v3145_v46 }
 0x5f1   :  { %v4246_v51 = vrot.slane %v4224_v34, %v5710_v61  ;;  %5278 = vpow2.f32 %v4903_v44  ;;  %v4393_v23 = vsub.f32 %v3145_v46, %v5721_v49  ;;  %v3566_v53 = vcombine.low %v3214_v35, %v3216_v47 }
 0x5f2   :  { %v4253_v26 = vrot.slane %v4225_v32, %v5710_v61  ;;  %v4904_v54 = vmul.f32 -1.442695, %v3216_v47  ;;  %v4444_v56 = vmul.f32 %v4392_v45, %v5725_v50  ;;  %v3573_v57 = vrot.slane %v3565_v15, %v5710_v61 }
 0x5f3   :  { %5280 = vpow2.f32 %v4902_v52  ;;  %v4395_v38 = vsub.f32 %v3216_v47, %v5721_v49  ;;  %v4445_v60 = vmul.f32 %v4393_v23, %v5725_v50  ;;  %v3580_v62 = vrot.slane %v3566_v53, %v5710_v61 }
 0x5f4   :  { %v4255_v59 = vcombine.high %v4246_v51, %v4253_v26  ;;  %5282 = vpow2.f32 %v4904_v54  ;;  %v4446_v20 = vmul.f32 %v4394_v29, %v5725_v50 }
 0x5f5   :  { %v4447_v63 = vmul.f32 %v4395_v38, %v5725_v50  ;;  %v4794_v2 = vcombine.low %v4444_v56, %v4445_v60  ;;  %v3581_v3 = vcombine.low %v3573_v57, %v3580_v62 }
 0x5f6   :  { %v4269_v1 = vrot.slane %v4255_v59, %v5710_v61 }
 0x5f7   :  { %v4795_v49 = vcombine.low %v4446_v20, %v4447_v63  ;;  %v4802_v4 = vrot.slane %v4794_v2, %v5710_v61  ;;  %v3588_v5 = vrot.slane %v3581_v3, %v5710_v61 }
 0x5f8   :  { %v4270_v14 = vcombine.low %v4262_v0, %v4269_v1 }
 0x5f9   :  { %v4809_v6 = vrot.slane %v4795_v49, %v5710_v61  ;;  %4852 = vst.msk [vmem:[%s6221_s8 + $0xc0] ss:$4 sm:$0xf] %vm6179_vm1, %v3588_v5  ;;  %v4322_v58 = vcombine.high %v3588_v5, %v3588_v5 }
 0x5fa   :  { %4910 = vst [vmem:[%s6221_s8 + $0xa1] ss:$4 sm:$0xff] %v4270_v14 }
 0x5fb   :  { %v4810_v50 = vcombine.high %v4802_v4, %v4809_v6  ;;  %4918 = vst.msk [vmem:[%s6221_s8 + $0xc2] ss:$4 sm:$0xf] %vm6179_vm1, %v4322_v58 }
 0x5fd   :  { %v5277_v7 = vpop.eup %5276  ;;  %v4817_v8 = vrot.slane %v4810_v50, %v5710_v61 }
 0x5fe   :  { %v5279_v9 = vpop.eup %5278  ;;  %v3817_v10 = vadd.f32 1.0, %v5277_v7 }
 0x5ff   :  { %v3819_v11 = vadd.f32 1.0, %v5279_v9  ;;  %v4818_v12 = vcombine.high %v4817_v8, %v4817_v8 }
 0x600   :  { %v5281_v13 = vpop.eup %5280  ;;  %5284 = vrcp.f32 %v3817_v10 }
 0x601   :  { %v5283_v16 = vpop.eup %5282  ;;  %v3818_v18 = vadd.f32 1.0, %v5281_v13  ;;  %4925 = vst.msk [vmem:[%s6221_s8 + $0xc3] ss:$4 sm:$0xf] %vm6179_vm1, %v4818_v12  ;;  %5286 = vrcp.f32 %v3819_v11 }
 0x602   :  { %v3820_v19 = vadd.f32 1.0, %v5283_v16 }
 0x603   :  { %5288 = vrcp.f32 %v3818_v18 }
 0x604   :  { %5290 = vrcp.f32 %v3820_v19 }
 0x60d   :  { %v5285_v21 = vpop.eup %5284 }
 0x60e   :  { %v5287_v55 = vpop.eup %5286 }
 0x610   :  { %v5289_v22 = vpop.eup %5288 }
 0x611   :  { %v5291_v24 = vpop.eup %5290  ;;  %v4271_v25 = vcombine.low %v5285_v21, %v5289_v22 }
 0x612   :  { %v4272_v27 = vcombine.low %v5287_v55, %v5291_v24 }
 0x613   :  { %v4279_v28 = vrot.slane %v4271_v25, %v5710_v61 }
 0x614   :  { %v4286_v30 = vrot.slane %v4272_v27, %v5710_v61 }
 0x616   :  { %v4287_v31 = vcombine.high %v4279_v28, %v4286_v30 }
 0x618   :  { %v4294_v39 = vrot.slane %v4287_v31, %v5710_v61 }
 0x61a   :  { %4911 = vst.msk [vmem:[%s6221_s8 + $0xc1] ss:$4 sm:$0xf] %vm6179_vm1, %v4294_v39 }
 0x61b   :  { %4844 = vsyncpa [#allocation5], 1 }
 0x61c   :  { %4845 = vsyncpa [#allocation7], 1 }

</bundles_post_ra>
